<compile_context>
chip_gen: v5e
topology: v5e:2x2
jax: 0.10.0
libtpu: 0.0.40
codegen_flags: <defaults>
</compile_context>

<pallas_src>
import jax
import jax.numpy as jnp
from jax import lax
from jax.experimental import pallas as pl
from jax.experimental.pallas import tpu as pltpu


def _make_lka_kernel(H, W, C):
    """One grid step = one batch element. All convs + gating fused in-kernel."""
    L = W * C              # lane width of the un-padded image rows
    PW1 = (W + 18) * C     # lane width of the conv_spatial padded buffer

    def kernel(x_ref, w0_ref, b0_ref, ws_ref, bs_ref, w1_ref, b1_ref,
               o_ref, pad1):
        # x_ref : (H+4, (W+4)*C)  input zero-padded by 2, (W,C) -> lanes
        # o_ref : (H, L)
        # pad1  : (H+18, PW1)     scratch, conv0 output zero-padded by 9

        # Hoist all weight / bias loads out of the tap loops.
        w0 = w0_ref[...]            # (25, L)
        ws = ws_ref[...]            # (49, L)
        b0 = b0_ref[...]            # (1, L)
        bs = bs_ref[...]            # (1, L)
        b1 = b1_ref[...]            # (1, L)

        # ---- conv0: depthwise 5x5, padding=2 (input pre-padded in wrapper) --
        # Bias folded into the accumulator init.
        acc0 = jnp.broadcast_to(b0, (H, L)).astype(jnp.float32)
        for i in range(5):
            for j in range(5):
                k = i * 5 + j
                acc0 = acc0 + x_ref[i:i + H, j * C:j * C + L] * w0[k:k + 1, :]

        # ---- conv_spatial: depthwise 7x7, dilation=3, padding=9 -------------
        # Full zero + interior store every step: cheap in the lane-dense layout
        # (~15 vector stores) and stays correct when the batch axis is sharded
        # across TensorCores ("parallel"), where program_id==0 never runs on
        # the second core.
        pad1[...] = jnp.zeros((H + 18, PW1), jnp.float32)
        pad1[9:9 + H, 9 * C:9 * C + L] = acc0
        acc1 = jnp.broadcast_to(bs, (H, L)).astype(jnp.float32)
        for i in range(7):
            for j in range(7):
                k = i * 7 + j
                acc1 = acc1 + (pad1[3 * i:3 * i + H, 3 * j * C:3 * j * C + L]
                               * ws[k:k + 1, :])

        # ---- conv1: 1x1 pointwise as block-diagonal matmul on the MXU -------
        # w1_ref = kron(I_W, w1^T): lane-dense K = W*C contraction, no reshape.
        a2 = jnp.dot(acc1, w1_ref[...],
                     preferred_element_type=jnp.float32) + b1

        # ---- gating: u * attn ------------------------------------------------
        u = x_ref[2:2 + H, 2 * C:2 * C + L]
        o_ref[...] = u * a2

    return kernel


def lka_pallas(x_nchw, params):
    """x_nchw: (N, C, H, W). params: conv weights/biases in PyTorch layouts."""
    N, C, H, W = x_nchw.shape
    L = W * C

    # NHWC, zero-pad spatially by 2 for conv0, flatten (W, C) onto lanes.
    x_nhwc = jnp.transpose(x_nchw, (0, 2, 3, 1)).astype(jnp.float32)
    xp = jnp.pad(x_nhwc, ((0, 0), (2, 2), (2, 2), (0, 0)))
    xp = xp.reshape(N, H + 4, (W + 4) * C)

    w0, b0, ws, bs, w1, b1 = params
    # Depthwise tap weights: (C, 1, kh, kw) -> (kh*kw, C), tiled W times along
    # lanes so weight[k, w*C + c] == weight_torch[c, 0, i, j] for k = i*kw + j.
    w0_flat = jnp.tile(jnp.transpose(w0[:, 0], (1, 2, 0)).reshape(25, C),
                       (1, W)).astype(jnp.float32)
    ws_flat = jnp.tile(jnp.transpose(ws[:, 0], (1, 2, 0)).reshape(49, C),
                       (1, W)).astype(jnp.float32)
    b0_flat = jnp.tile(b0.astype(jnp.float32), W).reshape(1, L)
    bs_flat = jnp.tile(bs.astype(jnp.float32), W).reshape(1, L)
    b1_flat = jnp.tile(b1.astype(jnp.float32), W).reshape(1, L)
    # 1x1 conv weight (Cout, Cin, 1, 1) -> block-diagonal (W*C, W*C) operating
    # directly on the flattened lane layout.
    w1_mat = jnp.transpose(w1[:, :, 0, 0], (1, 0)).astype(jnp.float32)  # (Cin, Cout)
    w1_big = jnp.kron(jnp.eye(W, dtype=jnp.float32), w1_mat)            # (L, L)

    kernel = _make_lka_kernel(H, W, C)
    out_flat = pl.pallas_call(
        kernel,
        out_shape=jax.ShapeDtypeStruct((N, H, L), jnp.float32),
        grid_spec=pltpu.PrefetchScalarGridSpec(
            num_scalar_prefetch=0,
            grid=(N,),
            in_specs=[
                pl.BlockSpec((None, H + 4, (W + 4) * C), lambda n: (n, 0, 0)),
                pl.BlockSpec((25, L), lambda n: (0, 0)),
                pl.BlockSpec((1, L), lambda n: (0, 0)),
                pl.BlockSpec((49, L), lambda n: (0, 0)),
                pl.BlockSpec((1, L), lambda n: (0, 0)),
                pl.BlockSpec((L, L), lambda n: (0, 0)),
                pl.BlockSpec((1, L), lambda n: (0, 0)),
            ],
            out_specs=pl.BlockSpec((None, H, L), lambda n: (n, 0, 0)),
            scratch_shapes=[
                pltpu.VMEM((H + 18, (W + 18) * C), jnp.float32),  # conv_spatial pad
            ],
        ),
        compiler_params=pltpu.CompilerParams(
            dimension_semantics=("parallel",)),   # batch elems are independent
    )(xp, w0_flat, b0_flat, ws_flat, bs_flat, w1_big, b1_flat)

    out = out_flat.reshape(N, H, W, C)
    return jnp.transpose(out, (0, 3, 1, 2))  # back to NCHW


def _reference(x, params):
    """Pure-JAX (XLA conv) reference matching the PyTorch module semantics."""
    w0, b0, ws, bs, w1, b1 = params
    C = x.shape[1]
    dn = ('NCHW', 'OIHW', 'NCHW')
    a = lax.conv_general_dilated(x, w0, (1, 1), [(2, 2), (2, 2)],
                                 feature_group_count=C, dimension_numbers=dn)
    a = a + b0[None, :, None, None]
    a = lax.conv_general_dilated(a, ws, (1, 1), [(9, 9), (9, 9)],
                                 rhs_dilation=(3, 3),
                                 feature_group_count=C, dimension_numbers=dn)
    a = a + bs[None, :, None, None]
    a = lax.conv_general_dilated(a, w1, (1, 1), [(0, 0), (0, 0)],
                                 dimension_numbers=dn)
    a = a + b1[None, :, None, None]
    return x * a


if __name__ == "__main__":
    key = jax.random.PRNGKey(0)
    N, C, H, W = 2, 8, 16, 16   # dim = C = 8 ; W*C = 128 (exactly lane-dense)
    keys = jax.random.split(key, 7)

    x = jax.random.normal(keys[0], (N, C, H, W), jnp.float32)
    # Deterministic synthetic parameters (shapes per nn.Conv2d in __init__).
    w0 = jax.random.normal(keys[1], (C, 1, 5, 5), jnp.float32) * 0.1   # conv0 (depthwise 5x5)
    b0 = jax.random.normal(keys[2], (C,), jnp.float32) * 0.1
    ws = jax.random.normal(keys[3], (C, 1, 7, 7), jnp.float32) * 0.05  # conv_spatial (dw 7x7, dil=3)
    bs = jax.random.normal(keys[4], (C,), jnp.float32) * 0.1
    w1 = jax.random.normal(keys[5], (C, C, 1, 1), jnp.float32) * 0.1   # conv1 (1x1)
    b1 = jax.random.normal(keys[6], (C,), jnp.float32) * 0.1
    params = (w0, b0, ws, bs, w1, b1)

    out = lka_pallas(x, params)
    out = jax.block_until_ready(out)

    expected = _reference(x, params)
    assert out.shape == expected.shape and out.dtype == expected.dtype
    assert jnp.allclose(out, expected, atol=1e-3, rtol=1e-3), \
        float(jnp.max(jnp.abs(out - expected)))
    print("KERNEL_OK")
</pallas_src>

<mosaic_0001>
module attributes {stable_mosaic.version = 11 : i64} {
  func.func @kernel(%arg0: i32, %arg1: memref<1x20x160xf32, #tpu.memory_space<vmem>>, %arg2: memref<25x128xf32, #tpu.memory_space<vmem>>, %arg3: memref<1x128xf32, #tpu.memory_space<vmem>>, %arg4: memref<49x128xf32, #tpu.memory_space<vmem>>, %arg5: memref<1x128xf32, #tpu.memory_space<vmem>>, %arg6: memref<128x128xf32, #tpu.memory_space<vmem>>, %arg7: memref<1x128xf32, #tpu.memory_space<vmem>>, %arg8: memref<1x16x128xf32, #tpu.memory_space<vmem>>, %arg9: memref<34x272xf32, #tpu.memory_space<vmem>>) attributes {dimension_semantics = [#tpu.dimension_semantics<parallel>], iteration_bounds = array<i64: 2>, scalar_prefetch = 0 : i64, scratch_operands = 1 : i64, tpu.core_type = #tpu.core_type<tc>, window_params = [{transform_indices = @transform_0, window_bounds = array<i64: 1, 20, 160>}, {pipeline_mode = #tpu.pipeline_mode<synchronous>, transform_indices = @transform_1, window_bounds = array<i64: 25, 128>}, {pipeline_mode = #tpu.pipeline_mode<synchronous>, transform_indices = @transform_2, window_bounds = array<i64: 1, 128>}, {pipeline_mode = #tpu.pipeline_mode<synchronous>, transform_indices = @transform_3, window_bounds = array<i64: 49, 128>}, {pipeline_mode = #tpu.pipeline_mode<synchronous>, transform_indices = @transform_4, window_bounds = array<i64: 1, 128>}, {pipeline_mode = #tpu.pipeline_mode<synchronous>, transform_indices = @transform_5, window_bounds = array<i64: 128, 128>}, {pipeline_mode = #tpu.pipeline_mode<synchronous>, transform_indices = @transform_6, window_bounds = array<i64: 1, 128>}, {transform_indices = @transform_7, window_bounds = array<i64: 1, 16, 128>}]} {
    %c0 = arith.constant 0 : index
    %c0_0 = arith.constant 0 : index
    %0 = vector.load %arg2[%c0, %c0_0] : memref<25x128xf32, #tpu.memory_space<vmem>>, vector<25x128xf32>
    %c0_1 = arith.constant 0 : index
    %c0_2 = arith.constant 0 : index
    %1 = vector.load %arg4[%c0_1, %c0_2] : memref<49x128xf32, #tpu.memory_space<vmem>>, vector<49x128xf32>
    %c0_3 = arith.constant 0 : index
    %c0_4 = arith.constant 0 : index
    %2 = vector.load %arg3[%c0_3, %c0_4] : memref<1x128xf32, #tpu.memory_space<vmem>>, vector<1x128xf32>
    %c0_5 = arith.constant 0 : index
    %c0_6 = arith.constant 0 : index
    %3 = vector.load %arg5[%c0_5, %c0_6] : memref<1x128xf32, #tpu.memory_space<vmem>>, vector<1x128xf32>
    %c0_7 = arith.constant 0 : index
    %c0_8 = arith.constant 0 : index
    %4 = vector.load %arg7[%c0_7, %c0_8] : memref<1x128xf32, #tpu.memory_space<vmem>>, vector<1x128xf32>
    %5 = vector.shape_cast %2 : vector<1x128xf32> to vector<1x128xf32>
    %6 = vector.broadcast %5 : vector<1x128xf32> to vector<16x128xf32>
    %c0_9 = arith.constant 0 : index
    %c0_10 = arith.constant 0 : index
    %c0_11 = arith.constant 0 : index
    %7 = vector.load %arg1[%c0_9, %c0_10, %c0_11] : memref<1x20x160xf32, #tpu.memory_space<vmem>>, vector<1x16x128xf32>
    %8 = vector.shape_cast %7 : vector<1x16x128xf32> to vector<16x128xf32>
    %9 = vector.extract_strided_slice %0 {offsets = [0, 0], sizes = [1, 128], strides = [1, 1]} : vector<25x128xf32> to vector<1x128xf32>
    %10 = vector.broadcast %9 : vector<1x128xf32> to vector<16x128xf32>
    %11 = arith.mulf %8, %10 : vector<16x128xf32>
    %12 = arith.addf %6, %11 : vector<16x128xf32>
    %c0_12 = arith.constant 0 : index
    %c0_13 = arith.constant 0 : index
    %c8 = arith.constant 8 : index
    %13 = vector.load %arg1[%c0_12, %c0_13, %c8] : memref<1x20x160xf32, #tpu.memory_space<vmem>>, vector<1x16x128xf32>
    %14 = vector.shape_cast %13 : vector<1x16x128xf32> to vector<16x128xf32>
    %15 = vector.extract_strided_slice %0 {offsets = [1, 0], sizes = [1, 128], strides = [1, 1]} : vector<25x128xf32> to vector<1x128xf32>
    %16 = vector.broadcast %15 : vector<1x128xf32> to vector<16x128xf32>
    %17 = arith.mulf %14, %16 : vector<16x128xf32>
    %18 = arith.addf %12, %17 : vector<16x128xf32>
    %c0_14 = arith.constant 0 : index
    %c0_15 = arith.constant 0 : index
    %c16 = arith.constant 16 : index
    %19 = vector.load %arg1[%c0_14, %c0_15, %c16] : memref<1x20x160xf32, #tpu.memory_space<vmem>>, vector<1x16x128xf32>
    %20 = vector.shape_cast %19 : vector<1x16x128xf32> to vector<16x128xf32>
    %21 = vector.extract_strided_slice %0 {offsets = [2, 0], sizes = [1, 128], strides = [1, 1]} : vector<25x128xf32> to vector<1x128xf32>
    %22 = vector.broadcast %21 : vector<1x128xf32> to vector<16x128xf32>
    %23 = arith.mulf %20, %22 : vector<16x128xf32>
    %24 = arith.addf %18, %23 : vector<16x128xf32>
    %c0_16 = arith.constant 0 : index
    %c0_17 = arith.constant 0 : index
    %c24 = arith.constant 24 : index
    %25 = vector.load %arg1[%c0_16, %c0_17, %c24] : memref<1x20x160xf32, #tpu.memory_space<vmem>>, vector<1x16x128xf32>
    %26 = vector.shape_cast %25 : vector<1x16x128xf32> to vector<16x128xf32>
    %27 = vector.extract_strided_slice %0 {offsets = [3, 0], sizes = [1, 128], strides = [1, 1]} : vector<25x128xf32> to vector<1x128xf32>
    %28 = vector.broadcast %27 : vector<1x128xf32> to vector<16x128xf32>
    %29 = arith.mulf %26, %28 : vector<16x128xf32>
    %30 = arith.addf %24, %29 : vector<16x128xf32>
    %c0_18 = arith.constant 0 : index
    %c0_19 = arith.constant 0 : index
    %c32 = arith.constant 32 : index
    %31 = vector.load %arg1[%c0_18, %c0_19, %c32] : memref<1x20x160xf32, #tpu.memory_space<vmem>>, vector<1x16x128xf32>
    %32 = vector.shape_cast %31 : vector<1x16x128xf32> to vector<16x128xf32>
    %33 = vector.extract_strided_slice %0 {offsets = [4, 0], sizes = [1, 128], strides = [1, 1]} : vector<25x128xf32> to vector<1x128xf32>
    %34 = vector.broadcast %33 : vector<1x128xf32> to vector<16x128xf32>
    %35 = arith.mulf %32, %34 : vector<16x128xf32>
    %36 = arith.addf %30, %35 : vector<16x128xf32>
    %c0_20 = arith.constant 0 : index
    %c1 = arith.constant 1 : index
    %c0_21 = arith.constant 0 : index
    %37 = vector.load %arg1[%c0_20, %c1, %c0_21] : memref<1x20x160xf32, #tpu.memory_space<vmem>>, vector<1x16x128xf32>
    %38 = vector.shape_cast %37 : vector<1x16x128xf32> to vector<16x128xf32>
    %39 = vector.extract_strided_slice %0 {offsets = [5, 0], sizes = [1, 128], strides = [1, 1]} : vector<25x128xf32> to vector<1x128xf32>
    %40 = vector.broadcast %39 : vector<1x128xf32> to vector<16x128xf32>
    %41 = arith.mulf %38, %40 : vector<16x128xf32>
    %42 = arith.addf %36, %41 : vector<16x128xf32>
    %c0_22 = arith.constant 0 : index
    %c1_23 = arith.constant 1 : index
    %c8_24 = arith.constant 8 : index
    %43 = vector.load %arg1[%c0_22, %c1_23, %c8_24] : memref<1x20x160xf32, #tpu.memory_space<vmem>>, vector<1x16x128xf32>
    %44 = vector.shape_cast %43 : vector<1x16x128xf32> to vector<16x128xf32>
    %45 = vector.extract_strided_slice %0 {offsets = [6, 0], sizes = [1, 128], strides = [1, 1]} : vector<25x128xf32> to vector<1x128xf32>
    %46 = vector.broadcast %45 : vector<1x128xf32> to vector<16x128xf32>
    %47 = arith.mulf %44, %46 : vector<16x128xf32>
    %48 = arith.addf %42, %47 : vector<16x128xf32>
    %c0_25 = arith.constant 0 : index
    %c1_26 = arith.constant 1 : index
    %c16_27 = arith.constant 16 : index
    %49 = vector.load %arg1[%c0_25, %c1_26, %c16_27] : memref<1x20x160xf32, #tpu.memory_space<vmem>>, vector<1x16x128xf32>
    %50 = vector.shape_cast %49 : vector<1x16x128xf32> to vector<16x128xf32>
    %51 = vector.extract_strided_slice %0 {offsets = [7, 0], sizes = [1, 128], strides = [1, 1]} : vector<25x128xf32> to vector<1x128xf32>
    %52 = vector.broadcast %51 : vector<1x128xf32> to vector<16x128xf32>
    %53 = arith.mulf %50, %52 : vector<16x128xf32>
    %54 = arith.addf %48, %53 : vector<16x128xf32>
    %c0_28 = arith.constant 0 : index
    %c1_29 = arith.constant 1 : index
    %c24_30 = arith.constant 24 : index
    %55 = vector.load %arg1[%c0_28, %c1_29, %c24_30] : memref<1x20x160xf32, #tpu.memory_space<vmem>>, vector<1x16x128xf32>
    %56 = vector.shape_cast %55 : vector<1x16x128xf32> to vector<16x128xf32>
    %57 = vector.extract_strided_slice %0 {offsets = [8, 0], sizes = [1, 128], strides = [1, 1]} : vector<25x128xf32> to vector<1x128xf32>
    %58 = vector.broadcast %57 : vector<1x128xf32> to vector<16x128xf32>
    %59 = arith.mulf %56, %58 : vector<16x128xf32>
    %60 = arith.addf %54, %59 : vector<16x128xf32>
    %c0_31 = arith.constant 0 : index
    %c1_32 = arith.constant 1 : index
    %c32_33 = arith.constant 32 : index
    %61 = vector.load %arg1[%c0_31, %c1_32, %c32_33] : memref<1x20x160xf32, #tpu.memory_space<vmem>>, vector<1x16x128xf32>
    %62 = vector.shape_cast %61 : vector<1x16x128xf32> to vector<16x128xf32>
    %63 = vector.extract_strided_slice %0 {offsets = [9, 0], sizes = [1, 128], strides = [1, 1]} : vector<25x128xf32> to vector<1x128xf32>
    %64 = vector.broadcast %63 : vector<1x128xf32> to vector<16x128xf32>
    %65 = arith.mulf %62, %64 : vector<16x128xf32>
    %66 = arith.addf %60, %65 : vector<16x128xf32>
    %c0_34 = arith.constant 0 : index
    %c2 = arith.constant 2 : index
    %c0_35 = arith.constant 0 : index
    %67 = vector.load %arg1[%c0_34, %c2, %c0_35] : memref<1x20x160xf32, #tpu.memory_space<vmem>>, vector<1x16x128xf32>
    %68 = vector.shape_cast %67 : vector<1x16x128xf32> to vector<16x128xf32>
    %69 = vector.extract_strided_slice %0 {offsets = [10, 0], sizes = [1, 128], strides = [1, 1]} : vector<25x128xf32> to vector<1x128xf32>
    %70 = vector.broadcast %69 : vector<1x128xf32> to vector<16x128xf32>
    %71 = arith.mulf %68, %70 : vector<16x128xf32>
    %72 = arith.addf %66, %71 : vector<16x128xf32>
    %c0_36 = arith.constant 0 : index
    %c2_37 = arith.constant 2 : index
    %c8_38 = arith.constant 8 : index
    %73 = vector.load %arg1[%c0_36, %c2_37, %c8_38] : memref<1x20x160xf32, #tpu.memory_space<vmem>>, vector<1x16x128xf32>
    %74 = vector.shape_cast %73 : vector<1x16x128xf32> to vector<16x128xf32>
    %75 = vector.extract_strided_slice %0 {offsets = [11, 0], sizes = [1, 128], strides = [1, 1]} : vector<25x128xf32> to vector<1x128xf32>
    %76 = vector.broadcast %75 : vector<1x128xf32> to vector<16x128xf32>
    %77 = arith.mulf %74, %76 : vector<16x128xf32>
    %78 = arith.addf %72, %77 : vector<16x128xf32>
    %c0_39 = arith.constant 0 : index
    %c2_40 = arith.constant 2 : index
    %c16_41 = arith.constant 16 : index
    %79 = vector.load %arg1[%c0_39, %c2_40, %c16_41] : memref<1x20x160xf32, #tpu.memory_space<vmem>>, vector<1x16x128xf32>
    %80 = vector.shape_cast %79 : vector<1x16x128xf32> to vector<16x128xf32>
    %81 = vector.extract_strided_slice %0 {offsets = [12, 0], sizes = [1, 128], strides = [1, 1]} : vector<25x128xf32> to vector<1x128xf32>
    %82 = vector.broadcast %81 : vector<1x128xf32> to vector<16x128xf32>
    %83 = arith.mulf %80, %82 : vector<16x128xf32>
    %84 = arith.addf %78, %83 : vector<16x128xf32>
    %c0_42 = arith.constant 0 : index
    %c2_43 = arith.constant 2 : index
    %c24_44 = arith.constant 24 : index
    %85 = vector.load %arg1[%c0_42, %c2_43, %c24_44] : memref<1x20x160xf32, #tpu.memory_space<vmem>>, vector<1x16x128xf32>
    %86 = vector.shape_cast %85 : vector<1x16x128xf32> to vector<16x128xf32>
    %87 = vector.extract_strided_slice %0 {offsets = [13, 0], sizes = [1, 128], strides = [1, 1]} : vector<25x128xf32> to vector<1x128xf32>
    %88 = vector.broadcast %87 : vector<1x128xf32> to vector<16x128xf32>
    %89 = arith.mulf %86, %88 : vector<16x128xf32>
    %90 = arith.addf %84, %89 : vector<16x128xf32>
    %c0_45 = arith.constant 0 : index
    %c2_46 = arith.constant 2 : index
    %c32_47 = arith.constant 32 : index
    %91 = vector.load %arg1[%c0_45, %c2_46, %c32_47] : memref<1x20x160xf32, #tpu.memory_space<vmem>>, vector<1x16x128xf32>
    %92 = vector.shape_cast %91 : vector<1x16x128xf32> to vector<16x128xf32>
    %93 = vector.extract_strided_slice %0 {offsets = [14, 0], sizes = [1, 128], strides = [1, 1]} : vector<25x128xf32> to vector<1x128xf32>
    %94 = vector.broadcast %93 : vector<1x128xf32> to vector<16x128xf32>
    %95 = arith.mulf %92, %94 : vector<16x128xf32>
    %96 = arith.addf %90, %95 : vector<16x128xf32>
    %c0_48 = arith.constant 0 : index
    %c3 = arith.constant 3 : index
    %c0_49 = arith.constant 0 : index
    %97 = vector.load %arg1[%c0_48, %c3, %c0_49] : memref<1x20x160xf32, #tpu.memory_space<vmem>>, vector<1x16x128xf32>
    %98 = vector.shape_cast %97 : vector<1x16x128xf32> to vector<16x128xf32>
    %99 = vector.extract_strided_slice %0 {offsets = [15, 0], sizes = [1, 128], strides = [1, 1]} : vector<25x128xf32> to vector<1x128xf32>
    %100 = vector.broadcast %99 : vector<1x128xf32> to vector<16x128xf32>
    %101 = arith.mulf %98, %100 : vector<16x128xf32>
    %102 = arith.addf %96, %101 : vector<16x128xf32>
    %c0_50 = arith.constant 0 : index
    %c3_51 = arith.constant 3 : index
    %c8_52 = arith.constant 8 : index
    %103 = vector.load %arg1[%c0_50, %c3_51, %c8_52] : memref<1x20x160xf32, #tpu.memory_space<vmem>>, vector<1x16x128xf32>
    %104 = vector.shape_cast %103 : vector<1x16x128xf32> to vector<16x128xf32>
    %105 = vector.extract_strided_slice %0 {offsets = [16, 0], sizes = [1, 128], strides = [1, 1]} : vector<25x128xf32> to vector<1x128xf32>
    %106 = vector.broadcast %105 : vector<1x128xf32> to vector<16x128xf32>
    %107 = arith.mulf %104, %106 : vector<16x128xf32>
    %108 = arith.addf %102, %107 : vector<16x128xf32>
    %c0_53 = arith.constant 0 : index
    %c3_54 = arith.constant 3 : index
    %c16_55 = arith.constant 16 : index
    %109 = vector.load %arg1[%c0_53, %c3_54, %c16_55] : memref<1x20x160xf32, #tpu.memory_space<vmem>>, vector<1x16x128xf32>
    %110 = vector.shape_cast %109 : vector<1x16x128xf32> to vector<16x128xf32>
    %111 = vector.extract_strided_slice %0 {offsets = [17, 0], sizes = [1, 128], strides = [1, 1]} : vector<25x128xf32> to vector<1x128xf32>
    %112 = vector.broadcast %111 : vector<1x128xf32> to vector<16x128xf32>
    %113 = arith.mulf %110, %112 : vector<16x128xf32>
    %114 = arith.addf %108, %113 : vector<16x128xf32>
    %c0_56 = arith.constant 0 : index
    %c3_57 = arith.constant 3 : index
    %c24_58 = arith.constant 24 : index
    %115 = vector.load %arg1[%c0_56, %c3_57, %c24_58] : memref<1x20x160xf32, #tpu.memory_space<vmem>>, vector<1x16x128xf32>
    %116 = vector.shape_cast %115 : vector<1x16x128xf32> to vector<16x128xf32>
    %117 = vector.extract_strided_slice %0 {offsets = [18, 0], sizes = [1, 128], strides = [1, 1]} : vector<25x128xf32> to vector<1x128xf32>
    %118 = vector.broadcast %117 : vector<1x128xf32> to vector<16x128xf32>
    %119 = arith.mulf %116, %118 : vector<16x128xf32>
    %120 = arith.addf %114, %119 : vector<16x128xf32>
    %c0_59 = arith.constant 0 : index
    %c3_60 = arith.constant 3 : index
    %c32_61 = arith.constant 32 : index
    %121 = vector.load %arg1[%c0_59, %c3_60, %c32_61] : memref<1x20x160xf32, #tpu.memory_space<vmem>>, vector<1x16x128xf32>
    %122 = vector.shape_cast %121 : vector<1x16x128xf32> to vector<16x128xf32>
    %123 = vector.extract_strided_slice %0 {offsets = [19, 0], sizes = [1, 128], strides = [1, 1]} : vector<25x128xf32> to vector<1x128xf32>
    %124 = vector.broadcast %123 : vector<1x128xf32> to vector<16x128xf32>
    %125 = arith.mulf %122, %124 : vector<16x128xf32>
    %126 = arith.addf %120, %125 : vector<16x128xf32>
    %c0_62 = arith.constant 0 : index
    %c4 = arith.constant 4 : index
    %c0_63 = arith.constant 0 : index
    %127 = vector.load %arg1[%c0_62, %c4, %c0_63] : memref<1x20x160xf32, #tpu.memory_space<vmem>>, vector<1x16x128xf32>
    %128 = vector.shape_cast %127 : vector<1x16x128xf32> to vector<16x128xf32>
    %129 = vector.extract_strided_slice %0 {offsets = [20, 0], sizes = [1, 128], strides = [1, 1]} : vector<25x128xf32> to vector<1x128xf32>
    %130 = vector.broadcast %129 : vector<1x128xf32> to vector<16x128xf32>
    %131 = arith.mulf %128, %130 : vector<16x128xf32>
    %132 = arith.addf %126, %131 : vector<16x128xf32>
    %c0_64 = arith.constant 0 : index
    %c4_65 = arith.constant 4 : index
    %c8_66 = arith.constant 8 : index
    %133 = vector.load %arg1[%c0_64, %c4_65, %c8_66] : memref<1x20x160xf32, #tpu.memory_space<vmem>>, vector<1x16x128xf32>
    %134 = vector.shape_cast %133 : vector<1x16x128xf32> to vector<16x128xf32>
    %135 = vector.extract_strided_slice %0 {offsets = [21, 0], sizes = [1, 128], strides = [1, 1]} : vector<25x128xf32> to vector<1x128xf32>
    %136 = vector.broadcast %135 : vector<1x128xf32> to vector<16x128xf32>
    %137 = arith.mulf %134, %136 : vector<16x128xf32>
    %138 = arith.addf %132, %137 : vector<16x128xf32>
    %c0_67 = arith.constant 0 : index
    %c4_68 = arith.constant 4 : index
    %c16_69 = arith.constant 16 : index
    %139 = vector.load %arg1[%c0_67, %c4_68, %c16_69] : memref<1x20x160xf32, #tpu.memory_space<vmem>>, vector<1x16x128xf32>
    %140 = vector.shape_cast %139 : vector<1x16x128xf32> to vector<16x128xf32>
    %141 = vector.extract_strided_slice %0 {offsets = [22, 0], sizes = [1, 128], strides = [1, 1]} : vector<25x128xf32> to vector<1x128xf32>
    %142 = vector.broadcast %141 : vector<1x128xf32> to vector<16x128xf32>
    %143 = arith.mulf %140, %142 : vector<16x128xf32>
    %144 = arith.addf %138, %143 : vector<16x128xf32>
    %c0_70 = arith.constant 0 : index
    %c4_71 = arith.constant 4 : index
    %c24_72 = arith.constant 24 : index
    %145 = vector.load %arg1[%c0_70, %c4_71, %c24_72] : memref<1x20x160xf32, #tpu.memory_space<vmem>>, vector<1x16x128xf32>
    %146 = vector.shape_cast %145 : vector<1x16x128xf32> to vector<16x128xf32>
    %147 = vector.extract_strided_slice %0 {offsets = [23, 0], sizes = [1, 128], strides = [1, 1]} : vector<25x128xf32> to vector<1x128xf32>
    %148 = vector.broadcast %147 : vector<1x128xf32> to vector<16x128xf32>
    %149 = arith.mulf %146, %148 : vector<16x128xf32>
    %150 = arith.addf %144, %149 : vector<16x128xf32>
    %c0_73 = arith.constant 0 : index
    %c4_74 = arith.constant 4 : index
    %c32_75 = arith.constant 32 : index
    %151 = vector.load %arg1[%c0_73, %c4_74, %c32_75] : memref<1x20x160xf32, #tpu.memory_space<vmem>>, vector<1x16x128xf32>
    %152 = vector.shape_cast %151 : vector<1x16x128xf32> to vector<16x128xf32>
    %153 = vector.extract_strided_slice %0 {offsets = [24, 0], sizes = [1, 128], strides = [1, 1]} : vector<25x128xf32> to vector<1x128xf32>
    %154 = vector.broadcast %153 : vector<1x128xf32> to vector<16x128xf32>
    %155 = arith.mulf %152, %154 : vector<16x128xf32>
    %156 = arith.addf %150, %155 : vector<16x128xf32>
    %cst = arith.constant 0.000000e+00 : f32
    %157 = vector.broadcast %cst : f32 to vector<34x272xf32>
    %c0_76 = arith.constant 0 : index
    %c0_77 = arith.constant 0 : index
    %158 = vector.load %arg9[%c0_76, %c0_77] : memref<34x272xf32, #tpu.memory_space<vmem>>, vector<34x272xf32>
    tpu.vector_store %arg9[%c0_76, %c0_77], %157 {strides = array<i32>} : memref<34x272xf32, #tpu.memory_space<vmem>>, vector<34x272xf32>,
    %c9 = arith.constant 9 : index
    %c72 = arith.constant 72 : index
    %159 = vector.load %arg9[%c9, %c72] : memref<34x272xf32, #tpu.memory_space<vmem>>, vector<16x128xf32>
    tpu.vector_store %arg9[%c9, %c72], %156 {strides = array<i32>} : memref<34x272xf32, #tpu.memory_space<vmem>>, vector<16x128xf32>,
    %160 = vector.shape_cast %3 : vector<1x128xf32> to vector<1x128xf32>
    %161 = vector.broadcast %160 : vector<1x128xf32> to vector<16x128xf32>
    %c0_78 = arith.constant 0 : index
    %c0_79 = arith.constant 0 : index
    %162 = vector.load %arg9[%c0_78, %c0_79] : memref<34x272xf32, #tpu.memory_space<vmem>>, vector<16x128xf32>
    %163 = vector.extract_strided_slice %1 {offsets = [0, 0], sizes = [1, 128], strides = [1, 1]} : vector<49x128xf32> to vector<1x128xf32>
    %164 = vector.broadcast %163 : vector<1x128xf32> to vector<16x128xf32>
    %165 = arith.mulf %162, %164 : vector<16x128xf32>
    %166 = arith.addf %161, %165 : vector<16x128xf32>
    %c0_80 = arith.constant 0 : index
    %c24_81 = arith.constant 24 : index
    %167 = vector.load %arg9[%c0_80, %c24_81] : memref<34x272xf32, #tpu.memory_space<vmem>>, vector<16x128xf32>
    %168 = vector.extract_strided_slice %1 {offsets = [1, 0], sizes = [1, 128], strides = [1, 1]} : vector<49x128xf32> to vector<1x128xf32>
    %169 = vector.broadcast %168 : vector<1x128xf32> to vector<16x128xf32>
    %170 = arith.mulf %167, %169 : vector<16x128xf32>
    %171 = arith.addf %166, %170 : vector<16x128xf32>
    %c0_82 = arith.constant 0 : index
    %c48 = arith.constant 48 : index
    %172 = vector.load %arg9[%c0_82, %c48] : memref<34x272xf32, #tpu.memory_space<vmem>>, vector<16x128xf32>
    %173 = vector.extract_strided_slice %1 {offsets = [2, 0], sizes = [1, 128], strides = [1, 1]} : vector<49x128xf32> to vector<1x128xf32>
    %174 = vector.broadcast %173 : vector<1x128xf32> to vector<16x128xf32>
    %175 = arith.mulf %172, %174 : vector<16x128xf32>
    %176 = arith.addf %171, %175 : vector<16x128xf32>
    %c0_83 = arith.constant 0 : index
    %c72_84 = arith.constant 72 : index
    %177 = vector.load %arg9[%c0_83, %c72_84] : memref<34x272xf32, #tpu.memory_space<vmem>>, vector<16x128xf32>
    %178 = vector.extract_strided_slice %1 {offsets = [3, 0], sizes = [1, 128], strides = [1, 1]} : vector<49x128xf32> to vector<1x128xf32>
    %179 = vector.broadcast %178 : vector<1x128xf32> to vector<16x128xf32>
    %180 = arith.mulf %177, %179 : vector<16x128xf32>
    %181 = arith.addf %176, %180 : vector<16x128xf32>
    %c0_85 = arith.constant 0 : index
    %c96 = arith.constant 96 : index
    %182 = vector.load %arg9[%c0_85, %c96] : memref<34x272xf32, #tpu.memory_space<vmem>>, vector<16x128xf32>
    %183 = vector.extract_strided_slice %1 {offsets = [4, 0], sizes = [1, 128], strides = [1, 1]} : vector<49x128xf32> to vector<1x128xf32>
    %184 = vector.broadcast %183 : vector<1x128xf32> to vector<16x128xf32>
    %185 = arith.mulf %182, %184 : vector<16x128xf32>
    %186 = arith.addf %181, %185 : vector<16x128xf32>
    %c0_86 = arith.constant 0 : index
    %c120 = arith.constant 120 : index
    %187 = vector.load %arg9[%c0_86, %c120] : memref<34x272xf32, #tpu.memory_space<vmem>>, vector<16x128xf32>
    %188 = vector.extract_strided_slice %1 {offsets = [5, 0], sizes = [1, 128], strides = [1, 1]} : vector<49x128xf32> to vector<1x128xf32>
    %189 = vector.broadcast %188 : vector<1x128xf32> to vector<16x128xf32>
    %190 = arith.mulf %187, %189 : vector<16x128xf32>
    %191 = arith.addf %186, %190 : vector<16x128xf32>
    %c0_87 = arith.constant 0 : index
    %c144 = arith.constant 144 : index
    %192 = vector.load %arg9[%c0_87, %c144] : memref<34x272xf32, #tpu.memory_space<vmem>>, vector<16x128xf32>
    %193 = vector.extract_strided_slice %1 {offsets = [6, 0], sizes = [1, 128], strides = [1, 1]} : vector<49x128xf32> to vector<1x128xf32>
    %194 = vector.broadcast %193 : vector<1x128xf32> to vector<16x128xf32>
    %195 = arith.mulf %192, %194 : vector<16x128xf32>
    %196 = arith.addf %191, %195 : vector<16x128xf32>
    %c3_88 = arith.constant 3 : index
    %c0_89 = arith.constant 0 : index
    %197 = vector.load %arg9[%c3_88, %c0_89] : memref<34x272xf32, #tpu.memory_space<vmem>>, vector<16x128xf32>
    %198 = vector.extract_strided_slice %1 {offsets = [7, 0], sizes = [1, 128], strides = [1, 1]} : vector<49x128xf32> to vector<1x128xf32>
    %199 = vector.broadcast %198 : vector<1x128xf32> to vector<16x128xf32>
    %200 = arith.mulf %197, %199 : vector<16x128xf32>
    %201 = arith.addf %196, %200 : vector<16x128xf32>
    %c3_90 = arith.constant 3 : index
    %c24_91 = arith.constant 24 : index
    %202 = vector.load %arg9[%c3_90, %c24_91] : memref<34x272xf32, #tpu.memory_space<vmem>>, vector<16x128xf32>
    %203 = vector.extract_strided_slice %1 {offsets = [8, 0], sizes = [1, 128], strides = [1, 1]} : vector<49x128xf32> to vector<1x128xf32>
    %204 = vector.broadcast %203 : vector<1x128xf32> to vector<16x128xf32>
    %205 = arith.mulf %202, %204 : vector<16x128xf32>
    %206 = arith.addf %201, %205 : vector<16x128xf32>
    %c3_92 = arith.constant 3 : index
    %c48_93 = arith.constant 48 : index
    %207 = vector.load %arg9[%c3_92, %c48_93] : memref<34x272xf32, #tpu.memory_space<vmem>>, vector<16x128xf32>
    %208 = vector.extract_strided_slice %1 {offsets = [9, 0], sizes = [1, 128], strides = [1, 1]} : vector<49x128xf32> to vector<1x128xf32>
    %209 = vector.broadcast %208 : vector<1x128xf32> to vector<16x128xf32>
    %210 = arith.mulf %207, %209 : vector<16x128xf32>
    %211 = arith.addf %206, %210 : vector<16x128xf32>
    %c3_94 = arith.constant 3 : index
    %c72_95 = arith.constant 72 : index
    %212 = vector.load %arg9[%c3_94, %c72_95] : memref<34x272xf32, #tpu.memory_space<vmem>>, vector<16x128xf32>
    %213 = vector.extract_strided_slice %1 {offsets = [10, 0], sizes = [1, 128], strides = [1, 1]} : vector<49x128xf32> to vector<1x128xf32>
    %214 = vector.broadcast %213 : vector<1x128xf32> to vector<16x128xf32>
    %215 = arith.mulf %212, %214 : vector<16x128xf32>
    %216 = arith.addf %211, %215 : vector<16x128xf32>
    %c3_96 = arith.constant 3 : index
    %c96_97 = arith.constant 96 : index
    %217 = vector.load %arg9[%c3_96, %c96_97] : memref<34x272xf32, #tpu.memory_space<vmem>>, vector<16x128xf32>
    %218 = vector.extract_strided_slice %1 {offsets = [11, 0], sizes = [1, 128], strides = [1, 1]} : vector<49x128xf32> to vector<1x128xf32>
    %219 = vector.broadcast %218 : vector<1x128xf32> to vector<16x128xf32>
    %220 = arith.mulf %217, %219 : vector<16x128xf32>
    %221 = arith.addf %216, %220 : vector<16x128xf32>
    %c3_98 = arith.constant 3 : index
    %c120_99 = arith.constant 120 : index
    %222 = vector.load %arg9[%c3_98, %c120_99] : memref<34x272xf32, #tpu.memory_space<vmem>>, vector<16x128xf32>
    %223 = vector.extract_strided_slice %1 {offsets = [12, 0], sizes = [1, 128], strides = [1, 1]} : vector<49x128xf32> to vector<1x128xf32>
    %224 = vector.broadcast %223 : vector<1x128xf32> to vector<16x128xf32>
    %225 = arith.mulf %222, %224 : vector<16x128xf32>
    %226 = arith.addf %221, %225 : vector<16x128xf32>
    %c3_100 = arith.constant 3 : index
    %c144_101 = arith.constant 144 : index
    %227 = vector.load %arg9[%c3_100, %c144_101] : memref<34x272xf32, #tpu.memory_space<vmem>>, vector<16x128xf32>
    %228 = vector.extract_strided_slice %1 {offsets = [13, 0], sizes = [1, 128], strides = [1, 1]} : vector<49x128xf32> to vector<1x128xf32>
    %229 = vector.broadcast %228 : vector<1x128xf32> to vector<16x128xf32>
    %230 = arith.mulf %227, %229 : vector<16x128xf32>
    %231 = arith.addf %226, %230 : vector<16x128xf32>
    %c6 = arith.constant 6 : index
    %c0_102 = arith.constant 0 : index
    %232 = vector.load %arg9[%c6, %c0_102] : memref<34x272xf32, #tpu.memory_space<vmem>>, vector<16x128xf32>
    %233 = vector.extract_strided_slice %1 {offsets = [14, 0], sizes = [1, 128], strides = [1, 1]} : vector<49x128xf32> to vector<1x128xf32>
    %234 = vector.broadcast %233 : vector<1x128xf32> to vector<16x128xf32>
    %235 = arith.mulf %232, %234 : vector<16x128xf32>
    %236 = arith.addf %231, %235 : vector<16x128xf32>
    %c6_103 = arith.constant 6 : index
    %c24_104 = arith.constant 24 : index
    %237 = vector.load %arg9[%c6_103, %c24_104] : memref<34x272xf32, #tpu.memory_space<vmem>>, vector<16x128xf32>
    %238 = vector.extract_strided_slice %1 {offsets = [15, 0], sizes = [1, 128], strides = [1, 1]} : vector<49x128xf32> to vector<1x128xf32>
    %239 = vector.broadcast %238 : vector<1x128xf32> to vector<16x128xf32>
    %240 = arith.mulf %237, %239 : vector<16x128xf32>
    %241 = arith.addf %236, %240 : vector<16x128xf32>
    %c6_105 = arith.constant 6 : index
    %c48_106 = arith.constant 48 : index
    %242 = vector.load %arg9[%c6_105, %c48_106] : memref<34x272xf32, #tpu.memory_space<vmem>>, vector<16x128xf32>
    %243 = vector.extract_strided_slice %1 {offsets = [16, 0], sizes = [1, 128], strides = [1, 1]} : vector<49x128xf32> to vector<1x128xf32>
    %244 = vector.broadcast %243 : vector<1x128xf32> to vector<16x128xf32>
    %245 = arith.mulf %242, %244 : vector<16x128xf32>
    %246 = arith.addf %241, %245 : vector<16x128xf32>
    %c6_107 = arith.constant 6 : index
    %c72_108 = arith.constant 72 : index
    %247 = vector.load %arg9[%c6_107, %c72_108] : memref<34x272xf32, #tpu.memory_space<vmem>>, vector<16x128xf32>
    %248 = vector.extract_strided_slice %1 {offsets = [17, 0], sizes = [1, 128], strides = [1, 1]} : vector<49x128xf32> to vector<1x128xf32>
    %249 = vector.broadcast %248 : vector<1x128xf32> to vector<16x128xf32>
    %250 = arith.mulf %247, %249 : vector<16x128xf32>
    %251 = arith.addf %246, %250 : vector<16x128xf32>
    %c6_109 = arith.constant 6 : index
    %c96_110 = arith.constant 96 : index
    %252 = vector.load %arg9[%c6_109, %c96_110] : memref<34x272xf32, #tpu.memory_space<vmem>>, vector<16x128xf32>
    %253 = vector.extract_strided_slice %1 {offsets = [18, 0], sizes = [1, 128], strides = [1, 1]} : vector<49x128xf32> to vector<1x128xf32>
    %254 = vector.broadcast %253 : vector<1x128xf32> to vector<16x128xf32>
    %255 = arith.mulf %252, %254 : vector<16x128xf32>
    %256 = arith.addf %251, %255 : vector<16x128xf32>
    %c6_111 = arith.constant 6 : index
    %c120_112 = arith.constant 120 : index
    %257 = vector.load %arg9[%c6_111, %c120_112] : memref<34x272xf32, #tpu.memory_space<vmem>>, vector<16x128xf32>
    %258 = vector.extract_strided_slice %1 {offsets = [19, 0], sizes = [1, 128], strides = [1, 1]} : vector<49x128xf32> to vector<1x128xf32>
    %259 = vector.broadcast %258 : vector<1x128xf32> to vector<16x128xf32>
    %260 = arith.mulf %257, %259 : vector<16x128xf32>
    %261 = arith.addf %256, %260 : vector<16x128xf32>
    %c6_113 = arith.constant 6 : index
    %c144_114 = arith.constant 144 : index
    %262 = vector.load %arg9[%c6_113, %c144_114] : memref<34x272xf32, #tpu.memory_space<vmem>>, vector<16x128xf32>
    %263 = vector.extract_strided_slice %1 {offsets = [20, 0], sizes = [1, 128], strides = [1, 1]} : vector<49x128xf32> to vector<1x128xf32>
    %264 = vector.broadcast %263 : vector<1x128xf32> to vector<16x128xf32>
    %265 = arith.mulf %262, %264 : vector<16x128xf32>
    %266 = arith.addf %261, %265 : vector<16x128xf32>
    %c9_115 = arith.constant 9 : index
    %c0_116 = arith.constant 0 : index
    %267 = vector.load %arg9[%c9_115, %c0_116] : memref<34x272xf32, #tpu.memory_space<vmem>>, vector<16x128xf32>
    %268 = vector.extract_strided_slice %1 {offsets = [21, 0], sizes = [1, 128], strides = [1, 1]} : vector<49x128xf32> to vector<1x128xf32>
    %269 = vector.broadcast %268 : vector<1x128xf32> to vector<16x128xf32>
    %270 = arith.mulf %267, %269 : vector<16x128xf32>
    %271 = arith.addf %266, %270 : vector<16x128xf32>
    %c9_117 = arith.constant 9 : index
    %c24_118 = arith.constant 24 : index
    %272 = vector.load %arg9[%c9_117, %c24_118] : memref<34x272xf32, #tpu.memory_space<vmem>>, vector<16x128xf32>
    %273 = vector.extract_strided_slice %1 {offsets = [22, 0], sizes = [1, 128], strides = [1, 1]} : vector<49x128xf32> to vector<1x128xf32>
    %274 = vector.broadcast %273 : vector<1x128xf32> to vector<16x128xf32>
    %275 = arith.mulf %272, %274 : vector<16x128xf32>
    %276 = arith.addf %271, %275 : vector<16x128xf32>
    %c9_119 = arith.constant 9 : index
    %c48_120 = arith.constant 48 : index
    %277 = vector.load %arg9[%c9_119, %c48_120] : memref<34x272xf32, #tpu.memory_space<vmem>>, vector<16x128xf32>
    %278 = vector.extract_strided_slice %1 {offsets = [23, 0], sizes = [1, 128], strides = [1, 1]} : vector<49x128xf32> to vector<1x128xf32>
    %279 = vector.broadcast %278 : vector<1x128xf32> to vector<16x128xf32>
    %280 = arith.mulf %277, %279 : vector<16x128xf32>
    %281 = arith.addf %276, %280 : vector<16x128xf32>
    %c9_121 = arith.constant 9 : index
    %c72_122 = arith.constant 72 : index
    %282 = vector.load %arg9[%c9_121, %c72_122] : memref<34x272xf32, #tpu.memory_space<vmem>>, vector<16x128xf32>
    %283 = vector.extract_strided_slice %1 {offsets = [24, 0], sizes = [1, 128], strides = [1, 1]} : vector<49x128xf32> to vector<1x128xf32>
    %284 = vector.broadcast %283 : vector<1x128xf32> to vector<16x128xf32>
    %285 = arith.mulf %282, %284 : vector<16x128xf32>
    %286 = arith.addf %281, %285 : vector<16x128xf32>
    %c9_123 = arith.constant 9 : index
    %c96_124 = arith.constant 96 : index
    %287 = vector.load %arg9[%c9_123, %c96_124] : memref<34x272xf32, #tpu.memory_space<vmem>>, vector<16x128xf32>
    %288 = vector.extract_strided_slice %1 {offsets = [25, 0], sizes = [1, 128], strides = [1, 1]} : vector<49x128xf32> to vector<1x128xf32>
    %289 = vector.broadcast %288 : vector<1x128xf32> to vector<16x128xf32>
    %290 = arith.mulf %287, %289 : vector<16x128xf32>
    %291 = arith.addf %286, %290 : vector<16x128xf32>
    %c9_125 = arith.constant 9 : index
    %c120_126 = arith.constant 120 : index
    %292 = vector.load %arg9[%c9_125, %c120_126] : memref<34x272xf32, #tpu.memory_space<vmem>>, vector<16x128xf32>
    %293 = vector.extract_strided_slice %1 {offsets = [26, 0], sizes = [1, 128], strides = [1, 1]} : vector<49x128xf32> to vector<1x128xf32>
    %294 = vector.broadcast %293 : vector<1x128xf32> to vector<16x128xf32>
    %295 = arith.mulf %292, %294 : vector<16x128xf32>
    %296 = arith.addf %291, %295 : vector<16x128xf32>
    %c9_127 = arith.constant 9 : index
    %c144_128 = arith.constant 144 : index
    %297 = vector.load %arg9[%c9_127, %c144_128] : memref<34x272xf32, #tpu.memory_space<vmem>>, vector<16x128xf32>
    %298 = vector.extract_strided_slice %1 {offsets = [27, 0], sizes = [1, 128], strides = [1, 1]} : vector<49x128xf32> to vector<1x128xf32>
    %299 = vector.broadcast %298 : vector<1x128xf32> to vector<16x128xf32>
    %300 = arith.mulf %297, %299 : vector<16x128xf32>
    %301 = arith.addf %296, %300 : vector<16x128xf32>
    %c12 = arith.constant 12 : index
    %c0_129 = arith.constant 0 : index
    %302 = vector.load %arg9[%c12, %c0_129] : memref<34x272xf32, #tpu.memory_space<vmem>>, vector<16x128xf32>
    %303 = vector.extract_strided_slice %1 {offsets = [28, 0], sizes = [1, 128], strides = [1, 1]} : vector<49x128xf32> to vector<1x128xf32>
    %304 = vector.broadcast %303 : vector<1x128xf32> to vector<16x128xf32>
    %305 = arith.mulf %302, %304 : vector<16x128xf32>
    %306 = arith.addf %301, %305 : vector<16x128xf32>
    %c12_130 = arith.constant 12 : index
    %c24_131 = arith.constant 24 : index
    %307 = vector.load %arg9[%c12_130, %c24_131] : memref<34x272xf32, #tpu.memory_space<vmem>>, vector<16x128xf32>
    %308 = vector.extract_strided_slice %1 {offsets = [29, 0], sizes = [1, 128], strides = [1, 1]} : vector<49x128xf32> to vector<1x128xf32>
    %309 = vector.broadcast %308 : vector<1x128xf32> to vector<16x128xf32>
    %310 = arith.mulf %307, %309 : vector<16x128xf32>
    %311 = arith.addf %306, %310 : vector<16x128xf32>
    %c12_132 = arith.constant 12 : index
    %c48_133 = arith.constant 48 : index
    %312 = vector.load %arg9[%c12_132, %c48_133] : memref<34x272xf32, #tpu.memory_space<vmem>>, vector<16x128xf32>
    %313 = vector.extract_strided_slice %1 {offsets = [30, 0], sizes = [1, 128], strides = [1, 1]} : vector<49x128xf32> to vector<1x128xf32>
    %314 = vector.broadcast %313 : vector<1x128xf32> to vector<16x128xf32>
    %315 = arith.mulf %312, %314 : vector<16x128xf32>
    %316 = arith.addf %311, %315 : vector<16x128xf32>
    %c12_134 = arith.constant 12 : index
    %c72_135 = arith.constant 72 : index
    %317 = vector.load %arg9[%c12_134, %c72_135] : memref<34x272xf32, #tpu.memory_space<vmem>>, vector<16x128xf32>
    %318 = vector.extract_strided_slice %1 {offsets = [31, 0], sizes = [1, 128], strides = [1, 1]} : vector<49x128xf32> to vector<1x128xf32>
    %319 = vector.broadcast %318 : vector<1x128xf32> to vector<16x128xf32>
    %320 = arith.mulf %317, %319 : vector<16x128xf32>
    %321 = arith.addf %316, %320 : vector<16x128xf32>
    %c12_136 = arith.constant 12 : index
    %c96_137 = arith.constant 96 : index
    %322 = vector.load %arg9[%c12_136, %c96_137] : memref<34x272xf32, #tpu.memory_space<vmem>>, vector<16x128xf32>
    %323 = vector.extract_strided_slice %1 {offsets = [32, 0], sizes = [1, 128], strides = [1, 1]} : vector<49x128xf32> to vector<1x128xf32>
    %324 = vector.broadcast %323 : vector<1x128xf32> to vector<16x128xf32>
    %325 = arith.mulf %322, %324 : vector<16x128xf32>
    %326 = arith.addf %321, %325 : vector<16x128xf32>
    %c12_138 = arith.constant 12 : index
    %c120_139 = arith.constant 120 : index
    %327 = vector.load %arg9[%c12_138, %c120_139] : memref<34x272xf32, #tpu.memory_space<vmem>>, vector<16x128xf32>
    %328 = vector.extract_strided_slice %1 {offsets = [33, 0], sizes = [1, 128], strides = [1, 1]} : vector<49x128xf32> to vector<1x128xf32>
    %329 = vector.broadcast %328 : vector<1x128xf32> to vector<16x128xf32>
    %330 = arith.mulf %327, %329 : vector<16x128xf32>
    %331 = arith.addf %326, %330 : vector<16x128xf32>
    %c12_140 = arith.constant 12 : index
    %c144_141 = arith.constant 144 : index
    %332 = vector.load %arg9[%c12_140, %c144_141] : memref<34x272xf32, #tpu.memory_space<vmem>>, vector<16x128xf32>
    %333 = vector.extract_strided_slice %1 {offsets = [34, 0], sizes = [1, 128], strides = [1, 1]} : vector<49x128xf32> to vector<1x128xf32>
    %334 = vector.broadcast %333 : vector<1x128xf32> to vector<16x128xf32>
    %335 = arith.mulf %332, %334 : vector<16x128xf32>
    %336 = arith.addf %331, %335 : vector<16x128xf32>
    %c15 = arith.constant 15 : index
    %c0_142 = arith.constant 0 : index
    %337 = vector.load %arg9[%c15, %c0_142] : memref<34x272xf32, #tpu.memory_space<vmem>>, vector<16x128xf32>
    %338 = vector.extract_strided_slice %1 {offsets = [35, 0], sizes = [1, 128], strides = [1, 1]} : vector<49x128xf32> to vector<1x128xf32>
    %339 = vector.broadcast %338 : vector<1x128xf32> to vector<16x128xf32>
    %340 = arith.mulf %337, %339 : vector<16x128xf32>
    %341 = arith.addf %336, %340 : vector<16x128xf32>
    %c15_143 = arith.constant 15 : index
    %c24_144 = arith.constant 24 : index
    %342 = vector.load %arg9[%c15_143, %c24_144] : memref<34x272xf32, #tpu.memory_space<vmem>>, vector<16x128xf32>
    %343 = vector.extract_strided_slice %1 {offsets = [36, 0], sizes = [1, 128], strides = [1, 1]} : vector<49x128xf32> to vector<1x128xf32>
    %344 = vector.broadcast %343 : vector<1x128xf32> to vector<16x128xf32>
    %345 = arith.mulf %342, %344 : vector<16x128xf32>
    %346 = arith.addf %341, %345 : vector<16x128xf32>
    %c15_145 = arith.constant 15 : index
    %c48_146 = arith.constant 48 : index
    %347 = vector.load %arg9[%c15_145, %c48_146] : memref<34x272xf32, #tpu.memory_space<vmem>>, vector<16x128xf32>
    %348 = vector.extract_strided_slice %1 {offsets = [37, 0], sizes = [1, 128], strides = [1, 1]} : vector<49x128xf32> to vector<1x128xf32>
    %349 = vector.broadcast %348 : vector<1x128xf32> to vector<16x128xf32>
    %350 = arith.mulf %347, %349 : vector<16x128xf32>
    %351 = arith.addf %346, %350 : vector<16x128xf32>
    %c15_147 = arith.constant 15 : index
    %c72_148 = arith.constant 72 : index
    %352 = vector.load %arg9[%c15_147, %c72_148] : memref<34x272xf32, #tpu.memory_space<vmem>>, vector<16x128xf32>
    %353 = vector.extract_strided_slice %1 {offsets = [38, 0], sizes = [1, 128], strides = [1, 1]} : vector<49x128xf32> to vector<1x128xf32>
    %354 = vector.broadcast %353 : vector<1x128xf32> to vector<16x128xf32>
    %355 = arith.mulf %352, %354 : vector<16x128xf32>
    %356 = arith.addf %351, %355 : vector<16x128xf32>
    %c15_149 = arith.constant 15 : index
    %c96_150 = arith.constant 96 : index
    %357 = vector.load %arg9[%c15_149, %c96_150] : memref<34x272xf32, #tpu.memory_space<vmem>>, vector<16x128xf32>
    %358 = vector.extract_strided_slice %1 {offsets = [39, 0], sizes = [1, 128], strides = [1, 1]} : vector<49x128xf32> to vector<1x128xf32>
    %359 = vector.broadcast %358 : vector<1x128xf32> to vector<16x128xf32>
    %360 = arith.mulf %357, %359 : vector<16x128xf32>
    %361 = arith.addf %356, %360 : vector<16x128xf32>
    %c15_151 = arith.constant 15 : index
    %c120_152 = arith.constant 120 : index
    %362 = vector.load %arg9[%c15_151, %c120_152] : memref<34x272xf32, #tpu.memory_space<vmem>>, vector<16x128xf32>
    %363 = vector.extract_strided_slice %1 {offsets = [40, 0], sizes = [1, 128], strides = [1, 1]} : vector<49x128xf32> to vector<1x128xf32>
    %364 = vector.broadcast %363 : vector<1x128xf32> to vector<16x128xf32>
    %365 = arith.mulf %362, %364 : vector<16x128xf32>
    %366 = arith.addf %361, %365 : vector<16x128xf32>
    %c15_153 = arith.constant 15 : index
    %c144_154 = arith.constant 144 : index
    %367 = vector.load %arg9[%c15_153, %c144_154] : memref<34x272xf32, #tpu.memory_space<vmem>>, vector<16x128xf32>
    %368 = vector.extract_strided_slice %1 {offsets = [41, 0], sizes = [1, 128], strides = [1, 1]} : vector<49x128xf32> to vector<1x128xf32>
    %369 = vector.broadcast %368 : vector<1x128xf32> to vector<16x128xf32>
    %370 = arith.mulf %367, %369 : vector<16x128xf32>
    %371 = arith.addf %366, %370 : vector<16x128xf32>
    %c18 = arith.constant 18 : index
    %c0_155 = arith.constant 0 : index
    %372 = vector.load %arg9[%c18, %c0_155] : memref<34x272xf32, #tpu.memory_space<vmem>>, vector<16x128xf32>
    %373 = vector.extract_strided_slice %1 {offsets = [42, 0], sizes = [1, 128], strides = [1, 1]} : vector<49x128xf32> to vector<1x128xf32>
    %374 = vector.broadcast %373 : vector<1x128xf32> to vector<16x128xf32>
    %375 = arith.mulf %372, %374 : vector<16x128xf32>
    %376 = arith.addf %371, %375 : vector<16x128xf32>
    %c18_156 = arith.constant 18 : index
    %c24_157 = arith.constant 24 : index
    %377 = vector.load %arg9[%c18_156, %c24_157] : memref<34x272xf32, #tpu.memory_space<vmem>>, vector<16x128xf32>
    %378 = vector.extract_strided_slice %1 {offsets = [43, 0], sizes = [1, 128], strides = [1, 1]} : vector<49x128xf32> to vector<1x128xf32>
    %379 = vector.broadcast %378 : vector<1x128xf32> to vector<16x128xf32>
    %380 = arith.mulf %377, %379 : vector<16x128xf32>
    %381 = arith.addf %376, %380 : vector<16x128xf32>
    %c18_158 = arith.constant 18 : index
    %c48_159 = arith.constant 48 : index
    %382 = vector.load %arg9[%c18_158, %c48_159] : memref<34x272xf32, #tpu.memory_space<vmem>>, vector<16x128xf32>
    %383 = vector.extract_strided_slice %1 {offsets = [44, 0], sizes = [1, 128], strides = [1, 1]} : vector<49x128xf32> to vector<1x128xf32>
    %384 = vector.broadcast %383 : vector<1x128xf32> to vector<16x128xf32>
    %385 = arith.mulf %382, %384 : vector<16x128xf32>
    %386 = arith.addf %381, %385 : vector<16x128xf32>
    %c18_160 = arith.constant 18 : index
    %c72_161 = arith.constant 72 : index
    %387 = vector.load %arg9[%c18_160, %c72_161] : memref<34x272xf32, #tpu.memory_space<vmem>>, vector<16x128xf32>
    %388 = vector.extract_strided_slice %1 {offsets = [45, 0], sizes = [1, 128], strides = [1, 1]} : vector<49x128xf32> to vector<1x128xf32>
    %389 = vector.broadcast %388 : vector<1x128xf32> to vector<16x128xf32>
    %390 = arith.mulf %387, %389 : vector<16x128xf32>
    %391 = arith.addf %386, %390 : vector<16x128xf32>
    %c18_162 = arith.constant 18 : index
    %c96_163 = arith.constant 96 : index
    %392 = vector.load %arg9[%c18_162, %c96_163] : memref<34x272xf32, #tpu.memory_space<vmem>>, vector<16x128xf32>
    %393 = vector.extract_strided_slice %1 {offsets = [46, 0], sizes = [1, 128], strides = [1, 1]} : vector<49x128xf32> to vector<1x128xf32>
    %394 = vector.broadcast %393 : vector<1x128xf32> to vector<16x128xf32>
    %395 = arith.mulf %392, %394 : vector<16x128xf32>
    %396 = arith.addf %391, %395 : vector<16x128xf32>
    %c18_164 = arith.constant 18 : index
    %c120_165 = arith.constant 120 : index
    %397 = vector.load %arg9[%c18_164, %c120_165] : memref<34x272xf32, #tpu.memory_space<vmem>>, vector<16x128xf32>
    %398 = vector.extract_strided_slice %1 {offsets = [47, 0], sizes = [1, 128], strides = [1, 1]} : vector<49x128xf32> to vector<1x128xf32>
    %399 = vector.broadcast %398 : vector<1x128xf32> to vector<16x128xf32>
    %400 = arith.mulf %397, %399 : vector<16x128xf32>
    %401 = arith.addf %396, %400 : vector<16x128xf32>
    %c18_166 = arith.constant 18 : index
    %c144_167 = arith.constant 144 : index
    %402 = vector.load %arg9[%c18_166, %c144_167] : memref<34x272xf32, #tpu.memory_space<vmem>>, vector<16x128xf32>
    %403 = vector.extract_strided_slice %1 {offsets = [48, 0], sizes = [1, 128], strides = [1, 1]} : vector<49x128xf32> to vector<1x128xf32>
    %404 = vector.broadcast %403 : vector<1x128xf32> to vector<16x128xf32>
    %405 = arith.mulf %402, %404 : vector<16x128xf32>
    %406 = arith.addf %401, %405 : vector<16x128xf32>
    %c0_168 = arith.constant 0 : index
    %c0_169 = arith.constant 0 : index
    %407 = vector.load %arg6[%c0_168, %c0_169] : memref<128x128xf32, #tpu.memory_space<vmem>>, vector<128x128xf32>
    %cst_170 = arith.constant dense<0.000000e+00> : vector<16x128xf32>
    %408 = tpu.matmul %406, %407, %cst_170 {dimension_numbers = #tpu.dot_dimension_numbers<[1], [0], [0], [1], [0, 0, 1, 1], [], []>} : vector<16x128xf32>, vector<128x128xf32>, vector<16x128xf32> -> vector<16x128xf32>
    %409 = vector.broadcast %4 : vector<1x128xf32> to vector<16x128xf32>
    %410 = arith.addf %408, %409 : vector<16x128xf32>
    %c0_171 = arith.constant 0 : index
    %c2_172 = arith.constant 2 : index
    %c16_173 = arith.constant 16 : index
    %411 = vector.load %arg1[%c0_171, %c2_172, %c16_173] : memref<1x20x160xf32, #tpu.memory_space<vmem>>, vector<1x16x128xf32>
    %412 = vector.shape_cast %411 : vector<1x16x128xf32> to vector<16x128xf32>
    %413 = arith.mulf %412, %410 : vector<16x128xf32>
    %c0_174 = arith.constant 0 : index
    %c0_175 = arith.constant 0 : index
    %c0_176 = arith.constant 0 : index
    %414 = vector.load %arg8[%c0_174, %c0_175, %c0_176] : memref<1x16x128xf32, #tpu.memory_space<vmem>>, vector<1x16x128xf32>
    %415 = vector.shape_cast %414 : vector<1x16x128xf32> to vector<16x128xf32>
    %416 = vector.shape_cast %413 : vector<16x128xf32> to vector<1x16x128xf32>
    tpu.vector_store %arg8[%c0_174, %c0_175, %c0_176], %416 {strides = array<i32>} : memref<1x16x128xf32, #tpu.memory_space<vmem>>, vector<1x16x128xf32>,
    return
  }
  func.func @transform_0(%arg0: i32) -> (i32, i32, i32) {
    %c0_i32 = arith.constant 0 : i32
    %c0_i32_0 = arith.constant 0 : i32
    %c0_i32_1 = arith.constant 0 : i32
    return %arg0, %c0_i32, %c0_i32_0 : i32, i32, i32
  }
  func.func @transform_1(%arg0: i32) -> (i32, i32) {
    %c0_i32 = arith.constant 0 : i32
    %c0_i32_0 = arith.constant 0 : i32
    %c0_i32_1 = arith.constant 0 : i32
    return %c0_i32, %c0_i32_0 : i32, i32
  }
  func.func @transform_2(%arg0: i32) -> (i32, i32) {
    %c0_i32 = arith.constant 0 : i32
    %c0_i32_0 = arith.constant 0 : i32
    %c0_i32_1 = arith.constant 0 : i32
    return %c0_i32, %c0_i32_0 : i32, i32
  }
  func.func @transform_3(%arg0: i32) -> (i32, i32) {
    %c0_i32 = arith.constant 0 : i32
    %c0_i32_0 = arith.constant 0 : i32
    %c0_i32_1 = arith.constant 0 : i32
    return %c0_i32, %c0_i32_0 : i32, i32
  }
  func.func @transform_4(%arg0: i32) -> (i32, i32) {
    %c0_i32 = arith.constant 0 : i32
    %c0_i32_0 = arith.constant 0 : i32
    %c0_i32_1 = arith.constant 0 : i32
    return %c0_i32, %c0_i32_0 : i32, i32
  }
  func.func @transform_5(%arg0: i32) -> (i32, i32) {
    %c0_i32 = arith.constant 0 : i32
    %c0_i32_0 = arith.constant 0 : i32
    %c0_i32_1 = arith.constant 0 : i32
    return %c0_i32, %c0_i32_0 : i32, i32
  }
  func.func @transform_6(%arg0: i32) -> (i32, i32) {
    %c0_i32 = arith.constant 0 : i32
    %c0_i32_0 = arith.constant 0 : i32
    %c0_i32_1 = arith.constant 0 : i32
    return %c0_i32, %c0_i32_0 : i32, i32
  }
  func.func @transform_7(%arg0: i32) -> (i32, i32, i32) {
    %c0_i32 = arith.constant 0 : i32
    %c0_i32_0 = arith.constant 0 : i32
    %c0_i32_1 = arith.constant 0 : i32
    return %arg0, %c0_i32, %c0_i32_0 : i32, i32, i32
  }
}

</mosaic_0001>

<bundles_post_ra>
// kernel: tpu_custom_call.1
= control target key start
LH: loop header
LB: loop body
LE: loop exit
PB: predicated region body
PF: predicated region fallthrough
CT: control target
= control target key end

     0   :  { %12 = vsyncpa [#allocation4], 0  ;;  %s5598_s0 = inlined_call_operand.vmem [shape: f32[2,20,160], index: 0, kind: input, shape index: {}]   ;;  %s5599_s1 = inlined_call_operand.vmem [shape: f32[25,128], index: 1, kind: input, shape index: {}]   ;;  %s5600_s2 = inlined_call_operand.vmem [shape: f32[1,128], index: 2, kind: input, shape index: {}]   ;;  %s5601_s3 = inlined_call_operand.hbm [shape: f32[49,128], index: 3, kind: input, shape index: {}]   ;;  %s5602_s4 = inlined_call_operand.vmem [shape: f32[1,128], index: 4, kind: input, shape index: {}]   ;;  %s5603_s5 = inlined_call_operand.vmem [shape: f32[128,128], index: 5, kind: input, shape index: {}]   ;;  %s5604_s6 = inlined_call_operand.vmem [shape: f32[1,128], index: 6, kind: input, shape index: {}]   ;;  %s5605_s7 = inlined_call_operand.hbm [shape: f32[2,16,128], index: 7, kind: output, shape index: {}]  }
   0x1   :  { %13 = vsyncpa [#allocation5], 0 }
   0x2   :  { %15 = vsyncpa [#allocation5 + $0x1], 0  ;;  %s3464_s24 = smov 0   ;;  %s3466_s25 = smov 0  }
   0x3   :  { %s3468_s26 = smov 0   ;;  %s3470_s27 = smov 0  }
   0x4 LB: > { %s3485_s28 = sadd.s32 4294967295, %s3405_s27   ;;  %s3196_s29 = sadd.s32 4294967294, %s3405_s27   ;;  %s3405_s27 = sphi %s3470_s27, %s5687_s27   ;;  %s3401_s26 = sphi %s3468_s26, %s5686_s26   ;;  %s3397_s25 = sphi %s3466_s25, %s5685_s25   ;;  %s3393_s24 = sphi %s3464_s24, %s5684_s24  }
   0x5   : > { %s3489_s30 = sadd.s32 1, %s3405_s27   ;;  %s180_s8 = sadd.s32 1, %s3401_s26 }
   0x6   : > { %s177_s9 = ssub.s32 %s3405_s27, %s3489_s30  ;;  %p190_p0 = scmp.ne.s32.totalorder %s3401_s26, %s3397_s25 }
   0x7   : > { %p178_p1 = scmp.eq.s32.totalorder %s177_s9, 0  ;;  %p191_p2 = scmp.eq.s32.totalorder %s3485_s28, 1 }
   0x8   : > { %p196_p3 = scmp.ne.s32.totalorder %s3397_s25, %s3393_s24  ;;  %p197_p4 = scmp.eq.s32.totalorder %s3196_s29, 1 }
   0x9   : > { %s3500_s10 = scalar_select %p178_p1, %s3401_s26, %s180_s8  }
   0xa   : > { %p3502_p5 = por %p191_p2, %p190_p0  ;;  %p3506_p6 = por %p197_p4, %p196_p3 }
   0xb   : > { %p3197_p7 = scmp.ge.s32.totalorder %s3405_s27, 1  ;;  %p204_p8 = scmp.lt.s32.totalorder %s3405_s27, 3 }
   0xc   : > { %p3241_p9 = scmp.eq.s32.totalorder %s3485_s28, 0  ;;  %s221_s15 = sshll.u32 %s5601_s3, 4  ;;  %s222_s15 = int_to_ptr.hbm [resolvable:$true] %s221_s15 }
   0xd   : > { %p205_p10 = pnand %p3197_p7, %p204_p8  ;;  %s3407_s16 = smov [#allocation3]  }
   0xe   : > { %s223_s17 = sshll.u32 %s3407_s16, 4  ;;  %s3408_s18 = smov 128   ;;  %s224_s17 = int_to_ptr.vmem [resolvable:$true] %s223_s17 }
   0xf   : > { %p3233_p11 = pneg %p205_p10  ;;  %s3409_s19 = smov 8  }
  0x10   : > { %256 = sbr.rel (%p205_p10) target bundleno = 4156 (0x103c), region = 48 }
  0x11   : > { %p3234_p12 = pnand %p3241_p9, %p3233_p11 }
  0x13   : > { %3236 = dma.hbm_to_vmem [thread:$0]  (!%p3234_p12), %s222_s15, 896, %s224_s17, [#allocation4], %s3408_s18, %s3408_s18, %s3409_s19  }
  0x15   : > { %3384 = dma.done.wait (%p3241_p9), [#allocation4], 896  }
  0x16   : > { %3386 = vsyncadd (%p3241_p9), [#allocation4], 4294966400  ;;  %v3525_v0 = vld [vmem:[%s5599_s1] sm:$0xff]  ;;  %s3410_s22 = smov 8   ;;  %s3411_s23 = smov 24   ;;  %v3542_v7 = vld [vmem:[%s5599_s1 + $0x8] sm:$0xff] }
  0x17   : > { %v320_v1 = vperm.slane %v3525_v0, 1  ;;  %v376_v2 = vperm.slane %v3525_v0, 3  ;;  %v348_v3 = vperm.slane %v3525_v0, 2  ;;  %s3412_s29 = smov 16   ;;  %v404_v4 = vperm.slane %v3525_v0, 4  ;;  %s3413_s8 = smov 32  }
  0x18   : > { %v494_v5 = vperm.slane %v3525_v0, 7  ;;  %v453_v6 = vperm.slane %v3525_v0, 6  ;;  %v535_v8 = vperm.slane %v3542_v7, 0  ;;  %v638_v9 = vperm.slane %v3542_v7, 3  ;;  %p289_p13 = scmp.lt.s32.totalorder %s3485_s28, 1  ;;  %s3414_s19 = smov 120  }
  0x19   : > { %322 = vrot.lane.b32.xlu0 %v320_v1, %s3410_s22  ;;  %378 = vrot.lane.b32.xlu1 %v376_v2, %s3411_s23  ;;  %v576_v10 = vperm.slane %v3542_v7, 1  ;;  %v679_v11 = vperm.slane %v3542_v7, 4  ;;  %v720_v12 = vperm.slane %v3542_v7, 5  ;;  %s3415_s20 = smov 112   ;;  %s3416_s21 = smov 104   ;;  %vm441_vm0 = vcmask 1046528  }
  0x1a   : > { %350 = vrot.lane.b32.xlu2 %v348_v3, %s3412_s29  ;;  %s290_s14 = scalar_select %p289_p13, %s3485_s28, 1  ;;  %vm626_vm1 = vcmask 1045504   ;;  %vm341_vm2 = vcmask 982016   ;;  %vm369_vm3 = vcmask 916480   ;;  %vm397_vm4 = vcmask 850944  }
  0x1b   : > { %s5614_s9 = smov 96   ;;  %vm425_vm5 = vcmask 785408   ;;  %vm811_vm6 = vcmask 1044480   ;;  %vm996_vm7 = vcmask 1043456   ;;  %vm1191_vm8 = vcmask 1040384   ;;  %s3421_s16 = smov 80  }
  0x1c   : > { %s3226_s15 = smul.u32 48, %s290_s14  ;;  %s3419_s14 = smov 48   ;;  %vm1212_vm9 = vcmask 1040960   ;;  %vm1214_vm10 = vcmask 581632   ;;  %vm1208_vm11 = vcmask 1048128   ;;  %vm1210_vm12 = vcmask 588800  }
  0x1d   : > { %s3422_s17 = smov 56   ;;  %vm1204_vm13 = vcmask 1048129   ;;  %vm1206_vm14 = vcmask 588801   ;;  %vm1174_vm15 = vcmask 130048  }
  0x1e   : > { %s3559_s18 = scalar_lea.vmem %s5598_s0, %s3226_s15  ;;  %s3420_s15 = smov 72  }
  0x1f   : > { %v3562_v13 = vld [vmem:[%s3559_s18 + $0x18] sm:$0xff]  ;;  %v318_v14 = vld [vmem:[%s3559_s18 + $0x8] sm:$0xff]  ;;  %v3566_v15 = vld [vmem:[%s3559_s18] sm:$0xff] }
  0x20   : > { %v3574_v21 = vld [vmem:[%s3559_s18 + $0x10] sm:$0xff]  ;;  %v3593_v34 = vld [vmem:[%s3559_s18 + $0x20] sm:$0x1]  ;;  %v3596_v35 = vld [vmem:[%s3559_s18] sm:$0xfe] }
  0x21   : > { %406 = vrot.lane.b32.xlu0 %v404_v4, %s3413_s8  ;;  %496 = vrot.lane.b32.xlu1 %v494_v5, %s3412_s29  ;;  %v3607_v46 = vld [vmem:[%s3559_s18 + $0x8] sm:$0xfe]  ;;  %v3610_v47 = vld [vmem:[%s3559_s18 + $0x28] sm:$0x1] }
  0x22   : > { %455 = vrot.lane.b32.xlu2 %v453_v6, %s3410_s22 }
  0x29   : > { %537 = vrot.lane.b32.xlu0 %v535_v8, %s3411_s23  ;;  %640 = vrot.lane.b32.xlu1 %v638_v9, %s3410_s22 }
  0x2a   : > { %578 = vrot.lane.b32.xlu2 %v576_v10, %s3413_s8 }
  0x31   : > { %681 = vrot.lane.b32.xlu0 %v679_v11, %s3412_s29 }
  0x32   : > { %722 = vrot.lane.b32.xlu2 %v720_v12, %s3411_s23 }
  0x74   : > { %v351_v20 = vpop.permute.xlu2 %350 }
  0x75   : > { %v355_v22 = vmul.f32 %v351_v20, %v3574_v21  ;;  %v353_v23 = vmul.f32 %v351_v20, %v3566_v15  ;;  %v354_v27 = vmul.f32 %v351_v20, %v318_v14  ;;  %v356_v28 = vmul.f32 %v351_v20, %v3562_v13 }
  0x7c   : > { %v456_v33 = vpop.permute.xlu2 %455 }
  0x7d   : > { %v460_v38 = vmul.f32 %v456_v33, %v3574_v21  ;;  %v462_v39 = vmul.f32 %v456_v33, %v3593_v34  ;;  %v458_v41 = vmul.f32 %v456_v33, %v3596_v35  ;;  %v461_v49 = vmul.f32 %v456_v33, %v3562_v13 }
  0x7e   : > { %v459_v52 = vmul.f32 %v456_v33, %v3607_v46  ;;  %v463_v55 = vmul.f32 %v456_v33, %v3610_v47 }
  0x7f   : > { %v471_v42 = vrot.slane %v460_v38, 1  ;;  %v476_v43 = vrot.slane %v462_v39, 1  ;;  %v470_v44 = vrot.slane %v458_v41, 1  ;;  %v474_v56 = vrot.slane %v461_v49, 1 }
  0x80   : > { %v473_v59 = vrot.slane %v459_v52, 1  ;;  %v478_v60 = vrot.slane %v463_v55, 1 }
  0x81   : > { %v477_v48 = vsel %vm441_vm0, %v471_v42, %v476_v43  ;;  %v472_v53 = vsel %vm441_vm0, %v470_v44, %v471_v42 }
  0x82   : > { %v475_v2 = vsel %vm441_vm0, %v473_v59, %v474_v56  ;;  %v479_v3 = vsel %vm441_vm0, %v474_v56, %v478_v60  ;;  %v3669_v56 = vld [vmem:[%s3559_s18 + $0x28] sm:$0x3] }
  0x8b   : > { %v323_v16 = vpop.permute.xlu0 %322  ;;  %v379_v25 = vpop.permute.xlu1 %378 }
  0x8c   : > { %v328_v17 = vmul.f32 %v323_v16, %v3562_v13  ;;  %v326_v18 = vmul.f32 %v323_v16, %v318_v14  ;;  %v325_v19 = vmul.f32 %v323_v16, %v3566_v15  ;;  %v327_v24 = vmul.f32 %v323_v16, %v3574_v21 }
  0x8d   : > { %v381_v26 = vmul.f32 %v379_v25, %v3566_v15  ;;  %v384_v29 = vmul.f32 %v379_v25, %v3562_v13  ;;  %v383_v30 = vmul.f32 %v379_v25, %v3574_v21  ;;  %v382_v31 = vmul.f32 %v379_v25, %v318_v14 }
  0x8e   : > { %339 = vrot.lane.b32.xlu2 %v328_v17, %s3414_s19  ;;  %335 = vrot.lane.b32.xlu1 %v326_v18, %s3414_s19 }
  0x8f   : > { %333 = vrot.lane.b32.xlu0 %v325_v19, %s3414_s19 }
  0x93   : > { %v407_v32 = vpop.permute.xlu0 %406  ;;  %v497_v45 = vpop.permute.xlu1 %496 }
  0x94   : > { %v410_v36 = vmul.f32 %v407_v32, %v318_v14  ;;  %v409_v37 = vmul.f32 %v407_v32, %v3566_v15  ;;  %v411_v40 = vmul.f32 %v407_v32, %v3574_v21  ;;  %v499_v50 = vmul.f32 %v497_v45, %v3596_v35 }
  0x95   : > { %v501_v51 = vmul.f32 %v497_v45, %v3574_v21  ;;  %v412_v54 = vmul.f32 %v407_v32, %v3562_v13  ;;  %v502_v61 = vmul.f32 %v497_v45, %v3562_v13  ;;  %v504_v62 = vmul.f32 %v497_v45, %v3610_v47 }
  0x96   : > { %365 = vrot.lane.b32.xlu2 %v355_v22, %s3415_s20  ;;  %337 = vrot.lane.b32.xlu1 %v327_v24, %s3414_s19  ;;  %v511_v57 = vrot.slane %v499_v50, 1  ;;  %v503_v63 = vmul.f32 %v497_v45, %v3593_v34  ;;  %v500_v4 = vmul.f32 %v497_v45, %v3607_v46 }
  0x97   : > { %361 = vrot.lane.b32.xlu0 %v353_v23, %s3415_s20  ;;  %v512_v58 = vrot.slane %v501_v51, 1  ;;  %v515_v5 = vrot.slane %v502_v61, 1  ;;  %v519_v6 = vrot.slane %v504_v62, 1 }
  0x98   : > { %v517_v8 = vrot.slane %v503_v63, 1  ;;  %v514_v9 = vrot.slane %v500_v4, 1 }
  0x99   : > { %v513_v1 = vsel %vm441_vm0, %v511_v57, %v512_v58  ;;  %v520_v11 = vsel %vm441_vm0, %v515_v5, %v519_v6  ;;  %v3672_v57 = vld [vmem:[%s3559_s18 + $0x20] sm:$0x3] }
  0x9a   : > { %v518_v12 = vsel %vm441_vm0, %v512_v58, %v517_v8  ;;  %v516_v19 = vsel %vm441_vm0, %v514_v9, %v515_v5  ;;  %v3675_v58 = vld [vmem:[%s3559_s18 + $0x8] sm:$0xfc]  ;;  %v3691_v6 = vld [vmem:[%s5600_s2] ss:$0 sm:$0xff] }
  0x9b   : > { %v538_v10 = vpop.permute.xlu0 %537  ;;  %v641_v39 = vpop.permute.xlu1 %640 }
  0x9c   : > { %v542_v14 = vmul.f32 %v538_v10, %v3574_v21  ;;  %v541_v16 = vmul.f32 %v538_v10, %v3607_v46  ;;  %v543_v17 = vmul.f32 %v538_v10, %v3562_v13  ;;  %v540_v18 = vmul.f32 %v538_v10, %v3596_v35 }
  0x9d   : > { %v544_v20 = vmul.f32 %v538_v10, %v3593_v34  ;;  %v645_v45 = vmul.f32 %v641_v39, %v3574_v21  ;;  %v648_v59 = vmul.f32 %v641_v39, %v3669_v56  ;;  %v647_v60 = vmul.f32 %v641_v39, %v3672_v57 }
  0x9e   : > { %389 = vrot.lane.b32.xlu2 %v381_v26, %s3416_s21  ;;  %363 = vrot.lane.b32.xlu1 %v354_v27, %s3415_s20  ;;  %v553_v22 = vrot.slane %v542_v14, 1  ;;  %v555_v23 = vrot.slane %v541_v16, 1  ;;  %v556_v24 = vrot.slane %v543_v17, 1  ;;  %v552_v25 = vrot.slane %v540_v18, 1  ;;  %v579_v27 = vpop.permute.xlu2 %578 }
  0x9f   : > { %367 = vrot.lane.b32.xlu0 %v356_v28, %s3415_s20  ;;  %v558_v26 = vrot.slane %v544_v20, 1  ;;  %v581_v33 = vmul.f32 %v579_v27, %v3596_v35  ;;  %v586_v50 = vmul.f32 %v579_v27, %v3610_v47  ;;  %v663_v4 = vrot.slane %v648_v59, 2 }
  0xa0   : > { %v557_v28 = vsel %vm441_vm0, %v555_v23, %v556_v24  ;;  %v661_v5 = vrot.slane %v647_v60, 2 }
  0xa1   : > { %v559_v32 = vsel %vm441_vm0, %v553_v22, %v558_v26  ;;  %v593_v41 = vrot.slane %v581_v33, 1 }
  0xa6   : > { %395 = vrot.lane.b32.xlu2 %v384_v29, %s3416_s21  ;;  %393 = vrot.lane.b32.xlu1 %v383_v30, %s3416_s21  ;;  %v554_v29 = vsel %vm441_vm0, %v552_v25, %v553_v22  ;;  %v583_v30 = vmul.f32 %v579_v27, %v3574_v21 }
  0xa7   : > { %391 = vrot.lane.b32.xlu0 %v382_v31, %s3416_s21  ;;  %v585_v31 = vmul.f32 %v579_v27, %v3593_v34  ;;  %v584_v34 = vmul.f32 %v579_v27, %v3562_v13 }
  0xa9   : > { %v599_v38 = vrot.slane %v585_v31, 1  ;;  %v597_v52 = vrot.slane %v584_v34, 1 }
  0xae   : > { %419 = vrot.lane.b32.xlu2 %v410_v36, %s5614_s9  ;;  %417 = vrot.lane.b32.xlu1 %v409_v37, %s5614_s9  ;;  %v545_v36 = vmul.f32 %v538_v10, %v3610_v47  ;;  %v594_v37 = vrot.slane %v583_v30, 1  ;;  %v646_v47 = vmul.f32 %v641_v39, %v3562_v13  ;;  %v682_v10 = vpop.permute.xlu0 %681 }
  0xaf   : > { %421 = vrot.lane.b32.xlu0 %v411_v40, %s5614_s9  ;;  %v3655_v40 = vld [vmem:[%s3559_s18] sm:$0xfc]  ;;  %v686_v16 = vmul.f32 %v682_v10, %v3574_v21  ;;  %v685_v17 = vmul.f32 %v682_v10, %v3675_v58  ;;  %v687_v18 = vmul.f32 %v682_v10, %v3562_v13 }
  0xb0   : > { %v560_v42 = vrot.slane %v545_v36, 1  ;;  %v643_v43 = vmul.f32 %v641_v39, %v3655_v40  ;;  %v600_v44 = vsel %vm441_vm0, %v594_v37, %v599_v38  ;;  %v595_v49 = vsel %vm441_vm0, %v593_v41, %v594_v37 }
  0xb1   : > { %v697_v22 = vrot.slane %v686_v16, 2  ;;  %v699_v23 = vrot.slane %v685_v17, 2  ;;  %v689_v36 = vmul.f32 %v682_v10, %v3669_v56 }
  0xb2   : > { %v561_v51 = vsel %vm441_vm0, %v556_v24, %v560_v42  ;;  %v700_v24 = vrot.slane %v687_v18, 2 }
  0xb3   : > { %v704_v41 = vrot.slane %v689_v36, 2 }
  0xb6   : > { %484 = vrot.lane.b32.xlu2 %v477_v48, %s3414_s19  ;;  %423 = vrot.lane.b32.xlu1 %v412_v54, %s5614_s9  ;;  %v582_v48 = vmul.f32 %v579_v27, %v3607_v46  ;;  %v656_v54 = vrot.slane %v645_v45, 2  ;;  %v601_v46 = vrot.slane %v586_v50, 1  ;;  %v723_v27 = vpop.permute.xlu2 %722 }
  0xb7   : > { %480 = vrot.lane.b32.xlu0 %v472_v53, %s3414_s19  ;;  %v655_v53 = vrot.slane %v643_v43, 2  ;;  %v729_v30 = vmul.f32 %v723_v27, %v3672_v57  ;;  %v727_v33 = vmul.f32 %v723_v27, %v3574_v21  ;;  %v728_v42 = vmul.f32 %v723_v27, %v3562_v13 }
  0xb8   : > { %v596_v55 = vrot.slane %v582_v48, 1  ;;  %v602_v63 = vsel %vm441_vm0, %v597_v52, %v601_v46  ;;  %v662_v14 = vsel %vm626_vm1, %v656_v54, %v661_v5  ;;  %v726_v43 = vmul.f32 %v723_v27, %v3675_v58 }
  0xb9   : > { %v657_v61 = vsel %vm626_vm1, %v655_v53, %v656_v54  ;;  %v743_v37 = vrot.slane %v729_v30, 2  ;;  %v730_v45 = vmul.f32 %v723_v27, %v3669_v56  ;;  %v705_v48 = vsel %vm626_vm1, %v700_v24, %v704_v41 }
  0xba   : > { %v598_v62 = vsel %vm441_vm0, %v596_v55, %v597_v52  ;;  %v740_v50 = vrot.slane %v726_v43, 2  ;;  %v3735_v55 = vperm.slane %v3525_v0, 5 }
  0xbb   : > { %v745_v52 = vrot.slane %v730_v45, 2 }
  0xbc   : > { %v3742_v59 = vmul.f32 %v3735_v55, %v3574_v21 }
  0xbe   : > { %521 = vrot.lane.b32.xlu2 %v513_v1, %s3415_s20  ;;  %482 = vrot.lane.b32.xlu1 %v475_v2, %s3414_s19  ;;  %v644_v1 = vmul.f32 %v641_v39, %v3675_v58  ;;  %v5609_v2 = vperm.slane %v3525_v0, 0  ;;  %v738_v39 = vrot.slane %v727_v33, 2 }
  0xbf   : > { %486 = vrot.lane.b32.xlu0 %v479_v3, %s3414_s19  ;;  %v659_v3 = vrot.slane %v646_v47, 2  ;;  %v435_v47 = vmul.f32 %v3735_v55, %v3596_v35 }
  0xc0   : > { %v314_v8 = vmul.f32 %v5609_v2, %v3566_v15  ;;  %v658_v9 = vrot.slane %v644_v1, 2  ;;  %v688_v15 = vmul.f32 %v682_v10, %v3672_v57  ;;  %v744_v34 = vsel %vm626_vm1, %v738_v39, %v743_v37 }
  0xc1   : > { %v5608_v1 = vrot.slane %v3742_v59, 1 }
  0xc2   : > { %v660_v20 = vsel %vm626_vm1, %v658_v9, %v659_v3  ;;  %v702_v26 = vrot.slane %v688_v15, 2 }
  0xc4   : > { %v703_v31 = vsel %vm626_vm1, %v697_v22, %v702_v26 }
  0xc6   : > { %527 = vrot.lane.b32.xlu2 %v520_v11, %s3415_s20  ;;  %525 = vrot.lane.b32.xlu1 %v518_v12, %s3415_s20  ;;  %v3697_v11 = vadd.f32 %v3691_v6, %v314_v8  ;;  %v664_v12 = vsel %vm626_vm1, %v659_v3, %v663_v4 }
  0xc7   : > { %523 = vrot.lane.b32.xlu0 %v516_v19, %s3415_s20  ;;  %v684_v19 = vmul.f32 %v682_v10, %v3655_v40 }
  0xc9   : > { %v696_v25 = vrot.slane %v684_v19, 2 }
  0xce   : > { %564 = vrot.lane.b32.xlu2 %v557_v28, %s3416_s21  ;;  %562 = vrot.lane.b32.xlu1 %v554_v29, %s3416_s21  ;;  %v701_v28 = vsel %vm626_vm1, %v699_v23, %v700_v24  ;;  %v698_v29 = vsel %vm626_vm1, %v696_v25, %v697_v22 }
  0xcf   : > { %566 = vrot.lane.b32.xlu0 %v559_v32, %s3416_s21  ;;  %v725_v32 = vmul.f32 %v723_v27, %v3655_v40 }
  0xd1   : > { %v737_v38 = vrot.slane %v725_v32, 2 }
  0xd6   : > { %607 = vrot.lane.b32.xlu2 %v600_v44, %s5614_s9  ;;  %568 = vrot.lane.b32.xlu1 %v561_v51, %s3416_s21  ;;  %v739_v44 = vsel %vm626_vm1, %v737_v38, %v738_v39 }
  0xd7   : > { %603 = vrot.lane.b32.xlu0 %v595_v49, %s5614_s9  ;;  %v741_v49 = vrot.slane %v728_v42, 2 }
  0xd9   : > { %v742_v53 = vsel %vm626_vm1, %v740_v50, %v741_v49  ;;  %v746_v54 = vsel %vm626_vm1, %v741_v49, %v745_v52 }
  0xde   : > { %665 = vrot.lane.b32.xlu2 %v657_v61, %s3414_s19  ;;  %605 = vrot.lane.b32.xlu1 %v598_v62, %s5614_s9  ;;  %v761_v62 = vperm.slane %v3542_v7, 6 }
  0xdf   : > { %609 = vrot.lane.b32.xlu0 %v602_v63, %s5614_s9  ;;  %v442_v63 = vrot.slane %v435_v47, 1 }
  0xe1   : > { %v444_v3 = vsel %vm441_vm0, %v442_v63, %v5608_v1 }
  0xe6   : > { %671 = vrot.lane.b32.xlu2 %v664_v12, %s3414_s19  ;;  %669 = vrot.lane.b32.xlu1 %v662_v14, %s3414_s19 }
  0xe7   : > { %667 = vrot.lane.b32.xlu0 %v660_v20, %s3414_s19 }
  0xe8   : > { %v3729_v51 = vpop.permute.xlu2 %339 }
  0xee   : > { %708 = vrot.lane.b32.xlu2 %v701_v28, %s3415_s20  ;;  %706 = vrot.lane.b32.xlu1 %v698_v29, %s3415_s20 }
  0xef   : > { %710 = vrot.lane.b32.xlu0 %v703_v31, %s3415_s20 }
  0xf0   : > { %v3744_v61 = vpop.permute.xlu2 %365 }
  0xf6   : > { %712 = vrot.lane.b32.xlu1 %v705_v48, %s3415_s20  ;;  %751 = vrot.lane.b32.xlu2 %v744_v34, %s3416_s21 }
  0xf7   : > { %747 = vrot.lane.b32.xlu0 %v739_v44, %s3416_s21 }
  0xf8   : > { %v390_v5 = vpop.permute.xlu2 %389 }
  0xfe   : > { %749 = vrot.lane.b32.xlu1 %v742_v53, %s3416_s21 }
  0xff   : > { %753 = vrot.lane.b32.xlu0 %v746_v54, %s3416_s21 }
 0x100   : > { %v336_v46 = vpop.permute.xlu1 %335  ;;  %v3756_v10 = vpop.permute.xlu2 %395 }
 0x101   : > { %v334_v60 = vpop.permute.xlu0 %333 }
 0x102   : > { %v342_v14 = vsel %vm341_vm2, %v334_v60, %v336_v46 }
 0x103   : > { %v346_v18 = vadd.f32 %v342_v14, %v3697_v11  ;;  %v3772_v11 = vperm.slane %v3542_v7, 2 }
 0x105   : > { %v3776_v32 = vmul.f32 %v3772_v11, %v3574_v21  ;;  %v620_v33 = vmul.f32 %v3772_v11, %v3655_v40 }
 0x106   : > { %763 = vrot.lane.b32.xlu1 %v761_v62, %s3413_s8 }
 0x107   : > { %v5607_v37 = vrot.slane %v3776_v32, 2  ;;  %v627_v38 = vrot.slane %v620_v33, 2 }
 0x108   : > { %v3752_v4 = vpop.permute.xlu1 %337  ;;  %v420_v15 = vpop.permute.xlu2 %419 }
 0x109   : > { %v362_v35 = vpop.permute.xlu0 %361  ;;  %v629_v39 = vsel %vm626_vm1, %v627_v38, %v5607_v37 }
 0x110   : > { %v364_v8 = vpop.permute.xlu1 %363  ;;  %v3769_v30 = vpop.permute.xlu2 %484 }
 0x111   : > { %v3754_v9 = vpop.permute.xlu0 %367  ;;  %v370_v17 = vsel %vm369_vm3, %v362_v35, %v364_v8 }
 0x112   : > { %v374_v20 = vadd.f32 %v370_v17, %v346_v18 }
 0x118   : > { %v3758_v12 = vpop.permute.xlu1 %393  ;;  %v522_v41 = vpop.permute.xlu2 %521 }
 0x119   : > { %v392_v16 = vpop.permute.xlu0 %391 }
 0x11a   : > { %v398_v19 = vsel %vm397_vm4, %v390_v5, %v392_v16 }
 0x11b   : > { %v402_v22 = vadd.f32 %v398_v19, %v374_v20 }
 0x120   : > { %v418_v23 = vpop.permute.xlu1 %417  ;;  %v3788_v44 = vpop.permute.xlu2 %527 }
 0x121   : > { %v426_v24 = vsel %vm425_vm5, %v418_v23, %v420_v15  ;;  %v3765_v25 = vpop.permute.xlu0 %421 }
 0x122   : > { %v430_v26 = vadd.f32 %v426_v24, %v402_v22 }
 0x124   : > { %v449_v27 = vadd.f32 %v444_v3, %v430_v26 }
 0x128   : > { %v3767_v28 = vpop.permute.xlu1 %423  ;;  %v565_v52 = vpop.permute.xlu2 %564 }
 0x129   : > { %v481_v29 = vpop.permute.xlu0 %480 }
 0x130   : > { %v483_v31 = vpop.permute.xlu1 %482 }
 0x131   : > { %v3780_v36 = vpop.permute.xlu0 %486  ;;  %v488_v49 = vsel %vm341_vm2, %v481_v29, %v483_v31 }
 0x132   : > { %v492_v53 = vadd.f32 %v488_v49, %v449_v27  ;;  %v3825_v49 = vpop.permute.xlu2 %607 }
 0x138   : > { %v3786_v42 = vpop.permute.xlu1 %525 }
 0x139   : > { %v524_v34 = vpop.permute.xlu0 %523 }
 0x13a   : > { %v529_v50 = vsel %vm369_vm3, %v522_v41, %v524_v34 }
 0x13b   : > { %v533_v46 = vadd.f32 %v529_v50, %v492_v53  ;;  %v666_v50 = vpop.permute.xlu2 %665  ;;  %v3831_v53 = vld [vmem:[%s3559_s18] sm:$0xf8] }
 0x140   : > { %v563_v43 = vpop.permute.xlu1 %562 }
 0x141   : > { %v3790_v45 = vpop.permute.xlu0 %566  ;;  %v570_v54 = vsel %vm397_vm4, %v563_v43, %v565_v52  ;;  %v3828_v52 = vperm.slane %v3542_v7, 7 }
 0x142   : > { %v574_v47 = vadd.f32 %v570_v54, %v533_v46 }
 0x143   : > { %v805_v54 = vmul.f32 %v3828_v52, %v3831_v53  ;;  %v3837_v46 = vmul.f32 %v3828_v52, %v3574_v21 }
 0x145   : > { %5620 = vst [vmem:[#allocation9_spill] sm:$0xff] %v3837_v46 }
 0x148   : > { %v3792_v48 = vpop.permute.xlu1 %568 }
 0x149   : > { %v604_v60 = vpop.permute.xlu0 %603 }
 0x150   : > { %v606_v62 = vpop.permute.xlu1 %605 }
 0x151   : > { %v611_v63 = vsel %vm425_vm5, %v604_v60, %v606_v62  ;;  %v3823_v43 = vpop.permute.xlu0 %609  ;;  %v5606_v60 = vrot.slane %v3837_v46, 3 }
 0x152   : > { %v615_v3 = vadd.f32 %v611_v63, %v574_v47  ;;  %v812_v47 = vrot.slane %v805_v54, 3  ;;  %v3845_v63 = vpop.permute.xlu2 %671 }
 0x154   : > { %v634_v35 = vadd.f32 %v629_v39, %v615_v3  ;;  %v814_v7 = vsel %vm811_vm6, %v812_v47, %v5606_v60 }
 0x158   : > { %v3798_v5 = vpop.permute.xlu1 %669 }
 0x160   : > { %v707_v8 = vpop.permute.xlu1 %706 }
 0x168   : > { %v3800_v14 = vpop.permute.xlu1 %712 }
 0x170   : > { %v750_v16 = vpop.permute.xlu1 %749 }
 0x178   : > { %v764_v17 = vpop.permute.xlu1 %763 }
 0x179   : > { %v768_v18 = vmul.f32 %v764_v17, %v3574_v21  ;;  %v770_v19 = vmul.f32 %v764_v17, %v3672_v57  ;;  %v767_v20 = vmul.f32 %v764_v17, %v3675_v58  ;;  %v769_v15 = vmul.f32 %v764_v17, %v3562_v13 }
 0x17a   : > { %v766_v22 = vmul.f32 %v764_v17, %v3655_v40  ;;  %v771_v38 = vmul.f32 %v764_v17, %v3669_v56  ;;  %v3817_v40 = vld [vmem:[%s5599_s1 + $0x10] sm:$0xff]  ;;  %v668_v56 = vpop.permute.xlu0 %667  ;;  %v709_v17 = vpop.permute.xlu2 %708 }
 0x17b   : > { %v779_v23 = vrot.slane %v768_v18, 2  ;;  %v784_v24 = vrot.slane %v770_v19, 2  ;;  %v781_v26 = vrot.slane %v767_v20, 2  ;;  %v782_v27 = vrot.slane %v769_v15, 2 }
 0x17c   : > { %v778_v29 = vrot.slane %v766_v22, 2  ;;  %v823_v39 = vperm.slane %v3817_v40, 0  ;;  %v786_v41 = vrot.slane %v771_v38, 2  ;;  %v673_v20 = vsel %vm341_vm2, %v666_v50, %v668_v56  ;;  %v3858_v38 = vld [vmem:[%s3559_s18 + $0x8] sm:$0xf8] }
 0x17d   : > { %v785_v31 = vsel %vm626_vm1, %v779_v23, %v784_v24  ;;  %v783_v33 = vsel %vm626_vm1, %v781_v26, %v782_v27  ;;  %v714_v15 = vsel %vm369_vm3, %v707_v8, %v709_v17  ;;  %v677_v22 = vadd.f32 %v673_v20, %v634_v35 }
 0x17e   : > { %792 = vrot.lane.b32.xlu1 %v785_v31, %s5614_s9  ;;  %790 = vrot.lane.b32.xlu0 %v783_v33, %s5614_s9  ;;  %v780_v58 = vsel %vm626_vm1, %v778_v29, %v779_v23  ;;  %v787_v34 = vsel %vm626_vm1, %v782_v27, %v786_v41  ;;  %v3861_v41 = vld [vmem:[%s3559_s18 + $0x20] sm:$0x7] }
 0x17f   : > { %788 = vrot.lane.b32.xlu2 %v780_v58, %s5614_s9  ;;  %v718_v24 = vadd.f32 %v714_v15, %v677_v22 }
 0x182   : > { %v3840_v62 = vpop.permute.xlu0 %710  ;;  %v3847_v18 = vpop.permute.xlu2 %751 }
 0x186   : > { %825 = vrot.lane.b32.xlu0 %v823_v39, %s3410_s22 }
 0x187   : > { %794 = vrot.lane.b32.xlu2 %v787_v34, %s5614_s9 }
 0x18a   : > { %v748_v3 = vpop.permute.xlu0 %747 }
 0x18b   : > { %v755_v23 = vsel %vm397_vm4, %v748_v3, %v750_v16  ;;  %v3869_v3 = vld [vmem:[%s3559_s18 + $0x28] sm:$0x7] }
 0x18c   : > { %v759_v26 = vadd.f32 %v755_v23, %v718_v24  ;;  %v864_v24 = vperm.slane %v3817_v40, 1 }
 0x192   : > { %v3849_v19 = vpop.permute.xlu0 %753 }
 0x1d9   : > { %v789_v27 = vpop.permute.xlu2 %788 }
 0x1f0   : > { %v791_v29 = vpop.permute.xlu0 %790 }
 0x1f1   : > { %v796_v31 = vsel %vm425_vm5, %v789_v27, %v791_v29  ;;  %v3882_v29 = vpop.permute.xlu2 %794 }
 0x1f2   : > { %v800_v33 = vadd.f32 %v796_v31, %v759_v26 }
 0x1f4   : > { %v3855_v58 = vadd.f32 %v814_v7, %v800_v33 }
 0x1f8   : > { %v826_v39 = vpop.permute.xlu0 %825 }
 0x1f9   : > { %v830_v8 = vmul.f32 %v826_v39, %v3574_v21  ;;  %v832_v35 = vmul.f32 %v826_v39, %v3861_v41  ;;  %v829_v16 = vmul.f32 %v826_v39, %v3858_v38  ;;  %v831_v34 = vmul.f32 %v826_v39, %v3562_v13 }
 0x1fa   : > { %v828_v56 = vmul.f32 %v826_v39, %v3831_v53  ;;  %v833_v23 = vmul.f32 %v826_v39, %v3869_v3 }
 0x1fb   : > { %v841_v50 = vrot.slane %v830_v8, 3  ;;  %v846_v54 = vrot.slane %v832_v35, 3  ;;  %v843_v47 = vrot.slane %v829_v16, 3  ;;  %v844_v7 = vrot.slane %v831_v34, 3 }
 0x1fc   : > { %v840_v17 = vrot.slane %v828_v56, 3  ;;  %v848_v26 = vrot.slane %v833_v23, 3 }
 0x1fd   : > { %v847_v20 = vsel %vm811_vm6, %v841_v50, %v846_v54  ;;  %v845_v15 = vsel %vm811_vm6, %v843_v47, %v844_v7 }
 0x1fe   : > { %854 = vrot.lane.b32.xlu0 %v847_v20, %s3414_s19  ;;  %852 = vrot.lane.b32.xlu2 %v845_v15, %s3414_s19  ;;  %v842_v22 = vsel %vm811_vm6, %v840_v17, %v841_v50  ;;  %v849_v27 = vsel %vm811_vm6, %v844_v7, %v848_v26 }
 0x1ff   : > { %850 = vrot.lane.b32.xlu1 %v842_v22, %s3414_s19 }
 0x206   : > { %866 = vrot.lane.b32.xlu2 %v864_v24, %s3412_s29  ;;  %v905_v24 = vperm.slane %v3817_v40, 2 }
 0x207   : > { %856 = vrot.lane.b32.xlu1 %v849_v27, %s3414_s19  ;;  %v3902_v27 = vpop.permute.xlu1 %792 }
 0x208   : > { %5621 = vst [vmem:[#allocation10_spill] sm:$0xff] %v3902_v27 }
 0x258   : > { %v3884_v31 = vpop.permute.xlu2 %852 }
 0x260   : > { %v867_v33 = vpop.permute.xlu2 %866 }
 0x261   : > { %v871_v8 = vmul.f32 %v867_v33, %v3574_v21  ;;  %v873_v39 = vmul.f32 %v867_v33, %v3861_v41  ;;  %v869_v35 = vmul.f32 %v867_v33, %v3831_v53  ;;  %v870_v16 = vmul.f32 %v867_v33, %v3858_v38 }
 0x262   : > { %v872_v34 = vmul.f32 %v867_v33, %v3562_v13  ;;  %v874_v15 = vmul.f32 %v867_v33, %v3869_v3 }
 0x263   : > { %v882_v56 = vrot.slane %v871_v8, 3  ;;  %v887_v50 = vrot.slane %v873_v39, 3  ;;  %v881_v54 = vrot.slane %v869_v35, 3  ;;  %v884_v47 = vrot.slane %v870_v16, 3 }
 0x264   : > { %v885_v7 = vrot.slane %v872_v34, 3  ;;  %v889_v23 = vrot.slane %v874_v15, 3 }
 0x265   : > { %v888_v17 = vsel %vm811_vm6, %v882_v56, %v887_v50  ;;  %v883_v20 = vsel %vm811_vm6, %v881_v54, %v882_v56 }
 0x266   : > { %895 = vrot.lane.b32.xlu2 %v888_v17, %s3415_s20  ;;  %891 = vrot.lane.b32.xlu0 %v883_v20, %s3415_s20  ;;  %v886_v22 = vsel %vm811_vm6, %v884_v47, %v885_v7  ;;  %v890_v26 = vsel %vm811_vm6, %v885_v7, %v889_v23 }
 0x267   : > { %893 = vrot.lane.b32.xlu1 %v886_v22, %s3415_s20 }
 0x26e   : > { %897 = vrot.lane.b32.xlu0 %v890_v26, %s3415_s20 }
 0x26f   : > { %907 = vrot.lane.b32.xlu1 %v905_v24, %s3411_s23 }
 0x271   : > { %v3904_v33 = vpop.permute.xlu1 %850 }
 0x279   : > { %v3906_v8 = vpop.permute.xlu1 %856 }
 0x27a   : > { %5622 = vst [vmem:[#allocation11_spill] sm:$0xff] %v3906_v8 }
 0x2d9   : > { %v3908_v39 = vpop.permute.xlu1 %893 }
 0x2e1   : > { %v908_v35 = vpop.permute.xlu1 %907 }
 0x2e2   : > { %v912_v16 = vmul.f32 %v908_v35, %v3574_v21  ;;  %v914_v34 = vmul.f32 %v908_v35, %v3861_v41  ;;  %v911_v56 = vmul.f32 %v908_v35, %v3858_v38  ;;  %v913_v50 = vmul.f32 %v908_v35, %v3562_v13 }
 0x2e3   : > { %v910_v54 = vmul.f32 %v908_v35, %v3831_v53  ;;  %v915_v26 = vmul.f32 %v908_v35, %v3869_v3 }
 0x2e4   : > { %v923_v47 = vrot.slane %v912_v16, 3  ;;  %v928_v7 = vrot.slane %v914_v34, 3  ;;  %v925_v17 = vrot.slane %v911_v56, 3  ;;  %v926_v20 = vrot.slane %v913_v50, 3  ;;  %v3926_v56 = vpop.permute.xlu0 %854 }
 0x2e5   : > { %v922_v15 = vrot.slane %v910_v54, 3  ;;  %v930_v60 = vrot.slane %v915_v26, 3  ;;  %v946_v16 = vperm.slane %v3817_v40, 3  ;;  %5623 = vst [vmem:[#allocation12_spill] sm:$0xff] %v3926_v56 }
 0x2e6   : > { %v929_v22 = vsel %vm811_vm6, %v923_v47, %v928_v7  ;;  %v927_v23 = vsel %vm811_vm6, %v925_v17, %v926_v20 }
 0x2e7   : > { %936 = vrot.lane.b32.xlu1 %v929_v22, %s3416_s21  ;;  %v924_v24 = vsel %vm811_vm6, %v922_v15, %v923_v47  ;;  %934 = vrot.lane.b32.xlu0 %v927_v23, %s3416_s21  ;;  %v931_v34 = vsel %vm811_vm6, %v926_v20, %v930_v60 }
 0x2e8   : > { %932 = vrot.lane.b32.xlu2 %v924_v24, %s3416_s21 }
 0x2ec   : > { %v892_v50 = vpop.permute.xlu0 %891 }
 0x2ef   : > { %948 = vrot.lane.b32.xlu0 %v946_v16, %s3413_s8 }
 0x2f0   : > { %938 = vrot.lane.b32.xlu2 %v931_v34, %s3416_s21 }
 0x2f4   : > { %v3928_v54 = vpop.permute.xlu0 %897 }
 0x2f5   : > { %5624 = vst [vmem:[#allocation13_spill] sm:$0xff] %v3928_v54 }
 0x359   : > { %v3930_v47 = vpop.permute.xlu0 %934  ;;  %v3988_v27 = vpop.permute.xlu1 %936 }
 0x361   : > { %v949_v35 = vpop.permute.xlu0 %948 }
 0x362   : > { %v953_v7 = vmul.f32 %v949_v35, %v3574_v21  ;;  %v955_v17 = vmul.f32 %v949_v35, %v3861_v41  ;;  %v951_v15 = vmul.f32 %v949_v35, %v3831_v53  ;;  %v952_v60 = vmul.f32 %v949_v35, %v3858_v38 }
 0x363   : > { %v954_v20 = vmul.f32 %v949_v35, %v3562_v13  ;;  %v956_v1 = vmul.f32 %v949_v35, %v3869_v3  ;;  %v3948_v3 = vpop.permute.xlu2 %895 }
 0x364   : > { %v964_v22 = vrot.slane %v953_v7, 3  ;;  %v969_v23 = vrot.slane %v955_v17, 3  ;;  %v963_v24 = vrot.slane %v951_v15, 3  ;;  %v966_v26 = vrot.slane %v952_v60, 3  ;;  %5625 = vst [vmem:[#allocation14_spill] sm:$0xff] %v3948_v3 }
 0x365   : > { %v967_v16 = vrot.slane %v954_v20, 3  ;;  %v971_v38 = vrot.slane %v956_v1, 3  ;;  %v1008_v7 = vperm.slane %v3817_v40, 5  ;;  %v3954_v15 = vld [vmem:[%s3559_s18] sm:$0xf0] }
 0x366   : > { %v970_v34 = vsel %vm811_vm6, %v964_v22, %v969_v23  ;;  %v965_v37 = vsel %vm811_vm6, %v963_v24, %v964_v22 }
 0x367   : > { %977 = vrot.lane.b32.xlu0 %v970_v34, %s5614_s9  ;;  %973 = vrot.lane.b32.xlu1 %v965_v37, %s5614_s9  ;;  %v968_v53 = vsel %vm811_vm6, %v966_v26, %v967_v16  ;;  %v972_v17 = vsel %vm811_vm6, %v967_v16, %v971_v38  ;;  %v3951_v37 = vperm.slane %v3817_v40, 4  ;;  %v3969_v16 = vld [vmem:[%s3559_s18 + $0x20] sm:$0xf]  ;;  %v3972_v34 = vld [vmem:[%s3559_s18 + $0x8] sm:$0xf0] }
 0x368   : > { %975 = vrot.lane.b32.xlu2 %v968_v53, %s5614_s9 }
 0x369   : > { %5626 = vst [vmem:[#allocation15_spill] sm:$0xff] %v3951_v37  ;;  %v990_v1 = vmul.f32 %v3951_v37, %v3954_v15  ;;  %v3962_v20 = vmul.f32 %v3951_v37, %v3574_v21 }
 0x36b   : > { %v933_v35 = vpop.permute.xlu2 %932  ;;  %5628 = vst [vmem:[#allocation17_spill] sm:$0xff] %v3962_v20  ;;  %v997_v22 = vrot.slane %v990_v1, 4  ;;  %v5612_v23 = vrot.slane %v3962_v20, 4 }
 0x36d   : > { %v999_v24 = vsel %vm996_vm7, %v997_v22, %v5612_v23  ;;  %v3980_v23 = vld [vmem:[%s3559_s18 + $0x28] sm:$0xf] }
 0x36f   : > { %979 = vrot.lane.b32.xlu1 %v972_v17, %s5614_s9 }
 0x370   : > { %1010 = vrot.lane.b32.xlu2 %v1008_v7, %s3410_s22 }
 0x373   : > { %v3956_v60 = vpop.permute.xlu2 %938 }
 0x374   : > { %5627 = vst [vmem:[#allocation16_spill] sm:$0xff] %v3956_v60 }
 0x3c2   : > { %v976_v26 = vpop.permute.xlu2 %975 }
 0x3ca   : > { %v1011_v53 = vpop.permute.xlu2 %1010 }
 0x3cb   : > { %v1015_v38 = vmul.f32 %v1011_v53, %v3574_v21  ;;  %v1017_v7 = vmul.f32 %v1011_v53, %v3969_v16  ;;  %v1014_v17 = vmul.f32 %v1011_v53, %v3972_v34  ;;  %v1016_v1 = vmul.f32 %v1011_v53, %v3562_v13 }
 0x3cc   : > { %v1013_v2 = vmul.f32 %v1011_v53, %v3954_v15  ;;  %v1018_v46 = vmul.f32 %v1011_v53, %v3980_v23 }
 0x3cd   : > { %v1026_v60 = vrot.slane %v1015_v38, 4  ;;  %v1031_v20 = vrot.slane %v1017_v7, 4  ;;  %v1028_v37 = vrot.slane %v1014_v17, 4  ;;  %v1029_v22 = vrot.slane %v1016_v1, 4 }
 0x3ce   : > { %v1025_v3 = vrot.slane %v1013_v2, 4  ;;  %v858_v2 = vsel %vm341_vm2, %v3904_v33, %v3884_v31 }
 0x3cf   : > { %v1032_v54 = vsel %vm996_vm7, %v1026_v60, %v1031_v20  ;;  %v1030_v56 = vsel %vm996_vm7, %v1028_v37, %v1029_v22  ;;  %v899_v20 = vsel %vm369_vm3, %v892_v50, %v3908_v39  ;;  %v1049_v37 = vperm.slane %v3817_v40, 6 }
 0x3d0   : > { %1039 = vrot.lane.b32.xlu2 %v1032_v54, %s3414_s19  ;;  %1037 = vrot.lane.b32.xlu1 %v1030_v56, %s3414_s19  ;;  %v1027_v8 = vsel %vm996_vm7, %v1025_v3, %v1026_v60  ;;  %v1033_v54 = vrot.slane %v1018_v46, 4  ;;  %v862_v56 = vadd.f32 %v858_v2, %v3855_v58  ;;  %v940_v3 = vsel %vm397_vm4, %v933_v35, %v3930_v47 }
 0x3d1   : > { %1035 = vrot.lane.b32.xlu0 %v1027_v8, %s3414_s19 }
 0x3d2   : > { %v903_v60 = vadd.f32 %v899_v20, %v862_v56  ;;  %v1034_v8 = vsel %vm996_vm7, %v1029_v22, %v1033_v54 }
 0x3d4   : > { %v944_v53 = vadd.f32 %v940_v3, %v903_v60  ;;  %v1090_v60 = vperm.slane %v3817_v40, 7 }
 0x3d8   : > { %1051 = vrot.lane.b32.xlu1 %v1049_v37, %s3412_s29 }
 0x3d9   : > { %1041 = vrot.lane.b32.xlu0 %v1034_v8, %s3414_s19  ;;  %v974_v31 = vpop.permute.xlu1 %973 }
 0x3da   : > { %v981_v33 = vsel %vm425_vm5, %v974_v31, %v976_v26 }
 0x3db   : > { %v985_v39 = vadd.f32 %v981_v33, %v944_v53  ;;  %v4026_v53 = vpop.permute.xlu0 %977 }
 0x3dd   : > { %v4004_v50 = vadd.f32 %v999_v24, %v985_v39 }
 0x3e1   : > { %v4006_v46 = vpop.permute.xlu1 %979 }
 0x442   : > { %v4008_v58 = vpop.permute.xlu1 %1037 }
 0x443   : > { %v4028_v31 = vpop.permute.xlu0 %1035 }
 0x44a   : > { %v1052_v38 = vpop.permute.xlu1 %1051 }
 0x44b   : > { %v1056_v47 = vmul.f32 %v1052_v38, %v3574_v21  ;;  %v1058_v35 = vmul.f32 %v1052_v38, %v3969_v16  ;;  %v1054_v7 = vmul.f32 %v1052_v38, %v3954_v15  ;;  %v1055_v17 = vmul.f32 %v1052_v38, %v3972_v34  ;;  %v4030_v33 = vpop.permute.xlu0 %1041 }
 0x44c   : > { %v1057_v1 = vmul.f32 %v1052_v38, %v3562_v13  ;;  %v1059_v56 = vmul.f32 %v1052_v38, %v3980_v23 }
 0x44d   : > { %v1067_v22 = vrot.slane %v1056_v47, 4  ;;  %v1072_v26 = vrot.slane %v1058_v35, 4  ;;  %v1066_v2 = vrot.slane %v1054_v7, 4  ;;  %v1069_v24 = vrot.slane %v1055_v17, 4  ;;  %v3298_v7 = vld [vmem:[%s3559_s18 + $0x18] sm:$0xff] }
 0x44e   : > { %v1070_v20 = vrot.slane %v1057_v1, 4  ;;  %v1074_v13 = vrot.slane %v1059_v56, 4 }
 0x44f   : > { %v1073_v37 = vsel %vm996_vm7, %v1067_v22, %v1072_v26  ;;  %v1068_v54 = vsel %vm996_vm7, %v1066_v2, %v1067_v22 }
 0x450   : > { %1080 = vrot.lane.b32.xlu1 %v1073_v37, %s3415_s20  ;;  %1076 = vrot.lane.b32.xlu2 %v1068_v54, %s3415_s20  ;;  %v1071_v3 = vsel %vm996_vm7, %v1069_v24, %v1070_v20  ;;  %v1075_v8 = vsel %vm996_vm7, %v1070_v20, %v1074_v13 }
 0x451   : > { %1078 = vrot.lane.b32.xlu0 %v1071_v3, %s3415_s20  ;;  %v3294_v3 = vld [vmem:[%s5599_s1 + $0x18] ss:$0 sm:$0xff] }
 0x458   : > { %1082 = vrot.lane.b32.xlu2 %v1075_v8, %s3415_s20  ;;  %v4052_v8 = vpop.permute.xlu2 %1039 }
 0x459   : > { %1092 = vrot.lane.b32.xlu0 %v1090_v60, %s3411_s23 }
 0x4c3   : > { %v4032_v39 = vpop.permute.xlu0 %1078 }
 0x4cb   : > { %v1093_v38 = vpop.permute.xlu0 %1092 }
 0x4cc   : > { %v1097_v47 = vmul.f32 %v1093_v38, %v3574_v21  ;;  %v1099_v35 = vmul.f32 %v1093_v38, %v3969_v16  ;;  %v1096_v40 = vmul.f32 %v1093_v38, %v3972_v34  ;;  %v1098_v17 = vmul.f32 %v3298_v7, %v1093_v38 }
 0x4cd   : > { %v1095_v1 = vmul.f32 %v1093_v38, %v3954_v15  ;;  %v1100_v56 = vmul.f32 %v1093_v38, %v3980_v23 }
 0x4ce   : > { %v1108_v22 = vrot.slane %v1097_v47, 4  ;;  %v1113_v26 = vrot.slane %v1099_v35, 4  ;;  %v1110_v2 = vrot.slane %v1096_v40, 4  ;;  %v1111_v24 = vrot.slane %v1098_v17, 4  ;;  %v4054_v47 = vpop.permute.xlu2 %1076  ;;  %v3299_v17 = vld [vmem:[%s3559_s18 + $0x10] sm:$0xff] }
 0x4cf   : > { %v1107_v20 = vrot.slane %v1095_v1, 4  ;;  %v1115_v13 = vrot.slane %v1100_v56, 4 }
 0x4d0   : > { %v1114_v37 = vsel %vm996_vm7, %v1108_v22, %v1113_v26  ;;  %v1112_v54 = vsel %vm996_vm7, %v1110_v2, %v1111_v24 }
 0x4d1   : > { %1121 = vrot.lane.b32.xlu0 %v1114_v37, %s3416_s21  ;;  %1119 = vrot.lane.b32.xlu2 %v1112_v54, %s3416_s21  ;;  %v1109_v21 = vsel %vm996_vm7, %v1107_v20, %v1108_v22  ;;  %v1116_v60 = vsel %vm996_vm7, %v1111_v24, %v1115_v13 }
 0x4d2   : > { %1117 = vrot.lane.b32.xlu1 %v1109_v21, %s3416_s21 }
 0x4d6   : > { %v4056_v35 = vpop.permute.xlu2 %1082 }
 0x4d9   : > { %1133 = vrot.lane.b32.xlu2 %v3294_v3, %s3413_s8 }
 0x4da   : > { %1123 = vrot.lane.b32.xlu1 %v1116_v60, %s3416_s21 }
 0x52b   : > { %v4058_v38 = vpop.permute.xlu2 %1119 }
 0x533   : > { %v1134_v40 = vpop.permute.xlu2 %1133 }
 0x534   : > { %v1138_v1 = vmul.f32 %v3299_v17, %v1134_v40  ;;  %v1140_v22 = vmul.f32 %v1134_v40, %v3969_v16  ;;  %v1136_v26 = vmul.f32 %v1134_v40, %v3954_v15  ;;  %v1137_v2 = vmul.f32 %v1134_v40, %v3972_v34  ;;  %v4071_v34 = vld [vmem:[#allocation3] sm:$0xff] }
 0x535   : > { %v1139_v24 = vmul.f32 %v3298_v7, %v1134_v40  ;;  %v1141_v60 = vmul.f32 %v1134_v40, %v3980_v23  ;;  %v5629_v23 = vperm.slane %v3525_v0, 0 }
 0x536   : > { %v1149_v20 = vrot.slane %v1138_v1, 4  ;;  %v1154_v37 = vrot.slane %v1140_v22, 4  ;;  %v1148_v54 = vrot.slane %v1136_v26, 4  ;;  %v1151_v21 = vrot.slane %v1137_v2, 4 }
 0x537   : > { %v1152_v56 = vrot.slane %v1139_v24, 4  ;;  %v1156_v7 = vrot.slane %v1141_v60, 4  ;;  %v1228_v1 = vperm.slane %v4071_v34, 1  ;;  %v315_v40 = vmul.f32 %v3299_v17, %v5629_v23 }
 0x538   : > { %v1155_v3 = vsel %vm996_vm7, %v1149_v20, %v1154_v37  ;;  %v1150_v13 = vsel %vm996_vm7, %v1148_v54, %v1149_v20  ;;  %v343_v2 = vsel %vm341_vm2, %v3752_v4, %v3729_v51  ;;  %v371_v24 = vsel %vm369_vm3, %v3744_v61, %v3754_v9  ;;  %v3300_v20 = vld [vmem:[%s3559_s18 + $0x20] sm:$0x1] }
 0x539   : > { %1162 = vrot.lane.b32.xlu2 %v1155_v3, %s5614_s9  ;;  %1158 = vrot.lane.b32.xlu0 %v1150_v13, %s5614_s9  ;;  %v1153_v15 = vsel %vm996_vm7, %v1151_v21, %v1152_v56  ;;  %v1157_v22 = vsel %vm996_vm7, %v1152_v56, %v1156_v7  ;;  %v317_v26 = vadd.f32 %v3691_v6, %v315_v40  ;;  %v5630_v4 = vrot.slane %v3742_v59, 1  ;;  %v5637_v40 = vld [vmem:[#allocation13_spill] sm:$0xff] }
 0x53a   : > { %1160 = vrot.lane.b32.xlu1 %v1153_v15, %s5614_s9  ;;  %v437_v37 = vmul.f32 %v3300_v20, %v3735_v55  ;;  %v399_v21 = vsel %vm397_vm4, %v3758_v12, %v3756_v10  ;;  %v427_v6 = vsel %vm425_vm5, %v3765_v25, %v3767_v28  ;;  %v489_v55 = vsel %vm341_vm2, %v3769_v30, %v3780_v36 }
 0x53b   : > { %v347_v54 = vadd.f32 %v343_v2, %v317_v26  ;;  %v530_v10 = vsel %vm369_vm3, %v3786_v42, %v3788_v44  ;;  %v622_v12 = vmul.f32 %v3772_v11, %v3672_v57  ;;  %v571_v28 = vsel %vm397_vm4, %v3790_v45, %v3792_v48  ;;  %v1081_v44 = vpop.permute.xlu1 %1080  ;;  %v5638_v26 = vld [vmem:[#allocation14_spill] sm:$0xff] }
 0x53c   : > { %v445_v17 = vrot.slane %v437_v37, 1  ;;  %v612_v3 = vsel %vm425_vm5, %v3825_v49, %v3823_v43  ;;  %v5631_v60 = vrot.slane %v3776_v32, 2  ;;  %v674_v57 = vsel %vm341_vm2, %v3798_v5, %v3845_v63  ;;  %v5632_v49 = vld [vmem:[#allocation10_spill] sm:$0xff] }
 0x53d   : > { %v375_v0 = vadd.f32 %v371_v24, %v347_v54  ;;  %v630_v13 = vrot.slane %v622_v12, 2  ;;  %v3418_v15 = vmov 0.0   ;;  %v715_v45 = vsel %vm369_vm3, %v3840_v62, %v3800_v14  ;;  %v5639_v24 = vld [vmem:[#allocation15_spill] sm:$0xff] }
 0x53e   : > { %v446_v61 = vsel %vm441_vm0, %v5630_v4, %v445_v17  ;;  %1173 = vst [vmem:[#allocation2 + $0x8] sm:$0xff] %v3418_v15  ;;  %v807_v48 = vmul.f32 %v3828_v52, %v3861_v41  ;;  %v756_v5 = vsel %vm397_vm4, %v3847_v18, %v3849_v19  ;;  %v797_v14 = vsel %vm425_vm5, %v5632_v49, %v3882_v29  ;;  %v5633_v18 = vld [vmem:[#allocation9_spill] sm:$0xff]  ;;  %v5636_v29 = vld [vmem:[#allocation12_spill] sm:$0xff] }
 0x53f   : > { %v403_v56 = vadd.f32 %v399_v21, %v375_v0  ;;  %v631_v42 = vsel %vm626_vm1, %v5631_v60, %v630_v13  ;;  %1172 = vst [vmem:[#allocation2] sm:$0xff] %v3418_v15  ;;  %v5634_v19 = vrot.slane %v5633_v18, 3  ;;  %v900_v2 = vsel %vm369_vm3, %v5638_v26, %v5637_v40  ;;  %v5640_v21 = vld [vmem:[#allocation16_spill] sm:$0xff] }
 0x540   : > { %1176 = vst [vmem:[#allocation2 + $0x18] sm:$0xff] %v3418_v15  ;;  %v815_v62 = vrot.slane %v807_v48, 3  ;;  %v992_v20 = vmul.f32 %v5639_v24, %v3969_v16  ;;  %v941_v0 = vsel %vm397_vm4, %v3988_v27, %v5640_v21  ;;  %v5641_v16 = vld [vmem:[#allocation17_spill] sm:$0xff]  ;;  %v1044_v27 = vsel %vm341_vm2, %v4052_v8, %v4030_v33 }
 0x541   : > { %1164 = vrot.lane.b32.xlu0 %v1157_v22, %s5614_s9  ;;  %v431_v51 = vadd.f32 %v427_v6, %v403_v56  ;;  %1177 = vst [vmem:[#allocation2 + $0x20] sm:$0xff] %v3418_v15  ;;  %v982_v56 = vsel %vm425_vm5, %v4026_v53, %v4006_v46  ;;  %v1084_v46 = vsel %vm369_vm3, %v4054_v47, %v4032_v39 }
 0x542   : > { %1230 = vrot.lane.b32.xlu1 %v1228_v1, %s3411_s23  ;;  %1179 = vst [vmem:[#allocation2 + $0x30] sm:$0xff] %v3418_v15  ;;  %v816_v7 = vsel %vm811_vm6, %v5634_v19, %v815_v62  ;;  %v5635_v1 = vld [vmem:[#allocation11_spill] sm:$0xff] }
 0x543   : > { %v450_v9 = vadd.f32 %v446_v61, %v431_v51  ;;  %1180 = vst [vmem:[#allocation2 + $0x38] sm:$0xff] %v3418_v15  ;;  %v859_v22 = vsel %vm341_vm2, %v5636_v29, %v5635_v1  ;;  %v1122_v54 = vpop.permute.xlu0 %1121  ;;  %v1000_v51 = vrot.slane %v992_v20, 4  ;;  %v1369_v20 = vperm.slane %v4071_v34, 6 }
 0x544   : > { %v1118_v52 = vpop.permute.xlu1 %1117  ;;  %1182 = vst [vmem:[#allocation2 + $0x48] sm:$0xff] %v3418_v15 }
 0x545   : > { %v493_v25 = vadd.f32 %v489_v55, %v450_v9  ;;  %1183 = vst [vmem:[#allocation2 + $0x50] sm:$0xff] %v3418_v15  ;;  %v1043_v55 = vsel %vm341_vm2, %v4028_v31, %v4008_v58  ;;  %v5642_v9 = vrot.slane %v5641_v16, 4  ;;  %v1085_v58 = vsel %vm369_vm3, %v1081_v44, %v4056_v35 }
 0x546   : > { %1185 = vst [vmem:[#allocation2 + $0x60] sm:$0x3] %v3418_v15  ;;  %v1125_v31 = vsel %vm397_vm4, %v1118_v52, %v4058_v38  ;;  %vm1673_vm2 = vcmask 1041408  }
 0x547   : > { %v534_v59 = vadd.f32 %v530_v10, %v493_v25  ;;  %1186 = vst [vmem:[#allocation2 + $0x68] sm:$0x3] %v3418_v15  ;;  %v1001_v10 = vsel %vm996_vm7, %v5642_v9, %v1000_v51  ;;  %v1047_v25 = vadd.f32 %v1043_v55, %v4004_v50 }
 0x548   : > { %1175 = vst.msk [vmem:[#allocation2 + $0x10] sm:$0xff] %vm1174_vm15, %v3418_v15 }
 0x549   : > { %v575_v30 = vadd.f32 %v571_v28, %v534_v59  ;;  %1178 = vst.msk [vmem:[#allocation2 + $0x28] sm:$0xff] %vm1174_vm15, %v3418_v15 }
 0x54a   : > { %1181 = vst.msk [vmem:[#allocation2 + $0x40] sm:$0xff] %vm1174_vm15, %v3418_v15 }
 0x54b   : > { %v616_v36 = vadd.f32 %v612_v3, %v575_v30  ;;  %v1088_v3 = vadd.f32 %v1084_v46, %v1047_v25  ;;  %1184 = vst.msk [vmem:[#allocation2 + $0x58] sm:$0xff] %vm1174_vm15, %v3418_v15 }
 0x54c   : > { %v1124_v6 = vpop.permute.xlu1 %1123 }
 0x54d   : > { %v635_v11 = vadd.f32 %v631_v42, %v616_v36  ;;  %v1126_v13 = vsel %vm397_vm4, %v1122_v54, %v1124_v6  ;;  %v1129_v30 = vadd.f32 %v1125_v31, %v1088_v3 }
 0x54f   : > { %v678_v32 = vadd.f32 %v674_v57, %v635_v11  ;;  %v1367_v55 = vld [vmem:[#allocation2 + $0x10] sm:$0xff] }
 0x550   : > { %v4253_v46 = vld [vmem:[#allocation2 + $0x28] sm:$0xff] }
 0x551   : > { %v719_v43 = vadd.f32 %v715_v45, %v678_v32  ;;  %v1255_v45 = vperm.slane %v4071_v34, 2 }
 0x553   : > { %v760_v63 = vadd.f32 %v756_v5, %v719_v43  ;;  %v1283_v43 = vperm.slane %v4071_v34, 3 }
 0x555   : > { %v801_v41 = vadd.f32 %v797_v14, %v760_v63 }
 0x557   : > { %v820_v23 = vadd.f32 %v816_v7, %v801_v41  ;;  %v1311_v41 = vperm.slane %v4071_v34, 4 }
 0x559   : > { %v863_v37 = vadd.f32 %v859_v22, %v820_v23  ;;  %v1339_v23 = vperm.slane %v4071_v34, 5 }
 0x55b   : > { %v904_v17 = vadd.f32 %v900_v2, %v863_v37  ;;  %v4222_v37 = vld [vmem:[#allocation3 + $0x8] sm:$0xff] }
 0x55c   : > { %v1498_v54 = vperm.slane %v4222_v37, 2  ;;  %v1623_v21 = vperm.slane %v4222_v37, 5  ;;  %v1457_v25 = vperm.slane %v4222_v37, 1 }
 0x55d   : > { %v945_v4 = vadd.f32 %v941_v0, %v904_v17 }
 0x55f   : > { %v986_v61 = vadd.f32 %v982_v56, %v945_v4 }
 0x561   : > { %v1005_v28 = vadd.f32 %v1001_v10, %v986_v61 }
 0x563   : > { %v1048_v59 = vadd.f32 %v1044_v27, %v1005_v28  ;;  %v1416_v27 = vperm.slane %v4222_v37, 0  ;;  %v1580_v28 = vperm.slane %v4222_v37, 4 }
 0x565   : > { %v1089_v8 = vadd.f32 %v1085_v58, %v1048_v59 }
 0x567   : > { %v1130_v36 = vadd.f32 %v1126_v13, %v1089_v8 }
 0x593   : > { %v1163_v39 = vpop.permute.xlu2 %1162 }
 0x5ab   : > { %v1159_v12 = vpop.permute.xlu0 %1158 }
 0x5ac   : > { %v1161_v53 = vpop.permute.xlu1 %1160 }
 0x5ad   : > { %v1166_v33 = vsel %vm425_vm5, %v1159_v12, %v1161_v53  ;;  %v1539_v53 = vperm.slane %v4222_v37, 3 }
 0x5ae   : > { %v1170_v47 = vadd.f32 %v1166_v33, %v1129_v30 }
 0x5b0   : > { %v1192_v38 = vrot.slane %v1170_v47, 7 }
 0x5b3   : > { %v1165_v60 = vpop.permute.xlu0 %1164 }
 0x5b4   : > { %v1167_v50 = vsel %vm425_vm5, %v1163_v39, %v1165_v60  ;;  %v4175_v42 = vpop.permute.xlu1 %1230  ;;  %v4290_v60 = vld [vmem:[#allocation2] sm:$0xf8]  ;;  %vm1276_vm5 = vcmask 654336  }
 0x5b5   : > { %v1171_v35 = vadd.f32 %v1167_v50, %v1130_v36  ;;  %v1234_v44 = vmul.f32 0.0, %v4175_v42 }
 0x5b7   : > { %v1193_v57 = vrot.slane %v1171_v35, 7  ;;  %1243 = vrot.lane.b32.xlu0 %v1234_v44, %s3416_s21  ;;  %1241 = vrot.lane.b32.xlu2 %v1234_v44, %s3416_s21 }
 0x5b9   : > { %v1194_v11 = vsel %vm1191_vm8, %v1192_v38, %v1193_v57 }
 0x5bf   : > { %1257 = vrot.lane.b32.xlu0 %v1255_v45, %s3419_s14 }
 0x5c7   : > { %1199 = vrot.lane.b32.xlu0 %v1193_v57, %s3420_s15 }
 0x611   : > { %v4195_v14 = vpop.permute.xlu2 %1241 }
 0x629   : > { %v4184_v48 = vpop.permute.xlu0 %1243 }
 0x631   : > { %v4186_v32 = vpop.permute.xlu0 %1257 }
 0x632   : > { %v1260_v5 = vmul.f32 0.0, %v4186_v32 }
 0x634   : > { %1268 = vrot.lane.b32.xlu1 %v1260_v5, %s3421_s16  ;;  %1270 = vrot.lane.b32.xlu2 %v1260_v5, %s3421_s16 }
 0x639   : > { %v1200_v49 = vpop.permute.xlu0 %1199 }
 0x63a   : > { %1213 = vst.msk [vmem:[#allocation2 + $0x48] sm:$0x1] %vm1212_vm9, %v1200_v49  ;;  %vm1304_vm9 = vcmask 457728  }
 0x63b   : > { %1215 = vst.msk [vmem:[#allocation2 + $0x50] sm:$0x1] %vm1214_vm10, %v1200_v49  ;;  %vm1332_vm10 = vcmask 261120  }
 0x63c   : > { %1285 = vrot.lane.b32.xlu2 %v1283_v43, %s3420_s15  ;;  %1195 = vrot.lane.b32.xlu1 %v1192_v38, %s3420_s15 }
 0x644   : > { %1197 = vrot.lane.b32.xlu2 %v1194_v11, %s3420_s15 }
 0x68e   : > { %v4197_v62 = vpop.permute.xlu2 %1270 }
 0x696   : > { %v4199_v52 = vpop.permute.xlu2 %1285 }
 0x697   : > { %v1288_v63 = vmul.f32 0.0, %v4199_v52 }
 0x699   : > { %1296 = vrot.lane.b32.xlu0 %v1288_v63, %s3422_s17  ;;  %1298 = vrot.lane.b32.xlu1 %v1288_v63, %s3422_s17 }
 0x69e   : > { %v1198_v18 = vpop.permute.xlu2 %1197 }
 0x69f   : > { %1209 = vst.msk [vmem:[#allocation2 + $0x30] sm:$0xff] %vm1208_vm11, %v1198_v18  ;;  %vm1360_vm11 = vcmask 64512  }
 0x6a0   : > { %1211 = vst.msk [vmem:[#allocation2 + $0x38] sm:$0xff] %vm1210_vm12, %v1198_v18 }
 0x6a1   : > { %1313 = vrot.lane.b32.xlu1 %v1311_v41, %s5614_s9 }
 0x6a6   : > { %v4206_v19 = vpop.permute.xlu1 %1268 }
 0x6ae   : > { %v1196_v7 = vpop.permute.xlu1 %1195 }
 0x6af   : > { %1205 = vst.msk [vmem:[#allocation2 + $0x18] sm:$0xfe] %vm1204_vm13, %v1196_v7 }
 0x6b0   : > { %1207 = vst.msk [vmem:[#allocation2 + $0x20] sm:$0xfe] %vm1206_vm14, %v1196_v7 }
 0x6b6   : > { %v4233_v17 = vld [vmem:[#allocation2 + $0x18] sm:$0xff] }
 0x6b7   : > { %v4228_v0 = vld [vmem:[#allocation2 + $0x20] sm:$0xff]  ;;  %v1290_v56 = vmul.f32 %v4199_v52, %v4233_v17  ;;  %v1235_v58 = vmul.f32 %v4175_v42, %v4233_v17  ;;  %v1262_v59 = vmul.f32 %v4186_v32, %v4233_v17 }
 0x6b8   : > { %v1236_v6 = vmul.f32 %v4175_v42, %v4228_v0  ;;  %v1263_v31 = vmul.f32 %v4186_v32, %v4228_v0  ;;  %v1291_v13 = vmul.f32 %v4199_v52, %v4228_v0  ;;  %v4294_v42 = vld [vmem:[#allocation2 + $0x8] sm:$0xf8] }
 0x70b   : > { %v4208_v1 = vpop.permute.xlu1 %1298  ;;  %v4214_v40 = vpop.permute.xlu0 %1296 }
 0x713   : > { %v1314_v29 = vpop.permute.xlu1 %1313 }
 0x714   : > { %v1317_v22 = vmul.f32 0.0, %v1314_v29  ;;  %v1319_v51 = vmul.f32 %v1314_v29, %v4228_v0  ;;  %v1318_v3 = vmul.f32 %v1314_v29, %v4233_v17 }
 0x716   : > { %1326 = vrot.lane.b32.xlu0 %v1317_v22, %s3413_s8  ;;  %1324 = vrot.lane.b32.xlu2 %v1317_v22, %s3413_s8 }
 0x71e   : > { %1341 = vrot.lane.b32.xlu0 %v1339_v23, %s3414_s19 }
 0x770   : > { %v4244_v4 = vpop.permute.xlu2 %1324 }
 0x788   : > { %v4216_v26 = vpop.permute.xlu0 %1326 }
 0x790   : > { %v1342_v2 = vpop.permute.xlu0 %1341 }
 0x791   : > { %v1344_v24 = vmul.f32 0.0, %v1342_v2  ;;  %v1347_v33 = vmul.f32 %v1342_v2, %v4228_v0  ;;  %v1346_v8 = vmul.f32 %v1342_v2, %v4233_v17 }
 0x793   : > { %1352 = vrot.lane.b32.xlu1 %v1344_v24, %s3410_s22  ;;  %1354 = vrot.lane.b32.xlu2 %v1344_v24, %s3410_s22 }
 0x79b   : > { %1371 = vrot.lane.b32.xlu2 %v1369_v20, %s3412_s29 }
 0x7a3   : > { %1500 = vrot.lane.b32.xlu2 %v1498_v54, %s3420_s15 }
 0x7ab   : > { %1625 = vrot.lane.b32.xlu2 %v1623_v21, %s3412_s29 }
 0x7b3   : > { %1247 = vrot.lane.b32.xlu2 %v1236_v6, %s3416_s21 }
 0x7bb   : > { %1300 = vrot.lane.b32.xlu2 %v1290_v56, %s3422_s17 }
 0x7c3   : > { %1330 = vrot.lane.b32.xlu2 %v1319_v51, %s3413_s8 }
 0x7ed   : > { %v4246_v61 = vpop.permute.xlu2 %1354 }
 0x7f5   : > { %v1372_v16 = vpop.permute.xlu2 %1371 }
 0x7f6   : > { %v1376_v9 = vmul.f32 %v1372_v16, %v4228_v0  ;;  %v1375_v10 = vmul.f32 %v1372_v16, %v1367_v55  ;;  %v1374_v12 = vmul.f32 0.0, %v1372_v16  ;;  %v1377_v15 = vmul.f32 %v1372_v16, %v4253_v46 }
 0x7f8   : > { %1386 = vrot.lane.b32.xlu2 %v1376_v9, %s3415_s20  ;;  %1384 = vrot.lane.b32.xlu1 %v1375_v10, %s3415_s20 }
 0x7f9   : > { %1382 = vrot.lane.b32.xlu0 %v1374_v12, %s3415_s20 }
 0x7fd   : > { %v4288_v47 = vpop.permute.xlu2 %1500 }
 0x7fe   : > { %v1503_v45 = vmul.f32 %v4288_v47, %v4290_v60  ;;  %v4314_v32 = vmul.f32 %v4288_v47, %v4233_v17  ;;  %v1504_v21 = vmul.f32 %v4288_v47, %v4294_v42  ;;  %v1506_v6 = vmul.f32 %v4288_v47, %v4228_v0 }
 0x800   : > { %1418 = vrot.lane.b32.xlu1 %v1416_v27, %s3411_s23  ;;  %v1515_v18 = vrot.slane %v1503_v45, 3  ;;  %v1516_v7 = vrot.slane %v4314_v32, 3 }
 0x801   : > { %1388 = vrot.lane.b32.xlu0 %v1377_v15, %s3415_s20 }
 0x802   : > { %v1517_v54 = vsel %vm811_vm6, %v1515_v18, %v1516_v7 }
 0x805   : > { %v4282_v30 = vpop.permute.xlu1 %1352 }
 0x808   : > { %1541 = vrot.lane.b32.xlu1 %v1539_v53, %s5614_s9 }
 0x809   : > { %1459 = vrot.lane.b32.xlu0 %v1457_v25, %s3419_s14  ;;  %v1518_v25 = vrot.slane %v1504_v21, 3  ;;  %v1415_v21 = vld [vmem:[#allocation2 + $0x38] sm:$0x7] }
 0x810   : > { %1245 = vrot.lane.b32.xlu1 %v1235_v58, %s3416_s21 }
 0x811   : > { %1582 = vrot.lane.b32.xlu0 %v1580_v28, %s3414_s19  ;;  %v1519_v28 = vrot.slane %v1506_v6, 3 }
 0x818   : > { %1274 = vrot.lane.b32.xlu1 %v1263_v31, %s3421_s16 }
 0x819   : > { %1272 = vrot.lane.b32.xlu0 %v1262_v59, %s3421_s16 }
 0x820   : > { %1328 = vrot.lane.b32.xlu1 %v1318_v3, %s3413_s8 }
 0x821   : > { %1302 = vrot.lane.b32.xlu0 %v1291_v13, %s3422_s17 }
 0x828   : > { %1358 = vrot.lane.b32.xlu1 %v1347_v33, %s3410_s22  ;;  %v1397_v33 = vld [vmem:[#allocation2 + $0x30] sm:$0x7] }
 0x829   : > { %1356 = vrot.lane.b32.xlu0 %v1346_v8, %s3410_s22 }
 0x86a   : > { %v4284_v36 = vpop.permute.xlu1 %1384 }
 0x86b   : > { %v4286_v39 = vpop.permute.xlu0 %1382 }
 0x872   : > { %v4292_v50 = vpop.permute.xlu1 %1418 }
 0x873   : > { %v4296_v35 = vpop.permute.xlu0 %1388  ;;  %v1421_v44 = vmul.f32 %v4292_v50, %v4290_v60  ;;  %v4302_v38 = vmul.f32 %v4292_v50, %v4233_v17  ;;  %v1422_v57 = vmul.f32 %v4292_v50, %v4294_v42  ;;  %v4308_v11 = vmul.f32 %v4292_v50, %v4228_v0 }
 0x874   : > { %5643 = vst [vmem:[#allocation10_spill] sm:$0xff] %v4296_v35 }
 0x875   : > { %v1433_v5 = vrot.slane %v1421_v44, 3  ;;  %v1434_v43 = vrot.slane %v4302_v38, 3  ;;  %v1436_v49 = vrot.slane %v1422_v57, 3  ;;  %v1437_v52 = vrot.slane %v4308_v11, 3 }
 0x876   : > { %v1520_v44 = vsel %vm811_vm6, %v1518_v25, %v1519_v28 }
 0x877   : > { %v1435_v63 = vsel %vm811_vm6, %v1433_v5, %v1434_v43  ;;  %v1438_v41 = vsel %vm811_vm6, %v1436_v49, %v1437_v52 }
 0x878   : > { %1443 = vrot.lane.b32.xlu2 %v1435_v63, %s3416_s21  ;;  %1445 = vrot.lane.b32.xlu0 %v1438_v41, %s3416_s21 }
 0x87a   : > { %v4329_v22 = vpop.permute.xlu1 %1541 }
 0x87b   : > { %v4327_v29 = vpop.permute.xlu0 %1459  ;;  %v1544_v9 = vmul.f32 %v4329_v22, %v4290_v60  ;;  %v4353_v10 = vmul.f32 %v4329_v22, %v4233_v17  ;;  %v1545_v12 = vmul.f32 %v4329_v22, %v4294_v42  ;;  %v4359_v27 = vmul.f32 %v4329_v22, %v4228_v0 }
 0x87c   : > { %v1463_v23 = vmul.f32 %v4327_v29, %v4294_v42  ;;  %v4335_v2 = vmul.f32 %v4327_v29, %v4228_v0  ;;  %v1462_v24 = vmul.f32 %v4327_v29, %v4290_v60  ;;  %v1464_v20 = vmul.f32 %v4327_v29, %v4233_v17 }
 0x87d   : > { %v1556_v58 = vrot.slane %v1544_v9, 3  ;;  %v1557_v31 = vrot.slane %v4353_v10, 3  ;;  %v1559_v59 = vrot.slane %v1545_v12, 3  ;;  %v1560_v3 = vrot.slane %v4359_v27, 3 }
 0x87e   : > { %v1477_v56 = vrot.slane %v1463_v23, 3  ;;  %v1478_v51 = vrot.slane %v4335_v2, 3  ;;  %v1474_v55 = vrot.slane %v1462_v24, 3  ;;  %v1475_v16 = vrot.slane %v1464_v20, 3 }
 0x87f   : > { %v1558_v8 = vsel %vm811_vm6, %v1556_v58, %v1557_v31  ;;  %v1561_v57 = vsel %vm811_vm6, %v1559_v59, %v1560_v3  ;;  %v1466_v45 = vmul.f32 %v4327_v29, %v1397_v33  ;;  %v1426_v12 = vmul.f32 %v4292_v50, %v1415_v21 }
 0x880   : > { %v1479_v15 = vsel %vm811_vm6, %v1477_v56, %v1478_v51  ;;  %v1476_v53 = vsel %vm811_vm6, %v1474_v55, %v1475_v16  ;;  %1525 = vrot.lane.b32.xlu0 %v1517_v54, %s3422_s17  ;;  %v1508_v56 = vmul.f32 %v4288_v47, %v1415_v21 }
 0x881   : > { %1486 = vrot.lane.b32.xlu2 %v1479_v15, %s3421_s16  ;;  %1484 = vrot.lane.b32.xlu1 %v1476_v53, %s3421_s16  ;;  %v1480_v18 = vrot.slane %v1466_v45, 3  ;;  %v1425_v15 = vmul.f32 %v4292_v50, %v1397_v33  ;;  %v1441_v25 = vrot.slane %v1426_v12, 3  ;;  %v1507_v50 = vmul.f32 %v4288_v47, %v1397_v33  ;;  %v1626_v45 = vpop.permute.xlu2 %1625 }
 0x882   : > { %v1523_v53 = vrot.slane %v1508_v56, 3  ;;  %v1628_v38 = vmul.f32 %v1626_v45, %v4294_v42 }
 0x883   : > { %v4370_v13 = vpop.permute.xlu0 %1582  ;;  %v1481_v6 = vsel %vm811_vm6, %v1475_v16, %v1480_v18  ;;  %v1439_v58 = vrot.slane %v1425_v15, 3  ;;  %v1685_v15 = vperm.slane %v4222_v37, 7 }
 0x884   : > { %v1586_v5 = vmul.f32 %v4370_v13, %v4294_v42  ;;  %v4385_v49 = vmul.f32 %v4370_v13, %v4228_v0  ;;  %v1585_v63 = vmul.f32 %v4370_v13, %v4290_v60  ;;  %v1587_v41 = vmul.f32 %v4370_v13, %v4233_v17  ;;  %v1622_v42 = vld [vmem:[#allocation2 + $0x40] sm:$0x7] }
 0x885   : > { %v1524_v16 = vsel %vm811_vm6, %v1519_v28, %v1523_v53  ;;  %v1589_v59 = vmul.f32 %v4370_v13, %v1397_v33  ;;  %v1633_v2 = vmul.f32 %v1626_v45, %v1622_v42  ;;  %v4452_v53 = vpop.permute.xlu1 %1245 }
 0x886   : > { %v1600_v23 = vrot.slane %v1586_v5, 3  ;;  %v1601_v24 = vrot.slane %v4385_v49, 3  ;;  %v1597_v20 = vrot.slane %v1585_v63, 3  ;;  %v1598_v54 = vrot.slane %v1587_v41, 3 }
 0x887   : > { %v1603_v28 = vrot.slane %v1589_v59, 3  ;;  %v1521_v5 = vrot.slane %v1507_v50, 3  ;;  %v1549_v49 = vmul.f32 %v4329_v22, %v1415_v21  ;;  %v1548_v63 = vmul.f32 %v4329_v22, %v1397_v33 }
 0x888   : > { %1568 = vrot.lane.b32.xlu0 %v1561_v57, %s3413_s8  ;;  %v1602_v55 = vsel %vm811_vm6, %v1600_v23, %v1601_v24  ;;  %v1599_v9 = vsel %vm811_vm6, %v1597_v20, %v1598_v54  ;;  %v1467_v57 = vmul.f32 %v4327_v29, %v1415_v21  ;;  %v1640_v41 = vrot.slane %v1628_v38, 3  ;;  %v4480_v38 = vld [vmem:[#allocation2] sm:$0xc0] }
 0x889   : > { %1566 = vrot.lane.b32.xlu2 %v1558_v8, %s3413_s8  ;;  %1527 = vrot.lane.b32.xlu1 %v1520_v44, %s3422_s17  ;;  %v1442_v8 = vsel %vm811_vm6, %v1437_v52, %v1441_v25  ;;  %v1440_v44 = vsel %vm811_vm6, %v1434_v43, %v1439_v58  ;;  %v1604_v52 = vsel %vm811_vm6, %v1598_v54, %v1603_v28  ;;  %v1564_v32 = vrot.slane %v1549_v49, 3 }
 0x88a   : > { %v1482_v11 = vrot.slane %v1467_v57, 3  ;;  %v1630_v43 = vmul.f32 %v1626_v45, %v4228_v0  ;;  %v1522_v47 = vsel %vm811_vm6, %v1516_v7, %v1521_v5  ;;  %v1562_v23 = vrot.slane %v1548_v63, 3  ;;  %v4476_v5 = vld [vmem:[#allocation2 + $0x8] sm:$0xc0] }
 0x88b   : > { %v1631_v7 = vmul.f32 %v1626_v45, %v4253_v46  ;;  %v1565_v20 = vsel %vm811_vm6, %v1560_v3, %v1564_v32  ;;  %v1590_v33 = vmul.f32 %v4370_v13, %v1415_v21  ;;  %v1632_v54 = vmul.f32 %v1626_v45, %v1415_v21 }
 0x88c   : > { %v1483_v29 = vsel %vm811_vm6, %v1478_v51, %v1482_v11  ;;  %v1641_v18 = vrot.slane %v1630_v43, 3  ;;  %v1563_v22 = vsel %vm811_vm6, %v1557_v31, %v1562_v23  ;;  %v1648_v56 = vrot.slane %v1633_v2, 3 }
 0x88d   : > { %v1646_v27 = vrot.slane %v1632_v54, 3  ;;  %v4496_v54 = vld [vmem:[#allocation3 + $0x10] sm:$0xff] }
 0x88e   : > { %v1642_v51 = vsel %vm811_vm6, %v1640_v41, %v1641_v18 }
 0x88f   : > { %v1647_v31 = vsel %vm811_vm6, %v1641_v18, %v1646_v27 }
 0x890   : > { %1488 = vrot.lane.b32.xlu0 %v1481_v6, %s3421_s16  ;;  %v1644_v6 = vrot.slane %v1631_v7, 3  ;;  %v4487_v7 = vld [vmem:[#allocation2 + $0x38] sm:$0x3f] }
 0x891   : > { %1609 = vrot.lane.b32.xlu2 %v1602_v55, %s3410_s22  ;;  %1607 = vrot.lane.b32.xlu1 %v1599_v9, %s3410_s22  ;;  %v1621_v55 = vld [vmem:[#allocation2 + $0x10] sm:$0xf8]  ;;  %v1605_v9 = vrot.slane %v1590_v33, 3 }
 0x892   : > { %v1649_v3 = vsel %vm811_vm6, %v1644_v6, %v1648_v56  ;;  %v1629_v12 = vmul.f32 %v1626_v45, %v1621_v55  ;;  %v4501_v55 = vpop.permute.xlu0 %1272 }
 0x893   : > { %v1606_v10 = vsel %vm811_vm6, %v1601_v24, %v1605_v9  ;;  %v4454_v24 = vpop.permute.xlu1 %1274 }
 0x894   : > { %v1643_v13 = vrot.slane %v1629_v12, 3 }
 0x896   : > { %v1645_v21 = vsel %vm811_vm6, %v1643_v13, %v1644_v6  ;;  %v1726_v6 = vperm.slane %v4496_v54, 0 }
 0x898   : > { %1531 = vrot.lane.b32.xlu0 %v1524_v16, %s3422_s17 }
 0x899   : > { %1449 = vrot.lane.b32.xlu2 %v1442_v8, %s3416_s21  ;;  %1447 = vrot.lane.b32.xlu1 %v1440_v44, %s3416_s21 }
 0x89a   : > { %v4504_v9 = vpop.permute.xlu0 %1302 }
 0x89b   : > { %v4456_v25 = vpop.permute.xlu1 %1328 }
 0x8a0   : > { %1611 = vrot.lane.b32.xlu0 %v1604_v52, %s3410_s22  ;;  %v4478_v52 = vld [vmem:[#allocation2 + $0x30] sm:$0x3f] }
 0x8a1   : > { %1529 = vrot.lane.b32.xlu2 %v1522_v47, %s3422_s17  ;;  %1490 = vrot.lane.b32.xlu1 %v1483_v29, %s3421_s16 }
 0x8a2   : > { %v4506_v27 = vpop.permute.xlu0 %1356 }
 0x8a3   : > { %v4458_v58 = vpop.permute.xlu1 %1358  ;;  %5649 = vst [vmem:[#allocation15_spill] sm:$0xff] %v4506_v27 }
 0x8a4   : > { %5644 = vst [vmem:[#allocation9_spill] sm:$0xff] %v4458_v58 }
 0x8a8   : > { %1650 = vrot.lane.b32.xlu0 %v1642_v51, %s3415_s20 }
 0x8a9   : > { %1572 = vrot.lane.b32.xlu2 %v1565_v20, %s3413_s8  ;;  %1570 = vrot.lane.b32.xlu1 %v1563_v22, %s3413_s8 }
 0x8b0   : > { %1656 = vrot.lane.b32.xlu0 %v1649_v3, %s3415_s20 }
 0x8b1   : > { %1613 = vrot.lane.b32.xlu1 %v1606_v10, %s3410_s22  ;;  %1654 = vrot.lane.b32.xlu2 %v1647_v31, %s3415_s20 }
 0x8b9   : > { %1652 = vrot.lane.b32.xlu1 %v1645_v21, %s3415_s20  ;;  %v4518_v21 = vpop.permute.xlu2 %1247 }
 0x8c1   : > { %1687 = vrot.lane.b32.xlu1 %v1685_v15, %s3411_s23 }
 0x8ea   : > { %v4508_v3 = vpop.permute.xlu0 %1445 }
 0x8f2   : > { %v4510_v12 = vpop.permute.xlu0 %1525 }
 0x8f3   : > { %v4460_v16 = vpop.permute.xlu1 %1484 }
 0x8fa   : > { %v4512_v10 = vpop.permute.xlu0 %1568 }
 0x8fb   : > { %v4462_v59 = vpop.permute.xlu1 %1527 }
 0x902   : > { %v4514_v31 = vpop.permute.xlu0 %1488 }
 0x903   : > { %v4464_v8 = vpop.permute.xlu1 %1607  ;;  %5650 = vst [vmem:[#allocation16_spill] sm:$0xff] %v4514_v31 }
 0x90a   : > { %v4516_v13 = vpop.permute.xlu0 %1531 }
 0x90b   : > { %v4466_v44 = vpop.permute.xlu1 %1447  ;;  %5651 = vst [vmem:[#allocation17_spill] sm:$0xff] %v4516_v13 }
 0x90c   : > { %5645 = vst [vmem:[#allocation11_spill] sm:$0xff] %v4466_v44 }
 0x912   : > { %v4520_v15 = vpop.permute.xlu0 %1611 }
 0x913   : > { %v4468_v50 = vpop.permute.xlu1 %1490  ;;  %5652 = vst [vmem:[#allocation18_spill] sm:$0xff] %v4520_v15 }
 0x914   : > { %5646 = vst [vmem:[#allocation12_spill] sm:$0xff] %v4468_v50 }
 0x91b   : > { %v4470_v57 = vpop.permute.xlu1 %1570 }
 0x91c   : > { %5647 = vst [vmem:[#allocation13_spill] sm:$0xff] %v4470_v57 }
 0x923   : > { %v4472_v28 = vpop.permute.xlu1 %1613 }
 0x924   : > { %5648 = vst [vmem:[#allocation14_spill] sm:$0xff] %v4472_v28 }
 0x92b   : > { %v4474_v45 = vpop.permute.xlu1 %1652 }
 0x933   : > { %v1688_v11 = vpop.permute.xlu1 %1687 }
 0x934   : > { %v1692_v43 = vmul.f32 %v1688_v11, %v4233_v17  ;;  %v1694_v47 = vmul.f32 %v1688_v11, %v4478_v52  ;;  %v1690_v29 = vmul.f32 %v1688_v11, %v4480_v38  ;;  %v1691_v49 = vmul.f32 %v1688_v11, %v4476_v5 }
 0x935   : > { %v1693_v63 = vmul.f32 %v1688_v11, %v4228_v0  ;;  %v1695_v20 = vmul.f32 %v1688_v11, %v4487_v7  ;;  %v4522_v11 = vpop.permute.xlu2 %1300 }
 0x936   : > { %v1703_v42 = vrot.slane %v1692_v43, 6  ;;  %v1708_v41 = vrot.slane %v1694_v47, 6  ;;  %v1702_v18 = vrot.slane %v1690_v29, 6  ;;  %v1705_v32 = vrot.slane %v1691_v49, 6  ;;  %v4524_v43 = vpop.permute.xlu0 %1650 }
 0x937   : > { %v1706_v23 = vrot.slane %v1693_v63, 6  ;;  %v1710_v33 = vrot.slane %v1695_v20, 6 }
 0x938   : > { %v1709_v2 = vsel %vm1673_vm2, %v1703_v42, %v1708_v41  ;;  %v1704_v51 = vsel %vm1673_vm2, %v1702_v18, %v1703_v42 }
 0x939   : > { %1716 = vrot.lane.b32.xlu1 %v1709_v2, %s3416_s21  ;;  %1712 = vrot.lane.b32.xlu2 %v1704_v51, %s3416_s21  ;;  %v1707_v22 = vsel %vm1673_vm2, %v1705_v32, %v1706_v23  ;;  %v1711_v56 = vsel %vm1673_vm2, %v1706_v23, %v1710_v33 }
 0x93a   : > { %1714 = vrot.lane.b32.xlu0 %v1707_v22, %s3416_s21 }
 0x93d   : > { %v4526_v47 = vpop.permute.xlu2 %1330 }
 0x93e   : > { %v4528_v29 = vpop.permute.xlu0 %1656 }
 0x93f   : > { %5653 = vst [vmem:[#allocation19_spill] sm:$0xff] %v4528_v29 }
 0x941   : > { %1718 = vrot.lane.b32.xlu2 %v1711_v56, %s3416_s21 }
 0x942   : > { %1728 = vrot.lane.b32.xlu0 %v1726_v6, %s3419_s14 }
 0x945   : > { %v4530_v49 = vpop.permute.xlu2 %1386 }
 0x946   : > { %5654 = vst [vmem:[#allocation20_spill] sm:$0xff] %v4530_v49 }
 0x94d   : > { %v4534_v42 = vpop.permute.xlu2 %1443 }
 0x955   : > { %v4548_v13 = vpop.permute.xlu2 %1486 }
 0x9ac   : > { %v4532_v63 = vpop.permute.xlu0 %1714 }
 0x9b4   : > { %v1729_v41 = vpop.permute.xlu0 %1728 }
 0x9b5   : > { %v1733_v18 = vmul.f32 %v1729_v41, %v4233_v17  ;;  %v1735_v32 = vmul.f32 %v1729_v41, %v4478_v52  ;;  %v1732_v23 = vmul.f32 %v1729_v41, %v4476_v5  ;;  %v1734_v2 = vmul.f32 %v1729_v41, %v4228_v0 }
 0x9b6   : > { %v1731_v51 = vmul.f32 %v1729_v41, %v4480_v38  ;;  %v1736_v57 = vmul.f32 %v1729_v41, %v4487_v7 }
 0x9b7   : > { %v1744_v20 = vrot.slane %v1733_v18, 6  ;;  %v1749_v22 = vrot.slane %v1735_v32, 6  ;;  %v1746_v33 = vrot.slane %v1732_v23, 6  ;;  %v1747_v6 = vrot.slane %v1734_v2, 6 }
 0x9b8   : > { %v1743_v56 = vrot.slane %v1731_v51, 6  ;;  %v1767_v18 = vperm.slane %v4496_v54, 1  ;;  %v1751_v32 = vrot.slane %v1736_v57, 6 }
 0x9b9   : > { %v1750_v29 = vsel %vm1673_vm2, %v1744_v20, %v1749_v22  ;;  %v1748_v15 = vsel %vm1673_vm2, %v1746_v33, %v1747_v6 }
 0x9ba   : > { %1757 = vrot.lane.b32.xlu0 %v1750_v29, %s3421_s16  ;;  %1755 = vrot.lane.b32.xlu2 %v1748_v15, %s3421_s16  ;;  %v1745_v28 = vsel %vm1673_vm2, %v1743_v56, %v1744_v20  ;;  %v1752_v23 = vsel %vm1673_vm2, %v1747_v6, %v1751_v32  ;;  %v4554_v29 = vpop.permute.xlu2 %1566 }
 0x9bb   : > { %1753 = vrot.lane.b32.xlu1 %v1745_v28, %s3421_s16 }
 0x9c2   : > { %1769 = vrot.lane.b32.xlu2 %v1767_v18, %s3420_s15  ;;  %v4556_v15 = vpop.permute.xlu2 %1609 }
 0x9c3   : > { %1759 = vrot.lane.b32.xlu1 %v1752_v23, %s3421_s16 }
 0x9ca   : > { %v4558_v2 = vpop.permute.xlu2 %1449 }
 0x9cb   : > { %5655 = vst [vmem:[#allocation21_spill] sm:$0xff] %v4558_v2 }
 0x9d2   : > { %v4560_v41 = vpop.permute.xlu2 %1529 }
 0x9d3   : > { %5656 = vst [vmem:[#allocation22_spill] sm:$0xff] %v4560_v41 }
 0x9da   : > { %v4562_v28 = vpop.permute.xlu2 %1572 }
 0x9db   : > { %5657 = vst [vmem:[#allocation23_spill] sm:$0xff] %v4562_v28 }
 0x9e2   : > { %v4564_v51 = vpop.permute.xlu2 %1654 }
 0x9e3   : > { %5658 = vst [vmem:[#allocation24_spill] sm:$0xff] %v4564_v51 }
 0x9ea   : > { %v4566_v20 = vpop.permute.xlu2 %1712 }
 0x9f2   : > { %v4568_v57 = vpop.permute.xlu2 %1718 }
 0x9f3   : > { %5659 = vst [vmem:[#allocation25_spill] sm:$0xff] %v4568_v57 }
 0xa14   : > { %v4570_v22 = vpop.permute.xlu2 %1755 }
 0xa1c   : > { %v1770_v33 = vpop.permute.xlu2 %1769 }
 0xa1d   : > { %v1774_v6 = vmul.f32 %v1770_v33, %v4233_v17  ;;  %v1776_v56 = vmul.f32 %v1770_v33, %v4478_v52  ;;  %v1773_v18 = vmul.f32 %v1770_v33, %v4476_v5  ;;  %v1775_v32 = vmul.f32 %v1770_v33, %v4228_v0 }
 0xa1e   : > { %v1772_v23 = vmul.f32 %v1770_v33, %v4480_v38  ;;  %v1777_v49 = vmul.f32 %v1770_v33, %v4487_v7 }
 0xa1f   : > { %v1785_v28 = vrot.slane %v1774_v6, 6  ;;  %v1790_v41 = vrot.slane %v1776_v56, 6  ;;  %v1787_v51 = vrot.slane %v1773_v18, 6  ;;  %v1788_v31 = vrot.slane %v1775_v32, 6 }
 0xa20   : > { %v1784_v50 = vrot.slane %v1772_v23, 6  ;;  %v1808_v6 = vperm.slane %v4496_v54, 2  ;;  %v1792_v56 = vrot.slane %v1777_v49, 6 }
 0xa21   : > { %v1791_v57 = vsel %vm1673_vm2, %v1785_v28, %v1790_v41  ;;  %v1789_v44 = vsel %vm1673_vm2, %v1787_v51, %v1788_v31  ;;  %v4588_v41 = vpop.permute.xlu1 %1716 }
 0xa22   : > { %1798 = vrot.lane.b32.xlu2 %v1791_v57, %s3422_s17  ;;  %1796 = vrot.lane.b32.xlu1 %v1789_v44, %s3422_s17  ;;  %v1786_v2 = vsel %vm1673_vm2, %v1784_v50, %v1785_v28  ;;  %v1793_v18 = vsel %vm1673_vm2, %v1788_v31, %v1792_v56  ;;  %5660 = vst [vmem:[#allocation26_spill] sm:$0xff] %v4588_v41 }
 0xa23   : > { %1794 = vrot.lane.b32.xlu0 %v1786_v2, %s3422_s17 }
 0xa2a   : > { %1810 = vrot.lane.b32.xlu1 %v1808_v6, %s5614_s9  ;;  %s5662_s9 = smov 96  }
 0xa2b   : > { %1800 = vrot.lane.b32.xlu0 %v1793_v18, %s3422_s17 }
 0xa2d   : > { %v4590_v51 = vpop.permute.xlu1 %1753 }
 0xa35   : > { %v4592_v44 = vpop.permute.xlu1 %1759 }
 0xa36   : > { %5661 = vst [vmem:[#allocation27_spill] sm:$0xff] %v4592_v44 }
 0xa94   : > { %v4594_v50 = vpop.permute.xlu1 %1796 }
 0xa9c   : > { %v1811_v28 = vpop.permute.xlu1 %1810 }
 0xa9d   : > { %v1815_v2 = vmul.f32 %v1811_v28, %v4233_v17  ;;  %v1817_v57 = vmul.f32 %v1811_v28, %v4478_v52  ;;  %v1813_v49 = vmul.f32 %v1811_v28, %v4480_v38  ;;  %v1814_v33 = vmul.f32 %v1811_v28, %v4476_v5 }
 0xa9e   : > { %v1816_v31 = vmul.f32 %v1811_v28, %v4228_v0  ;;  %v1818_v35 = vmul.f32 %v1811_v28, %v4487_v7 }
 0xa9f   : > { %v1826_v32 = vrot.slane %v1815_v2, 6  ;;  %v1831_v23 = vrot.slane %v1817_v57, 6  ;;  %v1825_v6 = vrot.slane %v1813_v49, 6  ;;  %v1828_v56 = vrot.slane %v1814_v33, 6 }
 0xaa0   : > { %v1829_v18 = vrot.slane %v1816_v31, 6  ;;  %v1833_v58 = vrot.slane %v1818_v35, 6  ;;  %v1849_v2 = vperm.slane %v4496_v54, 3  ;;  %v1221_v49 = vperm.slane %v4071_v34, 0 }
 0xaa1   : > { %v1832_v44 = vsel %vm1673_vm2, %v1826_v32, %v1831_v23  ;;  %v1827_v41 = vsel %vm1673_vm2, %v1825_v6, %v1826_v32  ;;  %v1305_v33 = vsel %vm1304_vm9, %v4214_v40, %v4208_v1  ;;  %v1333_v32 = vsel %vm1332_vm10, %v4244_v4, %v4216_v26 }
 0xaa2   : > { %1839 = vrot.lane.b32.xlu1 %v1832_v44, %s3413_s8  ;;  %1835 = vrot.lane.b32.xlu2 %v1827_v41, %s3413_s8  ;;  %v1830_v27 = vsel %vm1673_vm2, %v1828_v56, %v1829_v18  ;;  %v1834_v57 = vsel %vm1673_vm2, %v1829_v18, %v1833_v58  ;;  %v4616_v44 = vld [vmem:[%s5602_s4] ss:$0 sm:$0xff]  ;;  %v1222_v41 = vmul.f32 0.0, %v1221_v49  ;;  %v1249_v58 = vsel %vm397_vm4, %v4195_v14, %v4184_v48  ;;  %v4649_v18 = vpop.permute.xlu0 %1757 }
 0xaa3   : > { %1837 = vrot.lane.b32.xlu0 %v1830_v27, %s3413_s8  ;;  %v1277_v27 = vsel %vm1276_vm5, %v4206_v19, %v4197_v62  ;;  %v4634_v23 = vperm.slane %v4071_v34, 7  ;;  %v1361_v14 = vsel %vm1360_vm11, %v4282_v30, %v4246_v61  ;;  %v1390_v40 = vsel %vm369_vm3, %v4286_v39, %v4284_v36 }
 0xaa4   : > { %v1224_v35 = vadd.f32 %v4616_v44, %v1222_v41  ;;  %v1451_v30 = vsel %vm397_vm4, %v4534_v42, %v4508_v3  ;;  %v1492_v36 = vsel %vm1276_vm5, %v4460_v16, %v4548_v13  ;;  %v1574_v3 = vsel %vm1332_vm10, %v4554_v29, %v4512_v10 }
 0xaa5   : > { %v1399_v62 = vmul.f32 %v4634_v23, %v4290_v60  ;;  %v4643_v19 = vmul.f32 %v4634_v23, %v4233_v17  ;;  %v1615_v42 = vsel %vm1360_vm11, %v4464_v8, %v4556_v15 }
 0xaa6   : > { %v1253_v28 = vadd.f32 %v1249_v58, %v1224_v35  ;;  %v4664_v58 = vperm.slane %v4222_v37, 6  ;;  %v1658_v37 = vsel %vm369_vm3, %v4524_v43, %v4474_v45  ;;  %v1761_v45 = vsel %vm1276_vm5, %v4590_v51, %v4570_v22 }
 0xaa7   : > { %v1405_v4 = vrot.slane %v1399_v62, 3  ;;  %v1406_v6 = vrot.slane %v4643_v19, 3 }
 0xaa8   : > { %v1281_v31 = vadd.f32 %v1277_v27, %v1253_v28  ;;  %v4674_v16 = vmul.f32 %v4664_v58, %v4233_v17  ;;  %v4682_v28 = vpop.permute.xlu2 %1798 }
 0xaa9   : > { %v1407_v61 = vsel %vm811_vm6, %v1405_v4, %v1406_v6 }
 0xaaa   : > { %1841 = vrot.lane.b32.xlu2 %v1834_v57, %s3413_s8  ;;  %v1309_v48 = vadd.f32 %v1305_v33, %v1281_v31  ;;  %v1795_v35 = vpop.permute.xlu0 %1794  ;;  %v5617_v27 = vrot.slane %v4674_v16, 6  ;;  %v1720_v33 = vsel %vm397_vm4, %v4566_v20, %v4532_v63 }
 0xaab   : > { %1851 = vrot.lane.b32.xlu0 %v1849_v2, %s3414_s19  ;;  %v1533_v2 = vsel %vm1304_vm9, %v4510_v12, %v4462_v59  ;;  %v1667_v59 = vmul.f32 %v4664_v58, %v4480_v38 }
 0xaac   : > { %v1337_v1 = vadd.f32 %v1333_v32, %v1309_v48  ;;  %v1802_v32 = vsel %vm1304_vm9, %v1795_v35, %v4594_v50 }
 0xaad   : > { %v1674_v10 = vrot.slane %v1667_v59, 6 }
 0xaae   : > { %v1365_v26 = vadd.f32 %v1361_v14, %v1337_v1 }
 0xaaf   : > { %v1676_v15 = vsel %vm1673_vm2, %v1674_v10, %v5617_v27 }
 0xab0   : > { %v1394_v56 = vadd.f32 %v1390_v40, %v1365_v26 }
 0xab2   : > { %v1412_v60 = vadd.f32 %v1407_v61, %v1394_v56  ;;  %v4684_v8 = vpop.permute.xlu0 %1800 }
 0xab4   : > { %v1455_v39 = vadd.f32 %v1451_v30, %v1412_v60 }
 0xab6   : > { %v1496_v57 = vadd.f32 %v1492_v36, %v1455_v39 }
 0xab8   : > { %v1537_v41 = vadd.f32 %v1533_v2, %v1496_v57 }
 0xaba   : > { %v1578_v12 = vadd.f32 %v1574_v3, %v1537_v41 }
 0xabc   : > { %v1619_v13 = vadd.f32 %v1615_v42, %v1578_v12  ;;  %v1890_v42 = vld [vmem:[#allocation2 + $0x10] sm:$0xc0] }
 0xabe   : > { %v1662_v29 = vadd.f32 %v1658_v37, %v1619_v13 }
 0xac0   : > { %v1681_v31 = vadd.f32 %v1676_v15, %v1662_v29  ;;  %v1891_v15 = vld [vmem:[#allocation2 + $0x40] sm:$0x3f] }
 0xac2   : > { %v1724_v43 = vadd.f32 %v1720_v33, %v1681_v31 }
 0xac4   : > { %v1765_v48 = vadd.f32 %v1761_v45, %v1724_v43 }
 0xac6   : > { %v1806_v14 = vadd.f32 %v1802_v32, %v1765_v48 }
 0xafc   : > { %v1836_v62 = vpop.permute.xlu2 %1835 }
 0xb04   : > { %v4714_v35 = vpop.permute.xlu2 %1841 }
 0xb15   : > { %v1838_v1 = vpop.permute.xlu0 %1837 }
 0xb16   : > { %v1843_v40 = vsel %vm1332_vm10, %v1836_v62, %v1838_v1 }
 0xb17   : > { %v1847_v26 = vadd.f32 %v1843_v40, %v1806_v14 }
 0xb1d   : > { %v1852_v4 = vpop.permute.xlu0 %1851 }
 0xb1e   : > { %v1856_v56 = vmul.f32 %v1852_v4, %v4233_v17  ;;  %v1858_v63 = vmul.f32 %v1852_v4, %v4478_v52  ;;  %v1855_v20 = vmul.f32 %v1852_v4, %v4476_v5  ;;  %v1857_v22 = vmul.f32 %v1852_v4, %v4228_v0 }
 0xb1f   : > { %v1854_v51 = vmul.f32 %v1852_v4, %v4480_v38  ;;  %v1859_v52 = vmul.f32 %v1852_v4, %v4487_v7  ;;  %v1892_v38 = vperm.slane %v4496_v54, 4 }
 0xb20   : > { %v1867_v61 = vrot.slane %v1856_v56, 6  ;;  %v1872_v50 = vrot.slane %v1858_v63, 6  ;;  %v1869_v30 = vrot.slane %v1855_v20, 6  ;;  %v1870_v60 = vrot.slane %v1857_v22, 6 }
 0xb21   : > { %v1866_v36 = vrot.slane %v1854_v51, 6  ;;  %v1874_v57 = vrot.slane %v1859_v52, 6 }
 0xb22   : > { %v1873_v39 = vsel %vm1673_vm2, %v1867_v61, %v1872_v50  ;;  %v1871_v2 = vsel %vm1673_vm2, %v1869_v30, %v1870_v60  ;;  %v4738_v30 = vld [vmem:[#allocation2 + $0x30] sm:$0xff] }
 0xb23   : > { %1880 = vrot.lane.b32.xlu0 %v1873_v39, %s3410_s22  ;;  %1878 = vrot.lane.b32.xlu2 %v1871_v2, %s3410_s22  ;;  %v1868_v17 = vsel %vm1673_vm2, %v1866_v36, %v1867_v61  ;;  %v1875_v41 = vsel %vm1673_vm2, %v1870_v60, %v1874_v57  ;;  %v4740_v36 = vld [vmem:[#allocation2 + $0x48] sm:$0x1]  ;;  %v4742_v39 = vld [vmem:[#allocation2 + $0x20] sm:$0xfe]  ;;  %v4744_v2 = vld [vmem:[#allocation2 + $0x38] sm:$0xff] }
 0xb24   : > { %1876 = vrot.lane.b32.xlu1 %v1868_v17, %s3410_s22 }
 0xb2b   : > { %1894 = vrot.lane.b32.xlu2 %v1892_v38, %s3412_s29  ;;  %v4749_v38 = vld [vmem:[#allocation2 + $0x18] sm:$0xfe] }
 0xb2c   : > { %1882 = vrot.lane.b32.xlu1 %v1875_v41, %s3410_s22 }
 0xb7d   : > { %v1879_v3 = vpop.permute.xlu2 %1878 }
 0xb85   : > { %v1895_v59 = vpop.permute.xlu2 %1894 }
 0xb86   : > { %v1899_v12 = vmul.f32 %v1895_v59, %v4228_v0  ;;  %v1901_v37 = vmul.f32 %v1895_v59, %v4487_v7  ;;  %v1897_v13 = vmul.f32 %v1895_v59, %v4476_v5  ;;  %v1898_v10 = vmul.f32 %v1895_v59, %v1890_v42 }
 0xb87   : > { %v1900_v29 = vmul.f32 %v1895_v59, %v4253_v46  ;;  %v1902_v62 = vmul.f32 %v1895_v59, %v1891_v15  ;;  %v4726_v46 = vpop.permute.xlu1 %1839  ;;  %v1955_v7 = vperm.slane %v4496_v54, 6 }
 0xb88   : > { %v1910_v33 = vrot.slane %v1899_v12, 6  ;;  %v1915_v31 = vrot.slane %v1901_v37, 6  ;;  %v1909_v45 = vrot.slane %v1897_v13, 6  ;;  %v1912_v43 = vrot.slane %v1898_v10, 6  ;;  %v4754_v10 = vld [vmem:[#allocation2 + $0x50] sm:$0x1] }
 0xb89   : > { %v1913_v32 = vrot.slane %v1900_v29, 6  ;;  %v1917_v5 = vrot.slane %v1902_v62, 6 }
 0xb8a   : > { %v1916_v48 = vsel %vm1673_vm2, %v1910_v33, %v1915_v31  ;;  %v1911_v14 = vsel %vm1673_vm2, %v1909_v45, %v1910_v33  ;;  %v1996_v45 = vperm.slane %v4496_v54, 7 }
 0xb8b   : > { %1923 = vrot.lane.b32.xlu2 %v1916_v48, %s3415_s20  ;;  %1919 = vrot.lane.b32.xlu0 %v1911_v14, %s3415_s20  ;;  %v1914_v0 = vsel %vm1673_vm2, %v1912_v43, %v1913_v32  ;;  %v1918_v1 = vsel %vm1673_vm2, %v1913_v32, %v1917_v5  ;;  %v4767_v32 = vperm.slane %v4496_v54, 5 }
 0xb8c   : > { %1921 = vrot.lane.b32.xlu1 %v1914_v0, %s3415_s20 }
 0xb8d   : > { %v1937_v48 = vmul.f32 %v4767_v32, %v4749_v38  ;;  %v4777_v0 = vmul.f32 %v4767_v32, %v4738_v30 }
 0xb8f   : > { %v1943_v5 = vrot.slane %v1937_v48, 1 }
 0xb93   : > { %1925 = vrot.lane.b32.xlu0 %v1918_v1, %s3415_s20 }
 0xb94   : > { %1957 = vrot.lane.b32.xlu1 %v1955_v7, %s3411_s23  ;;  %v5616_v7 = vrot.slane %v4777_v0, 1 }
 0xb95   : > { %v4733_v63 = vpop.permute.xlu0 %1880 }
 0xb96   : > { %v1877_v40 = vpop.permute.xlu1 %1876  ;;  %v1945_v1 = vsel %vm441_vm0, %v1943_v5, %v5616_v7 }
 0xb97   : > { %v1884_v4 = vsel %vm1360_vm11, %v1877_v40, %v1879_v3 }
 0xb98   : > { %v1888_v56 = vadd.f32 %v1884_v4, %v1847_v26 }
 0xb9e   : > { %v4735_v20 = vpop.permute.xlu1 %1882 }
 0xbe5   : > { %v4771_v14 = vpop.permute.xlu2 %1923 }
 0xbfd   : > { %v1920_v22 = vpop.permute.xlu0 %1919 }
 0xbfe   : > { %v1922_v51 = vpop.permute.xlu1 %1921 }
 0xbff   : > { %v1927_v61 = vsel %vm369_vm3, %v1920_v22, %v1922_v51 }
 0xc00   : > { %v1931_v50 = vadd.f32 %v1927_v61, %v1888_v56 }
 0xc02   : > { %v1950_v40 = vadd.f32 %v1945_v1, %v1931_v50 }
 0xc05   : > { %v4773_v62 = vpop.permute.xlu0 %1925 }
 0xc06   : > { %v1958_v60 = vpop.permute.xlu1 %1957 }
 0xc07   : > { %v1962_v26 = vmul.f32 %v1958_v60, %v4738_v30  ;;  %v1964_v17 = vmul.f32 %v1958_v60, %v4740_v36  ;;  %v1961_v52 = vmul.f32 %v1958_v60, %v4742_v39  ;;  %v1963_v57 = vmul.f32 %v1958_v60, %v4744_v2 }
 0xc08   : > { %v1960_v41 = vmul.f32 %v1958_v60, %v4749_v38  ;;  %v1965_v33 = vmul.f32 %v1958_v60, %v4754_v10 }
 0xc09   : > { %v1973_v3 = vrot.slane %v1962_v26, 1  ;;  %v1978_v42 = vrot.slane %v1964_v17, 1  ;;  %v1975_v59 = vrot.slane %v1961_v52, 1  ;;  %v1976_v12 = vrot.slane %v1963_v57, 1 }
 0xc0a   : > { %v1972_v37 = vrot.slane %v1960_v41, 1  ;;  %v1980_v31 = vrot.slane %v1965_v33, 1 }
 0xc0b   : > { %v1979_v13 = vsel %vm441_vm0, %v1973_v3, %v1978_v42  ;;  %v1977_v29 = vsel %vm441_vm0, %v1975_v59, %v1976_v12 }
 0xc0c   : > { %1986 = vrot.lane.b32.xlu1 %v1979_v13, %s3416_s21  ;;  %v1974_v15 = vsel %vm441_vm0, %v1972_v37, %v1973_v3  ;;  %1984 = vrot.lane.b32.xlu0 %v1977_v29, %s3416_s21  ;;  %v1981_v43 = vsel %vm441_vm0, %v1976_v12, %v1980_v31 }
 0xc0d   : > { %1982 = vrot.lane.b32.xlu2 %v1974_v15, %s3416_s21  ;;  %v4796_v15 = vld [vmem:[#allocation3 + $0x18] sm:$0xff] }
 0xc0e   : > { %v2037_v33 = vperm.slane %v4796_v15, 0 }
 0xc14   : > { %1998 = vrot.lane.b32.xlu0 %v1996_v45, %s3419_s14 }
 0xc15   : > { %1988 = vrot.lane.b32.xlu2 %v1981_v43, %s3416_s21 }
 0xc67   : > { %v1983_v54 = vpop.permute.xlu2 %1982 }
 0xc6f   : > { %v4802_v45 = vpop.permute.xlu2 %1988 }
 0xc7e   : > { %v1985_v4 = vpop.permute.xlu0 %1984 }
 0xc7f   : > { %v1990_v56 = vsel %vm397_vm4, %v1983_v54, %v1985_v4 }
 0xc80   : > { %v1994_v22 = vadd.f32 %v1990_v56, %v1950_v40 }
 0xc86   : > { %v1999_v51 = vpop.permute.xlu0 %1998 }
 0xc87   : > { %v2003_v61 = vmul.f32 %v1999_v51, %v4738_v30  ;;  %v2005_v60 = vmul.f32 %v1999_v51, %v4740_v36  ;;  %v2001_v26 = vmul.f32 %v1999_v51, %v4749_v38  ;;  %v2002_v17 = vmul.f32 %v1999_v51, %v4742_v39 }
 0xc88   : > { %v2004_v52 = vmul.f32 %v1999_v51, %v4744_v2  ;;  %v2006_v37 = vmul.f32 %v1999_v51, %v4754_v10 }
 0xc89   : > { %v2014_v57 = vrot.slane %v2003_v61, 1  ;;  %v2019_v41 = vrot.slane %v2005_v60, 1  ;;  %v2013_v3 = vrot.slane %v2001_v26, 1  ;;  %v2016_v42 = vrot.slane %v2002_v17, 1 }
 0xc8a   : > { %v2017_v50 = vrot.slane %v2004_v52, 1  ;;  %v2021_v29 = vrot.slane %v2006_v37, 1 }
 0xc8b   : > { %v2020_v59 = vsel %vm441_vm0, %v2014_v57, %v2019_v41  ;;  %v2015_v12 = vsel %vm441_vm0, %v2013_v3, %v2014_v57  ;;  %v4814_v41 = vpop.permute.xlu1 %1986  ;;  %v2163_v3 = vperm.slane %v4796_v15, 3 }
 0xc8c   : > { %2027 = vrot.lane.b32.xlu0 %v2020_v59, %s3421_s16  ;;  %2023 = vrot.lane.b32.xlu1 %v2015_v12, %s3421_s16  ;;  %v2018_v13 = vsel %vm441_vm0, %v2016_v42, %v2017_v50  ;;  %v2022_v31 = vsel %vm441_vm0, %v2017_v50, %v2021_v29  ;;  %v2119_v42 = vperm.slane %v4796_v15, 2  ;;  %v2078_v50 = vperm.slane %v4796_v15, 1 }
 0xc8d   : > { %2025 = vrot.lane.b32.xlu2 %v2018_v13, %s3421_s16  ;;  %v2306_v13 = vperm.slane %v4796_v15, 7  ;;  %v2265_v29 = vperm.slane %v4796_v15, 6 }
 0xc94   : > { %2029 = vrot.lane.b32.xlu1 %v2022_v31, %s3421_s16  ;;  %v302_v31 = vld [vmem:[#allocation3 + $0x20] sm:$0xff] }
 0xc95   : > { %2039 = vrot.lane.b32.xlu2 %v2037_v33, %s3420_s15  ;;  %v2224_v33 = vperm.slane %v4796_v15, 5 }
 0xce7   : > { %v2026_v43 = vpop.permute.xlu2 %2025 }
 0xcef   : > { %v2040_v48 = vpop.permute.xlu2 %2039 }
 0xcf0   : > { %v2044_v5 = vmul.f32 %v2040_v48, %v4738_v30  ;;  %v2046_v1 = vmul.f32 %v2040_v48, %v4740_v36  ;;  %v2043_v54 = vmul.f32 %v2040_v48, %v4742_v39  ;;  %v2045_v40 = vmul.f32 %v2040_v48, %v4744_v2 }
 0xcf1   : > { %v2042_v4 = vmul.f32 %v2040_v48, %v4749_v38 }
 0xcf2   : > { %v2055_v56 = vrot.slane %v2044_v5, 1  ;;  %v2060_v51 = vrot.slane %v2046_v1, 1  ;;  %v2057_v61 = vrot.slane %v2043_v54, 1  ;;  %v2058_v60 = vrot.slane %v2045_v40, 1 }
 0xcf3   : > { %v2054_v26 = vrot.slane %v2042_v4, 1  ;;  %v2431_v5 = vperm.slane %v302_v31, 2  ;;  %v2388_v1 = vperm.slane %v302_v31, 1  ;;  %v2347_v54 = vperm.slane %v302_v31, 0  ;;  %v303_v4 = vld [vmem:[#allocation3 + $0x28] sm:$0xff] }
 0xcf4   : > { %v2061_v17 = vsel %vm441_vm0, %v2055_v56, %v2060_v51  ;;  %v2059_v52 = vsel %vm441_vm0, %v2057_v61, %v2058_v60  ;;  %v2492_v40 = vperm.slane %v302_v31, 4  ;;  %v2656_v51 = vperm.slane %v303_v4, 0 }
 0xcf5   : > { %2068 = vrot.lane.b32.xlu2 %v2061_v17, %s3422_s17  ;;  %2066 = vrot.lane.b32.xlu1 %v2059_v52, %s3422_s17  ;;  %v2056_v57 = vsel %vm441_vm0, %v2054_v26, %v2055_v56  ;;  %v2699_v56 = vperm.slane %v303_v4, 1  ;;  %v2615_v61 = vperm.slane %v302_v31, 7  ;;  %v2844_v26 = vperm.slane %v303_v4, 5 }
 0xcf6   : > { %2064 = vrot.lane.b32.xlu0 %v2056_v57, %s3422_s17  ;;  %v2803_v17 = vperm.slane %v303_v4, 4  ;;  %v2762_v52 = vperm.slane %v303_v4, 3  ;;  %v2047_v57 = vmul.f32 %v2040_v48, %v4754_v10 }
 0xcfd   : > { %2165 = vrot.lane.b32.xlu2 %v2163_v3, %s3412_s29  ;;  %2121 = vrot.lane.b32.xlu1 %v2119_v42, %s3414_s19  ;;  %v2885_v3 = vperm.slane %v303_v4, 6  ;;  %v2062_v42 = vrot.slane %v2047_v57, 1 }
 0xcfe   : > { %2080 = vrot.lane.b32.xlu0 %v2078_v50, %s5662_s9  ;;  %v2024_v59 = vpop.permute.xlu1 %2023 }
 0xcff   : > { %v2031_v12 = vsel %vm1276_vm5, %v2024_v59, %v2026_v43  ;;  %v2533_v43 = vperm.slane %v302_v31, 5  ;;  %v2063_v50 = vsel %vm441_vm0, %v2058_v60, %v2062_v42 }
 0xd00   : > { %v2035_v37 = vadd.f32 %v2031_v12, %v1994_v22  ;;  %v2574_v22 = vperm.slane %v302_v31, 6  ;;  %v4848_v12 = vpop.permute.xlu0 %2027 }
 0xd05   : > { %2308 = vrot.lane.b32.xlu2 %v2306_v13, %s3420_s15  ;;  %2267 = vrot.lane.b32.xlu1 %v2265_v29, %s3419_s14 }
 0xd06   : > { %2226 = vrot.lane.b32.xlu0 %v2224_v33, %s3411_s23  ;;  %v4846_v59 = vpop.permute.xlu1 %2029 }
 0xd0d   : > { %2433 = vrot.lane.b32.xlu2 %v2431_v5, %s3412_s29  ;;  %2390 = vrot.lane.b32.xlu1 %v2388_v1, %s3414_s19 }
 0xd0e   : > { %2349 = vrot.lane.b32.xlu0 %v2347_v54, %s5662_s9 }
 0xd15   : > { %2576 = vrot.lane.b32.xlu2 %v2574_v22, %s3420_s15  ;;  %2535 = vrot.lane.b32.xlu1 %v2533_v43, %s3419_s14 }
 0xd16   : > { %2494 = vrot.lane.b32.xlu0 %v2492_v40, %s3411_s23 }
 0xd1d   : > { %2701 = vrot.lane.b32.xlu2 %v2699_v56, %s3412_s29  ;;  %2658 = vrot.lane.b32.xlu1 %v2656_v51, %s3414_s19 }
 0xd1e   : > { %2617 = vrot.lane.b32.xlu0 %v2615_v61, %s5662_s9 }
 0xd25   : > { %2846 = vrot.lane.b32.xlu2 %v2844_v26, %s3420_s15  ;;  %2805 = vrot.lane.b32.xlu1 %v2803_v17, %s3419_s14  ;;  %s3209_s15 = sshll.u32 %s3485_s28, 4 }
 0xd26   : > { %2764 = vrot.lane.b32.xlu0 %v2762_v52, %s3411_s23  ;;  %s3118_s13 = scalar_lea.hbm %s5605_s7, %s3209_s15 }
 0xd27   : > { %s3121_s23 = sshll.u32 %s3118_s13, 4  ;;  %s3122_s23 = int_to_ptr.hbm [resolvable:$true] %s3121_s23 }
 0xd2d   : > { %2887 = vrot.lane.b32.xlu1 %v2885_v3, %s5662_s9 }
 0xd2e   : > { %2070 = vrot.lane.b32.xlu0 %v2063_v50, %s3422_s17 }
 0xd4f   : > { %v4867_v50 = vpop.permute.xlu2 %2068 }
 0xd67   : > { %v2067_v13 = vpop.permute.xlu1 %2066 }
 0xd68   : > { %v2065_v29 = vpop.permute.xlu0 %2064 }
 0xd69   : > { %v2072_v33 = vsel %vm1304_vm9, %v2065_v29, %v2067_v13 }
 0xd6a   : > { %v4851_v31 = vadd.f32 %v2072_v33, %v2035_v37  ;;  %v2926_v33 = vperm.slane %v303_v4, 7  ;;  %v2160_v4 = vld [vmem:[#allocation2 + $0x28] sm:$0xfe] }
 0xd6f   : > { %v2122_v22 = vpop.permute.xlu1 %2121 }
 0xd70   : > { %v2081_v48 = vpop.permute.xlu0 %2080  ;;  %v2124_v52 = vmul.f32 %v2122_v22, %v4749_v38  ;;  %v2126_v57 = vmul.f32 %v2122_v22, %v4738_v30 }
 0xd71   : > { %v2085_v5 = vmul.f32 %v2081_v48, %v4738_v30  ;;  %v2087_v1 = vmul.f32 %v2081_v48, %v4740_v36  ;;  %v2084_v54 = vmul.f32 %v2081_v48, %v4742_v39  ;;  %v2086_v60 = vmul.f32 %v2081_v48, %v4744_v2 }
 0xd72   : > { %v2083_v43 = vmul.f32 %v2081_v48, %v4749_v38  ;;  %v2088_v42 = vmul.f32 %v2081_v48, %v4754_v10  ;;  %v2136_v13 = vrot.slane %v2124_v52, 1  ;;  %v2137_v29 = vrot.slane %v2126_v57, 1 }
 0xd73   : > { %v2096_v40 = vrot.slane %v2085_v5, 1  ;;  %v2101_v56 = vrot.slane %v2087_v1, 1  ;;  %v2098_v51 = vrot.slane %v2084_v54, 1  ;;  %v2099_v61 = vrot.slane %v2086_v60, 1 }
 0xd74   : > { %v2095_v26 = vrot.slane %v2083_v43, 1  ;;  %v2103_v5 = vrot.slane %v2088_v42, 1  ;;  %v2138_v38 = vsel %vm441_vm0, %v2136_v13, %v2137_v29  ;;  %v2127_v1 = vmul.f32 %v2122_v22, %v4744_v2 }
 0xd75   : > { %v2102_v37 = vsel %vm441_vm0, %v2096_v40, %v2101_v56  ;;  %v2100_v17 = vsel %vm441_vm0, %v2098_v51, %v2099_v61  ;;  %v2129_v54 = vmul.f32 %v2122_v22, %v4754_v10  ;;  %v2128_v60 = vmul.f32 %v2122_v22, %v4740_v36 }
 0xd76   : > { %2109 = vrot.lane.b32.xlu1 %v2102_v37, %s3413_s8  ;;  %2107 = vrot.lane.b32.xlu0 %v2100_v17, %s3413_s8  ;;  %v2097_v3 = vsel %vm441_vm0, %v2095_v26, %v2096_v40  ;;  %v2104_v48 = vsel %vm441_vm0, %v2099_v61, %v2103_v5  ;;  %v2125_v43 = vmul.f32 %v2122_v22, %v4742_v39  ;;  %v4878_v40 = vld [vmem:[#allocation2 + $0x40] sm:$0xff]  ;;  %v2140_v56 = vrot.slane %v2127_v1, 1  ;;  %v2166_v37 = vpop.permute.xlu2 %2165 }
 0xd77   : > { %2105 = vrot.lane.b32.xlu2 %v2097_v3, %s3413_s8  ;;  %v2144_v51 = vrot.slane %v2129_v54, 1  ;;  %v2142_v26 = vrot.slane %v2128_v60, 1  ;;  %v2169_v52 = vmul.f32 %v2166_v37, %v2160_v4  ;;  %v2171_v57 = vmul.f32 %v2166_v37, %v4878_v40  ;;  %v2162_v54 = vld [vmem:[#allocation2 + $0x58] sm:$0x1] }
 0xd78   : > { %v2139_v17 = vrot.slane %v2125_v43, 1  ;;  %v2168_v61 = vmul.f32 %v2166_v37, %v4742_v39  ;;  %v2170_v22 = vmul.f32 %v2166_v37, %v4744_v2  ;;  %v2227_v60 = vpop.permute.xlu0 %2226  ;;  %v2173_v39 = vmul.f32 %v2166_v37, %v2162_v54  ;;  %v4890_v43 = vld [vmem:[#allocation2 + $0x18] sm:$0xf0] }
 0xd79   : > { %v2145_v3 = vsel %vm441_vm0, %v2140_v56, %v2144_v51  ;;  %v2143_v42 = vsel %vm441_vm0, %v2137_v29, %v2142_v26  ;;  %v2184_v5 = vrot.slane %v2171_v57, 1  ;;  %v2229_v51 = vmul.f32 %v2227_v60, %v4890_v43 }
 0xd7a   : > { %v2141_v13 = vsel %vm441_vm0, %v2139_v17, %v2140_v56  ;;  %v2181_v1 = vrot.slane %v2170_v22, 1  ;;  %v2231_v56 = vmul.f32 %v2227_v60, %v4738_v30  ;;  %v2172_v26 = vmul.f32 %v2166_v37, %v4754_v10  ;;  %v4902_v22 = vld [vmem:[#allocation2 + $0x50] sm:$0xf] }
 0xd7b   : > { %v2188_v17 = vrot.slane %v2173_v39, 1  ;;  %v2232_v10 = vmul.f32 %v2227_v60, %v4744_v2  ;;  %v2234_v37 = vmul.f32 %v2227_v60, %v4902_v22 }
 0xd7c   : > { %v2242_v57 = vrot.slane %v2231_v56, 4 }
 0xd7d   : > { %v2245_v39 = vrot.slane %v2232_v10, 4 }
 0xd7e   : > { %2146 = vrot.lane.b32.xlu1 %v2138_v38, %s3410_s22  ;;  %2928 = vrot.lane.b32.xlu0 %v2926_v33, %s3414_s19  ;;  %v2183_v33 = vrot.slane %v2169_v52, 1  ;;  %v2180_v38 = vrot.slane %v2168_v61, 1  ;;  %v2241_v52 = vrot.slane %v2229_v51, 4  ;;  %v4900_v61 = vld [vmem:[#allocation2 + $0x48] sm:$0xf] }
 0xd7f   : > { %2111 = vrot.lane.b32.xlu2 %v2104_v48, %s3413_s8  ;;  %v3296_v48 = vld [vmem:[#allocation3 + $0x30] ss:$0 sm:$0xff] }
 0xd80   : > { %v2185_v29 = vsel %vm441_vm0, %v2183_v33, %v2184_v5  ;;  %v2182_v4 = vsel %vm441_vm0, %v2180_v38, %v2181_v1  ;;  %v2233_v33 = vmul.f32 %v2227_v60, %v4900_v61  ;;  %v4906_v38 = vld [vmem:[#allocation2 + $0x20] sm:$0xf0] }
 0xd86   : > { %2152 = vrot.lane.b32.xlu1 %v2145_v3, %s3410_s22  ;;  %2150 = vrot.lane.b32.xlu0 %v2143_v42, %s3410_s22  ;;  %v2186_v3 = vrot.slane %v2172_v26, 1  ;;  %v2189_v42 = vsel %vm441_vm0, %v2184_v5, %v2188_v17  ;;  %v2230_v5 = vmul.f32 %v2227_v60, %v4906_v38 }
 0xd87   : > { %2148 = vrot.lane.b32.xlu2 %v2141_v13, %s3410_s22  ;;  %v2243_v13 = vsel %vm996_vm7, %v2241_v52, %v2242_v57 }
 0xd88   : > { %v2187_v54 = vsel %vm441_vm0, %v2181_v1, %v2186_v3  ;;  %v2244_v51 = vrot.slane %v2230_v5, 4 }
 0xd8a   : > { %v2246_v60 = vsel %vm996_vm7, %v2244_v51, %v2245_v39 }
 0xd8e   : > { %2192 = vrot.lane.b32.xlu1 %v2185_v29, %s3415_s20  ;;  %2190 = vrot.lane.b32.xlu0 %v2182_v4, %s3415_s20  ;;  %v2268_v29 = vpop.permute.xlu1 %2267  ;;  %v2249_v4 = vrot.slane %v2234_v37, 4 }
 0xd8f   : > { %2972 = vrot.lane.b32.xlu2 %v3296_v48, %s3412_s29  ;;  %v2247_v48 = vrot.slane %v2233_v33, 4  ;;  %v2271_v56 = vmul.f32 %v2268_v29, %v4906_v38  ;;  %v2273_v26 = vmul.f32 %v2268_v29, %v4744_v2  ;;  %v2272_v1 = vmul.f32 %v2268_v29, %v4738_v30 }
 0xd90   : > { %v2250_v52 = vsel %vm996_vm7, %v2245_v39, %v2249_v4  ;;  %v2274_v3 = vmul.f32 %v2268_v29, %v4900_v61 }
 0xd91   : > { %v2248_v17 = vsel %vm996_vm7, %v2242_v57, %v2247_v48  ;;  %v2285_v33 = vrot.slane %v2271_v56, 4  ;;  %v2286_v10 = vrot.slane %v2273_v26, 4  ;;  %v2283_v57 = vrot.slane %v2272_v1, 4 }
 0xd92   : > { %v2288_v37 = vrot.slane %v2274_v3, 4  ;;  %v2275_v26 = vmul.f32 %v2268_v29, %v4902_v22 }
 0xd93   : > { %v2287_v4 = vsel %vm996_vm7, %v2285_v33, %v2286_v10 }
 0xd94   : > { %v2289_v39 = vsel %vm996_vm7, %v2283_v57, %v2288_v37  ;;  %v2290_v33 = vrot.slane %v2275_v26, 4  ;;  %v3301_v26 = vld [vmem:[#allocation2 + $0x18] sm:$0xff] }
 0xd96   : > { %2196 = vrot.lane.b32.xlu0 %v2189_v42, %s3415_s20  ;;  %2251 = vrot.lane.b32.xlu1 %v2243_v13, %s3416_s21  ;;  %v2270_v42 = vmul.f32 %v2268_v29, %v4890_v43  ;;  %v2309_v13 = vpop.permute.xlu2 %2308 }
 0xd97   : > { %2194 = vrot.lane.b32.xlu2 %v2187_v54, %s3415_s20  ;;  %v2311_v5 = vmul.f32 %v2309_v13, %v4890_v43  ;;  %v2313_v48 = vmul.f32 %v2309_v13, %v4738_v30  ;;  %v2312_v51 = vmul.f32 %v2309_v13, %v4906_v38  ;;  %v2316_v7 = vmul.f32 %v2309_v13, %v4902_v22 }
 0xd98   : > { %v2282_v54 = vrot.slane %v2270_v42, 4  ;;  %v2350_v42 = vpop.permute.xlu0 %2349 }
 0xd99   : > { %v2324_v1 = vrot.slane %v2313_v48, 4  ;;  %v2326_v3 = vrot.slane %v2312_v51, 4  ;;  %v2354_v29 = vmul.f32 %v2350_v42, %v4738_v30  ;;  %v2315_v48 = vmul.f32 %v2309_v13, %v4900_v61 }
 0xd9a   : > { %v2284_v56 = vsel %vm996_vm7, %v2282_v54, %v2283_v57  ;;  %v2352_v54 = vmul.f32 %v2350_v42, %v4890_v43  ;;  %v2353_v34 = vmul.f32 %v2350_v42, %v4906_v38 }
 0xd9c   : > { %v2364_v51 = vrot.slane %v2352_v54, 4  ;;  %v1278_v54 = vsel %vm1276_vm5, %v4501_v55, %v4454_v24 }
 0xd9e   : > { %2255 = vrot.lane.b32.xlu0 %v2248_v17, %s3416_s21  ;;  %2257 = vrot.lane.b32.xlu1 %v2250_v52, %s3416_s21  ;;  %v2314_v17 = vmul.f32 %v2309_v13, %v4744_v2  ;;  %v2323_v52 = vrot.slane %v2311_v5, 4  ;;  %v4937_v37 = vpop.permute.xlu2 %2433  ;;  %v2291_v5 = vsel %vm996_vm7, %v2286_v10, %v2290_v33  ;;  %v2356_v33 = vmul.f32 %v2350_v42, %v4900_v61 }
 0xd9f   : > { %2253 = vrot.lane.b32.xlu2 %v2246_v60, %s3416_s21  ;;  %v2355_v13 = vmul.f32 %v2350_v42, %v4744_v2 }
 0xda0   : > { %v2327_v60 = vrot.slane %v2314_v17, 4  ;;  %v2365_v17 = vrot.slane %v2354_v29, 4  ;;  %v2370_v29 = vrot.slane %v2356_v33, 4 }
 0xda2   : > { %v2328_v57 = vsel %vm996_vm7, %v2326_v3, %v2327_v60  ;;  %v2366_v10 = vsel %vm996_vm7, %v2364_v51, %v2365_v17 }
 0xda6   : > { %2294 = vrot.lane.b32.xlu0 %v2287_v4, %s3421_s16  ;;  %2296 = vrot.lane.b32.xlu1 %v2289_v39, %s3421_s16  ;;  %v2325_v4 = vsel %vm996_vm7, %v2323_v52, %v2324_v1  ;;  %v2331_v39 = vrot.slane %v2316_v7, 4  ;;  %v1223_v52 = vmul.f32 %v3301_v26, %v1221_v49  ;;  %v4952_v27 = vpop.permute.xlu2 %2576  ;;  %v1250_v49 = vsel %vm397_vm4, %v4452_v53, %v4518_v21 }
 0xda7   : > { %2292 = vrot.lane.b32.xlu2 %v2284_v56, %s3421_s16  ;;  %v2329_v56 = vrot.slane %v2315_v48, 4 }
 0xda8   : > { %v2332_v3 = vsel %vm996_vm7, %v2327_v60, %v2331_v39  ;;  %v1225_v60 = vadd.f32 %v4616_v44, %v1223_v52  ;;  %v2367_v39 = vrot.slane %v2353_v34, 4  ;;  %v2371_v44 = vsel %vm996_vm7, %v2365_v17, %v2370_v29  ;;  %v4997_v29 = vpop.permute.xlu0 %2494 }
 0xda9   : > { %v2330_v7 = vsel %vm996_vm7, %v2324_v1, %v2329_v56  ;;  %v1334_v17 = vsel %vm1332_vm10, %v4456_v25, %v4526_v47  ;;  %v2439_v25 = vmul.f32 %v4937_v37, %v4878_v40  ;;  %v3302_v47 = vld [vmem:[#allocation2 + $0x30] sm:$0x7] }
 0xdaa   : > { %v1254_v48 = vadd.f32 %v1250_v49, %v1225_v60 }
 0xdac   : > { %v1282_v51 = vadd.f32 %v1278_v54, %v1254_v48  ;;  %v1401_v48 = vmul.f32 %v3302_v47, %v4634_v23  ;;  %v5665_v23 = vld [vmem:[#allocation10_spill] sm:$0xff] }
 0xdae   : > { %2333 = vrot.lane.b32.xlu0 %v2325_v4, %s3422_s17  ;;  %2335 = vrot.lane.b32.xlu1 %v2328_v57, %s3422_s17  ;;  %v2357_v4 = vmul.f32 %v2350_v42, %v4902_v22  ;;  %v2391_v57 = vpop.permute.xlu1 %2390  ;;  %v1306_v42 = vsel %vm1304_vm9, %v4522_v11, %v4504_v9  ;;  %v4985_v11 = vpop.permute.xlu2 %2701 }
 0xdaf   : > { %2298 = vrot.lane.b32.xlu2 %v2291_v5, %s3421_s16  ;;  %v2368_v5 = vrot.slane %v2355_v13, 4  ;;  %v2394_v53 = vmul.f32 %v2391_v57, %v4906_v38  ;;  %v4975_v21 = vmul.f32 %v2391_v57, %v4744_v2  ;;  %v2395_v24 = vmul.f32 %v2391_v57, %v4738_v30  ;;  %v2429_v13 = vld [vmem:[#allocation2 + $0x28] sm:$0xf0] }
 0xdb0   : > { %v2372_v1 = vrot.slane %v2357_v4, 4  ;;  %v2397_v55 = vmul.f32 %v2391_v57, %v4900_v61  ;;  %v1310_v26 = vadd.f32 %v1306_v42, %v1282_v51  ;;  %v2393_v9 = vmul.f32 %v2391_v57, %v4890_v43 }
 0xdb1   : > { %v2369_v52 = vsel %vm996_vm7, %v2367_v39, %v2368_v5  ;;  %v2408_v4 = vrot.slane %v2394_v53, 4  ;;  %v2406_v34 = vrot.slane %v2395_v24, 4  ;;  %v2436_v53 = vmul.f32 %v4937_v37, %v4906_v38  ;;  %v5666_v24 = vld [vmem:[#allocation20_spill] sm:$0xff] }
 0xdb2   : > { %v2373_v56 = vsel %vm996_vm7, %v2368_v5, %v2372_v1  ;;  %v2411_v49 = vrot.slane %v2397_v55, 4  ;;  %v1338_v60 = vadd.f32 %v1334_v17, %v1310_v26  ;;  %v2405_v5 = vrot.slane %v2393_v9, 4 }
 0xdb3   : > { %v2437_v1 = vmul.f32 %v4937_v37, %v2429_v13  ;;  %v1391_v55 = vsel %vm369_vm3, %v5666_v24, %v5665_v23  ;;  %v1408_v9 = vrot.slane %v1401_v48, 3  ;;  %v2430_v13 = vld [vmem:[#allocation2 + $0x58] sm:$0xf] }
 0xdb4   : > { %v2412_v51 = vsel %vm996_vm7, %v2406_v34, %v2411_v49 }
 0xdb5   : > { %v2451_v26 = vrot.slane %v2437_v1, 4  ;;  %v5669_v1 = vld [vmem:[#allocation12_spill] sm:$0xff] }
 0xdb6   : > { %2339 = vrot.lane.b32.xlu0 %v2332_v3, %s3422_s17  ;;  %2374 = vrot.lane.b32.xlu1 %v2366_v10, %s3413_s8  ;;  %v5663_v3 = vld [vmem:[#allocation9_spill] sm:$0xff]  ;;  %v5664_v10 = vld [vmem:[#allocation15_spill] sm:$0xff]  ;;  %v4995_v54 = vpop.permute.xlu1 %2535  ;;  %v5017_v17 = vpop.permute.xlu2 %2846 }
 0xdb7   : > { %2337 = vrot.lane.b32.xlu2 %v2330_v7, %s3422_s17  ;;  %v1362_v33 = vsel %vm1360_vm11, %v5664_v10, %v5663_v3  ;;  %v2409_v7 = vrot.slane %v4975_v21, 4  ;;  %v2438_v21 = vmul.f32 %v4937_v37, %v4744_v2  ;;  %v2448_v3 = vrot.slane %v2436_v53, 4 }
 0xdb8   : > { %v1366_v39 = vadd.f32 %v1362_v33, %v1338_v60  ;;  %v2499_v53 = vmul.f32 %v4997_v29, %v4738_v30 }
 0xdb9   : > { %v2410_v42 = vsel %vm996_vm7, %v2408_v4, %v2409_v7  ;;  %v2449_v10 = vrot.slane %v2438_v21, 4  ;;  %v5667_v4 = vld [vmem:[#allocation21_spill] sm:$0xff] }
 0xdba   : > { %v1395_v38 = vadd.f32 %v1391_v55, %v1366_v39  ;;  %v5031_v39 = vpop.permute.xlu0 %2617 }
 0xdbb   : > { %v2450_v19 = vsel %vm996_vm7, %v2448_v3, %v2449_v10  ;;  %v5671_v3 = vld [vmem:[#allocation17_spill] sm:$0xff] }
 0xdbe   : > { %2378 = vrot.lane.b32.xlu0 %v2371_v44, %s3413_s8  ;;  %2380 = vrot.lane.b32.xlu1 %v2373_v56, %s3413_s8  ;;  %v2407_v44 = vsel %vm996_vm7, %v2405_v5, %v2406_v34  ;;  %v2398_v56 = vmul.f32 %v2391_v57, %v4902_v22  ;;  %v1409_v57 = vsel %vm811_vm6, %v1406_v6, %v1408_v9  ;;  %v5668_v34 = vld [vmem:[#allocation11_spill] sm:$0xff]  ;;  %v5029_v48 = vpop.permute.xlu1 %2658 }
 0xdbf   : > { %2376 = vrot.lane.b32.xlu2 %v2369_v52, %s3413_s8  ;;  %v2452_v52 = vrot.slane %v2439_v25, 4  ;;  %v1452_v49 = vsel %vm397_vm4, %v5668_v34, %v5667_v4  ;;  %v1413_v5 = vadd.f32 %v1409_v57, %v1395_v38  ;;  %v5670_v25 = vld [vmem:[#allocation16_spill] sm:$0xff]  ;;  %v2441_v6 = vmul.f32 %v4937_v37, %v2430_v13  ;;  %v5672_v13 = vld [vmem:[#allocation22_spill] sm:$0xff]  ;;  %v5673_v4 = vld [vmem:[#allocation23_spill] sm:$0xff] }
 0xdc0   : > { %v2413_v33 = vrot.slane %v2398_v56, 4  ;;  %v1493_v47 = vsel %vm1276_vm5, %v5670_v25, %v5669_v1  ;;  %v2440_v56 = vmul.f32 %v4937_v37, %v4902_v22  ;;  %v2510_v38 = vrot.slane %v2499_v53, 7  ;;  %v5055_v34 = vld [vmem:[#allocation2 + $0x48] sm:$0x7f]  ;;  %v5675_v37 = vld [vmem:[#allocation14_spill] sm:$0xff] }
 0xdc1   : > { %v2453_v60 = vsel %vm996_vm7, %v2451_v26, %v2452_v52  ;;  %v1456_v21 = vadd.f32 %v1452_v49, %v1413_v5  ;;  %v2456_v55 = vrot.slane %v2441_v6, 4  ;;  %v1534_v57 = vsel %vm1304_vm9, %v5672_v13, %v5671_v3  ;;  %v5676_v49 = vld [vmem:[#allocation18_spill] sm:$0xff]  ;;  %v5062_v1 = vld [vmem:[#allocation2 + $0x50] sm:$0x7f] }
 0xdc2   : > { %v2454_v9 = vrot.slane %v2440_v56, 4  ;;  %v2501_v5 = vmul.f32 %v4997_v29, %v5055_v34  ;;  %v2500_v6 = vmul.f32 %v4997_v29, %v4744_v2 }
 0xdc3   : > { %v1497_v23 = vadd.f32 %v1493_v47, %v1456_v21  ;;  %v2457_v25 = vsel %vm996_vm7, %v2452_v52, %v2456_v55  ;;  %v3303_v55 = vld [vmem:[#allocation2 + $0x30] sm:$0x3f] }
 0xdc4   : > { %v2455_v56 = vsel %vm996_vm7, %v2449_v10, %v2454_v9  ;;  %v2515_v13 = vrot.slane %v2501_v5, 7  ;;  %v2540_v5 = vmul.f32 %v4995_v54, %v4738_v30 }
 0xdc5   : > { %v1538_v22 = vadd.f32 %v1534_v57, %v1497_v23  ;;  %v2513_v57 = vrot.slane %v2500_v6, 7 }
 0xdc6   : > { %2417 = vrot.lane.b32.xlu0 %v2410_v42, %s3410_s22  ;;  %2419 = vrot.lane.b32.xlu1 %v2412_v51, %s3410_s22  ;;  %v5033_v42 = vld [vmem:[#allocation2 + $0x18] sm:$0x80]  ;;  %v5072_v21 = vpop.permute.xlu1 %2805 }
 0xdc7   : > { %2415 = vrot.lane.b32.xlu2 %v2407_v44, %s3410_s22  ;;  %v2497_v51 = vmul.f32 %v4997_v29, %v5033_v42  ;;  %v2414_v44 = vsel %vm996_vm7, %v2409_v7, %v2413_v33  ;;  %v5674_v7 = vld [vmem:[#allocation13_spill] sm:$0xff]  ;;  %v2538_v6 = vmul.f32 %v4995_v54, %v5033_v42 }
 0xdc8   : > { %v1575_v33 = vsel %vm1332_vm10, %v5674_v7, %v5673_v4 }
 0xdc9   : > { %v2509_v26 = vrot.slane %v2497_v51, 7  ;;  %v2502_v51 = vmul.f32 %v4997_v29, %v5062_v1  ;;  %v1579_v53 = vadd.f32 %v1575_v33, %v1538_v22  ;;  %v5677_v33 = vld [vmem:[#allocation19_spill] sm:$0xff]  ;;  %v5678_v22 = vld [vmem:[#allocation24_spill] sm:$0xff] }
 0xdca   : > { %v1659_v10 = vsel %vm369_vm3, %v5678_v22, %v5677_v33  ;;  %v2551_v33 = vrot.slane %v2540_v5, 7 }
 0xdcb   : > { %v2511_v47 = vsel %vm1191_vm8, %v2509_v26, %v2510_v38  ;;  %v1669_v26 = vmul.f32 %v3303_v55, %v4664_v58  ;;  %v2517_v4 = vrot.slane %v2502_v51, 7  ;;  %v2516_v58 = vsel %vm1191_vm8, %v2510_v38, %v2515_v13  ;;  %v5682_v55 = vld [vmem:[#allocation27_spill] sm:$0xff] }
 0xdcc   : > { %v5679_v51 = vrot.slane %v4674_v16, 6 }
 0xdce   : > { %2458 = vrot.lane.b32.xlu0 %v2450_v19, %s3415_s20  ;;  %2460 = vrot.lane.b32.xlu1 %v2453_v60, %s3415_s20  ;;  %v1616_v60 = vsel %vm1360_vm11, %v5676_v49, %v5675_v37  ;;  %v5066_v19 = vld [vmem:[#allocation2 + $0x20] sm:$0x80]  ;;  %v1677_v37 = vrot.slane %v1669_v26, 6  ;;  %v5090_v49 = vmul.f32 %v4995_v54, %v4744_v2  ;;  %v1762_v26 = vsel %vm1276_vm5, %v4649_v18, %v5682_v55  ;;  %v5113_v13 = vpop.permute.xlu1 %2887 }
 0xdcf   : > { %2421 = vrot.lane.b32.xlu2 %v2414_v44, %s3410_s22  ;;  %v5074_v44 = vpop.permute.xlu0 %2764  ;;  %v2498_v52 = vmul.f32 %v4997_v29, %v5066_v19  ;;  %v1620_v23 = vadd.f32 %v1616_v60, %v1579_v53  ;;  %v2539_v29 = vmul.f32 %v4995_v54, %v5066_v19  ;;  %v2518_v60 = vsel %vm1191_vm8, %v2513_v57, %v2517_v4  ;;  %v5680_v53 = vld [vmem:[#allocation25_spill] sm:$0xff] }
 0xdd0   : > { %v1678_v38 = vsel %vm1673_vm2, %v5679_v51, %v1677_v37  ;;  %v2554_v16 = vrot.slane %v5090_v49, 7  ;;  %v2550_v37 = vrot.slane %v2538_v6, 7  ;;  %v1844_v18 = vsel %vm1332_vm10, %v4726_v46, %v4714_v35 }
 0xdd1   : > { %v5047_v24 = vpop.permute.xlu2 %2105  ;;  %v2512_v7 = vrot.slane %v2498_v52, 7  ;;  %v1663_v9 = vadd.f32 %v1659_v10, %v1620_v23  ;;  %v2543_v46 = vmul.f32 %v4995_v54, %v5062_v1  ;;  %v1939_v6 = vmul.f32 %v4767_v32, %v4740_v36 }
 0xdd2   : > { %v2552_v35 = vsel %vm1191_vm8, %v2550_v37, %v2551_v33  ;;  %v2583_v37 = vmul.f32 %v4952_v27, %v5055_v34 }
 0xdd3   : > { %v1682_v23 = vadd.f32 %v1678_v38, %v1663_v9  ;;  %v1803_v9 = vsel %vm1304_vm9, %v4682_v28, %v4684_v8  ;;  %v2582_v28 = vmul.f32 %v4952_v27, %v4744_v2  ;;  %v1928_v38 = vsel %vm369_vm3, %v4771_v14, %v4773_v62 }
 0xdd4   : > { %v1946_v14 = vrot.slane %v1939_v6, 1  ;;  %v2584_v62 = vmul.f32 %v4952_v27, %v5062_v1 }
 0xdd5   : > { %v2595_v36 = vrot.slane %v2582_v28, 7 }
 0xdd6   : > { %2464 = vrot.lane.b32.xlu0 %v2457_v25, %s3415_s20  ;;  %2519 = vrot.lane.b32.xlu1 %v2511_v47, %s3416_s21  ;;  %v2542_v25 = vmul.f32 %v4995_v54, %v5055_v34  ;;  %v2514_v47 = vsel %vm1191_vm8, %v2512_v7, %v2513_v57  ;;  %v2553_v7 = vrot.slane %v2539_v29, 7  ;;  %v5128_v29 = vmul.f32 %v4952_v27, %v4738_v30 }
 0xdd7   : > { %2462 = vrot.lane.b32.xlu2 %v2455_v56, %s3415_s20  ;;  %v5681_v56 = vld [vmem:[#allocation26_spill] sm:$0xff]  ;;  %v5115_v57 = vpop.permute.xlu0 %2070 }
 0xdd8   : > { %v1721_v52 = vsel %vm397_vm4, %v5681_v56, %v5680_v53  ;;  %v2556_v22 = vrot.slane %v2542_v25, 7  ;;  %v2555_v49 = vsel %vm1191_vm8, %v2553_v7, %v2554_v16  ;;  %v2580_v25 = vmul.f32 %v4952_v27, %v5066_v19 }
 0xdd9   : > { %v2112_v3 = vpop.permute.xlu2 %2111  ;;  %v1725_v10 = vadd.f32 %v1721_v52, %v1682_v23  ;;  %v2592_v23 = vrot.slane %v5128_v29, 7  ;;  %v2558_v7 = vrot.slane %v2543_v46, 7 }
 0xdda   : > { %v2557_v5 = vsel %vm1191_vm8, %v2551_v33, %v2556_v22 }
 0xdde   : > { %2523 = vrot.lane.b32.xlu0 %v2516_v58, %s3416_s21  ;;  %2525 = vrot.lane.b32.xlu1 %v2518_v60, %s3416_s21  ;;  %v1766_v58 = vadd.f32 %v1762_v26, %v1725_v10  ;;  %v2579_v60 = vmul.f32 %v4952_v27, %v5033_v42  ;;  %v2620_v10 = vmul.f32 %v5031_v39, %v5033_v42 }
 0xddf   : > { %2521 = vrot.lane.b32.xlu2 %v2514_v47, %s3416_s21  ;;  %v1885_v47 = vsel %vm1360_vm11, %v4733_v63, %v4735_v20  ;;  %v2594_v20 = vrot.slane %v2580_v25, 7 }
 0xde0   : > { %v1807_v8 = vadd.f32 %v1803_v9, %v1766_v58  ;;  %v2591_v52 = vrot.slane %v2579_v60, 7  ;;  %v5683_v9 = vrot.slane %v4777_v0, 1 }
 0xde1   : > { %v2149_v4 = vpop.permute.xlu2 %2148 }
 0xde2   : > { %v1848_v51 = vadd.f32 %v1844_v18, %v1807_v8  ;;  %v2593_v22 = vsel %vm1191_vm8, %v2591_v52, %v2592_v23  ;;  %v1947_v58 = vsel %vm441_vm0, %v5683_v9, %v1946_v14  ;;  %v1991_v18 = vsel %vm397_vm4, %v4814_v41, %v4802_v45  ;;  %v5212_v14 = vld [vmem:[#allocation2 + $0x30] sm:$0xff]  ;;  %v3305_v9 = vld [vmem:[#allocation2 + $0x8] sm:$0xff] }
 0xde3   : > { %v2597_v45 = vrot.slane %v2583_v37, 7  ;;  %v2073_v41 = vsel %vm1304_vm9, %v4867_v50, %v5115_v57  ;;  %v2621_v50 = vmul.f32 %v5031_v39, %v5066_v19  ;;  %vm1187_vm0 = vcmask 123904  }
 0xde4   : > { %v1889_v32 = vadd.f32 %v1885_v47, %v1848_v51  ;;  %1188 = vst.msk [vmem:[#allocation2 + $0x70] sm:$0x3] %vm1187_vm0, %v3305_v9 }
 0xde5   : > { %v2598_v51 = vsel %vm1191_vm8, %v2592_v23, %v2597_v45  ;;  %v2662_v23 = vmul.f32 %v5029_v48, %v5066_v19  ;;  %v3306_v45 = vld [vmem:[#allocation2 + $0x38] sm:$0xff] }
 0xde6   : > { %2562 = vrot.lane.b32.xlu0 %v2555_v49, %s3421_s16  ;;  %2564 = vrot.lane.b32.xlu1 %v2557_v5, %s3421_s16  ;;  %v1932_v33 = vadd.f32 %v1928_v38, %v1889_v32  ;;  %v2032_v49 = vsel %vm1276_vm5, %v4848_v12, %v4846_v59  ;;  %v2632_v5 = vrot.slane %v2620_v10, 7  ;;  %v2624_v59 = vmul.f32 %v5031_v39, %v5055_v34 }
 0xde7   : > { %2560 = vrot.lane.b32.xlu2 %v2552_v35, %s3421_s16  ;;  %v2623_v12 = vmul.f32 %v5031_v39, %v4744_v2 }
 0xde8   : > { %v2110_v53 = vpop.permute.xlu1 %2109  ;;  %v2108_v56 = vpop.permute.xlu0 %2107 }
 0xde9   : > { %v2114_v54 = vsel %vm1332_vm10, %v2110_v53, %v2112_v3  ;;  %v5152_v55 = vpop.permute.xlu2 %2972  ;;  %v2113_v63 = vsel %vm1332_vm10, %v5047_v24, %v2108_v56  ;;  %v2596_v3 = vsel %vm1191_vm8, %v2594_v20, %v2595_v36  ;;  %v2622_v24 = vmul.f32 %v5031_v39, %v4738_v30 }
 0xdea   : > { %v2117_v26 = vadd.f32 %v2113_v63, %v4851_v31  ;;  %v2559_v31 = vsel %vm1191_vm8, %v2554_v16, %v2558_v7  ;;  %v1951_v30 = vadd.f32 %v1947_v58, %v1932_v33  ;;  %v2599_v16 = vrot.slane %v2584_v62, 7 }
 0xdeb   : > { %v2633_v25 = vrot.slane %v2622_v24, 7  ;;  %v2638_v63 = vrot.slane %v2624_v59, 7  ;;  %v2636_v20 = vrot.slane %v2623_v12, 7  ;;  %v5207_v7 = vmul.f32 %v5029_v48, %v4744_v2 }
 0xdec   : > { %v1995_v28 = vadd.f32 %v1991_v18, %v1951_v30  ;;  %v2600_v46 = vsel %vm1191_vm8, %v2595_v36, %v2599_v16  ;;  %v2663_v62 = vmul.f32 %v5212_v14, %v5029_v48  ;;  %v2661_v2 = vmul.f32 %v5029_v48, %v5033_v42 }
 0xded   : > { %v2634_v47 = vsel %vm1191_vm8, %v2632_v5, %v2633_v25  ;;  %v2677_v30 = vrot.slane %v5207_v7, 7  ;;  %v2697_v5 = vld [vmem:[#allocation2 + $0x28] sm:$0x80]  ;;  %v2707_v59 = vmul.f32 %v4985_v11, %v4878_v40  ;;  %v5249_v7 = vld [vmem:[#allocation2 + $0x30] sm:$0xfc] }
 0xdee   : > { %2601 = vrot.lane.b32.xlu0 %v2593_v22, %s3422_s17  ;;  %2603 = vrot.lane.b32.xlu1 %v2596_v3, %s3422_s17  ;;  %v2036_v35 = vadd.f32 %v2032_v49, %v1995_v28  ;;  %v2665_v22 = vmul.f32 %v5029_v48, %v5055_v34  ;;  %v2704_v28 = vmul.f32 %v4985_v11, %v5066_v19 }
 0xdef   : > { %2566 = vrot.lane.b32.xlu2 %v2559_v31, %s3421_s16  ;;  %v2676_v31 = vrot.slane %v2662_v23, 7  ;;  %v2666_v19 = vmul.f32 %v5029_v48, %v5062_v1  ;;  %v2698_v23 = vld [vmem:[#allocation2 + $0x58] sm:$0x7f] }
 0xdf0   : > { %v2147_v60 = vpop.permute.xlu1 %2146  ;;  %v5177_v29 = vpop.permute.xlu0 %2928  ;;  %v2077_v6 = vadd.f32 %v2073_v41, %v2036_v35  ;;  %v2679_v16 = vrot.slane %v2665_v22, 7  ;;  %v2706_v41 = vmul.f32 %v3306_v45, %v4985_v11  ;;  %v2708_v22 = vmul.f32 %v4985_v11, %v5062_v1 }
 0xdf1   : > { %v2154_v27 = vsel %vm1360_vm11, %v2147_v60, %v2149_v4  ;;  %v5183_v0 = vpop.permute.xlu2 %2194  ;;  %v2625_v4 = vmul.f32 %v5031_v39, %v5062_v1  ;;  %v2206_v39 = vperm.slane %v4796_v15, 4  ;;  %v2674_v60 = vrot.slane %v2663_v62, 7  ;;  %v5274_v1 = vld [vmem:[#allocation2 + $0x50] sm:$0xff] }
 0xdf2   : > { %v2158_v8 = vadd.f32 %v2154_v27, %v2117_v26  ;;  %v2118_v57 = vadd.f32 %v2114_v54, %v2077_v6  ;;  %v2635_v26 = vrot.slane %v2621_v50, 7  ;;  %v2639_v54 = vsel %vm1191_vm8, %v2633_v25, %v2638_v63 }
 0xdf3   : > { %v2640_v36 = vrot.slane %v2625_v4, 7  ;;  %v2207_v15 = vmul.f32 %v2206_v39, %v4890_v43  ;;  %v2208_v37 = vmul.f32 %v5212_v14, %v2206_v39  ;;  %v2673_v27 = vrot.slane %v2661_v2, 7 }
 0xdf4   : > { %v2637_v3 = vsel %vm1191_vm8, %v2635_v26, %v2636_v20  ;;  %v2678_v35 = vsel %vm1191_vm8, %v2676_v31, %v2677_v30  ;;  %v2716_v50 = vrot.slane %v2704_v28, 7  ;;  %v2209_v40 = vmul.f32 %v2206_v39, %v4900_v61 }
 0xdf5   : > { %v2641_v33 = vsel %vm1191_vm8, %v2636_v20, %v2640_v36  ;;  %v2213_v43 = vrot.slane %v2207_v15, 4  ;;  %v2214_v25 = vrot.slane %v2208_v37, 4  ;;  %v2720_v20 = vrot.slane %v2707_v59, 7 }
 0xdf6   : > { %2607 = vrot.lane.b32.xlu0 %v2600_v46, %s3422_s17  ;;  %2642 = vrot.lane.b32.xlu1 %v2634_v47, %s3413_s8  ;;  %v2680_v46 = vsel %vm1191_vm8, %v2674_v60, %v2679_v16  ;;  %v2705_v47 = vmul.f32 %v4985_v11, %v2697_v5  ;;  %v2681_v26 = vrot.slane %v2666_v19, 7  ;;  %v2767_v61 = vmul.f32 %v5074_v44, %v5249_v7  ;;  %v5270_v16 = vld [vmem:[#allocation2 + $0x60] sm:$0x3] }
 0xdf7   : > { %2605 = vrot.lane.b32.xlu2 %v2598_v51, %s3422_s17  ;;  %v2215_v12 = vsel %vm996_vm7, %v2213_v43, %v2214_v25  ;;  %v5280_v43 = vld [vmem:[#allocation2 + $0x38] sm:$0xfc] }
 0xdf8   : > { %v2153_v38 = vpop.permute.xlu1 %2152  ;;  %v2151_v53 = vpop.permute.xlu0 %2150  ;;  %v2719_v63 = vrot.slane %v2705_v47, 7  ;;  %v2779_v9 = vrot.slane %v2767_v61, 2 }
 0xdf9   : > { %v2254_v56 = vpop.permute.xlu2 %2253  ;;  %v2155_v52 = vsel %vm1360_vm11, %v2151_v53, %v2153_v38 }
 0xdfa   : > { %v2159_v32 = vadd.f32 %v2155_v52, %v2118_v57  ;;  %v2717_v57 = vrot.slane %v2706_v41, 7  ;;  %v2768_v41 = vmul.f32 %v5074_v44, %v5280_v43 }
 0xdfc   : > { %v2718_v39 = vsel %vm1191_vm8, %v2716_v50, %v2717_v57  ;;  %v2782_v50 = vrot.slane %v2768_v41, 2 }
 0xdfe   : > { %2646 = vrot.lane.b32.xlu0 %v2639_v54, %s3413_s8  ;;  %2648 = vrot.lane.b32.xlu1 %v2641_v33, %s3413_s8  ;;  %v2216_v54 = vrot.slane %v2209_v40, 4  ;;  %v5251_v33 = vld [vmem:[#allocation2 + $0x48] sm:$0xff] }
 0xdff   : > { %2644 = vrot.lane.b32.xlu2 %v2637_v3, %s3413_s8  ;;  %v2769_v62 = vmul.f32 %v5074_v44, %v5251_v33 }
 0xe00   : > { %v2193_v10 = vpop.permute.xlu1 %2192  ;;  %v2191_v24 = vpop.permute.xlu0 %2190  ;;  %v2217_v3 = vsel %vm996_vm7, %v2214_v25, %v2216_v54  ;;  %v2770_v25 = vmul.f32 %v5074_v44, %v5274_v1 }
 0xe01   : > { %v5226_v58 = vpop.permute.xlu2 %2292  ;;  %v2198_v18 = vsel %vm369_vm3, %v2191_v24, %v2193_v10 }
 0xe02   : > { %v2202_v49 = vadd.f32 %v2198_v18, %v2158_v8  ;;  %v2675_v8 = vsel %vm1191_vm8, %v2673_v27, %v2674_v60  ;;  %v2780_v18 = vrot.slane %v2769_v62, 2  ;;  %v2722_v60 = vrot.slane %v2708_v22, 7 }
 0xe03   : > { %v2849_v62 = vmul.f32 %v5017_v17, %v5249_v7 }
 0xe04   : > { %v2220_v6 = vadd.f32 %v2215_v12, %v2202_v49  ;;  %v5276_v49 = vld [vmem:[#allocation2 + $0x68] sm:$0x3]  ;;  %v2781_v5 = vsel %vm626_vm1, %v2779_v9, %v2780_v18  ;;  %v2723_v45 = vsel %vm1191_vm8, %v2717_v57, %v2722_v60  ;;  %v2783_v12 = vrot.slane %v2770_v25, 2 }
 0xe05   : > { %v2772_v28 = vmul.f32 %v5074_v44, %v5276_v49 }
 0xe06   : > { %2685 = vrot.lane.b32.xlu0 %v2678_v35, %s3410_s22  ;;  %2687 = vrot.lane.b32.xlu1 %v2680_v46, %s3410_s22 }
 0xe07   : > { %2683 = vrot.lane.b32.xlu2 %v2675_v8, %s3410_s22 }
 0xe08   : > { %v2252_v4 = vpop.permute.xlu1 %2251  ;;  %v2197_v51 = vpop.permute.xlu0 %2196 }
 0xe09   : > { %v2299_v38 = vpop.permute.xlu2 %2298  ;;  %v2259_v53 = vsel %vm397_vm4, %v2252_v4, %v2254_v56  ;;  %v2199_v52 = vsel %vm369_vm3, %v5183_v0, %v2197_v51  ;;  %v2721_v56 = vsel %vm1191_vm8, %v2719_v63, %v2720_v20  ;;  %v2709_v0 = vmul.f32 %v4985_v11, %v2698_v23 }
 0xe0a   : > { %v2263_v48 = vadd.f32 %v2259_v53, %v2220_v6  ;;  %v2203_v36 = vadd.f32 %v2199_v52, %v2159_v32  ;;  %v2682_v32 = vsel %vm1191_vm8, %v2677_v30, %v2681_v26  ;;  %v2771_v11 = vmul.f32 %v5074_v44, %v5270_v16 }
 0xe0b   : > { %v2724_v37 = vrot.slane %v2709_v0, 7  ;;  %v2787_v4 = vrot.slane %v2772_v28, 2  ;;  %v2809_v44 = vmul.f32 %v5072_v21, %v5280_v43  ;;  %v2811_v53 = vmul.f32 %v5072_v21, %v5274_v1 }
 0xe0c   : > { %v2221_v15 = vadd.f32 %v2217_v3, %v2203_v36  ;;  %v2785_v47 = vrot.slane %v2771_v11, 2  ;;  %v2784_v52 = vsel %vm626_vm1, %v2782_v50, %v2783_v12  ;;  %v2808_v63 = vmul.f32 %v5072_v21, %v5249_v7 }
 0xe0d   : > { %v2725_v27 = vsel %vm1191_vm8, %v2720_v20, %v2724_v37  ;;  %v2788_v40 = vsel %vm626_vm1, %v2783_v12, %v2787_v4  ;;  %v2823_v36 = vrot.slane %v2809_v44, 2  ;;  %v2824_v54 = vrot.slane %v2811_v53, 2 }
 0xe0e   : > { %2726 = vrot.lane.b32.xlu0 %v2718_v39, %s3415_s20  ;;  %2728 = vrot.lane.b32.xlu1 %v2721_v56, %s3415_s20  ;;  %v2786_v57 = vsel %vm626_vm1, %v2780_v18, %v2785_v47  ;;  %v2820_v0 = vrot.slane %v2808_v63, 2  ;;  %v2861_v18 = vrot.slane %v2849_v62, 2  ;;  %v2890_v47 = vmul.f32 %v5113_v13, %v5249_v7 }
 0xe0f   : > { %2689 = vrot.lane.b32.xlu2 %v2682_v32, %s3410_s22  ;;  %v2851_v32 = vmul.f32 %v5017_v17, %v5251_v33  ;;  %v2825_v22 = vsel %vm626_vm1, %v2823_v36, %v2824_v54  ;;  %v2894_v53 = vmul.f32 %v5113_v13, %v5270_v16 }
 0xe10   : > { %v2258_v2 = vpop.permute.xlu1 %2257  ;;  %v2256_v10 = vpop.permute.xlu0 %2255  ;;  %v2902_v50 = vrot.slane %v2890_v47, 2  ;;  %v2967_v47 = vld [vmem:[#allocation2 + $0x40] sm:$0xfc] }
 0xe11   : > { %v5267_v24 = vpop.permute.xlu2 %2337  ;;  %v2260_v31 = vsel %vm397_vm4, %v2256_v10, %v2258_v2  ;;  %v2850_v2 = vmul.f32 %v5017_v17, %v5280_v43 }
 0xe12   : > { %v2264_v30 = vadd.f32 %v2260_v31, %v2221_v15  ;;  %v2852_v15 = vmul.f32 %v5017_v17, %v5274_v1  ;;  %v2813_v31 = vmul.f32 %v5072_v21, %v5276_v49 }
 0xe14   : > { %v2865_v25 = vrot.slane %v2852_v15, 2  ;;  %v2828_v41 = vrot.slane %v2813_v31, 2  ;;  %v2935_v31 = vmul.f32 %v5177_v29, %v5270_v16 }
 0xe16   : > { %2732 = vrot.lane.b32.xlu0 %v2725_v27, %s3415_s20  ;;  %2789 = vrot.lane.b32.xlu1 %v2781_v5, %s3416_s21  ;;  %v2864_v5 = vrot.slane %v2850_v2, 2  ;;  %v3307_v2 = vld [vmem:[#allocation3 + $0x20] sm:$0xff] }
 0xe17   : > { %2730 = vrot.lane.b32.xlu2 %v2723_v45, %s3415_s20  ;;  %v2474_v15 = vperm.slane %v3307_v2, 3 }
 0xe18   : > { %v2297_v35 = vpop.permute.xlu1 %2296  ;;  %v2295_v46 = vpop.permute.xlu0 %2294 }
 0xe19   : > { %v2301_v59 = vsel %vm1276_vm5, %v2297_v35, %v2299_v38  ;;  %v2377_v8 = vpop.permute.xlu2 %2376  ;;  %v2300_v19 = vsel %vm1276_vm5, %v5226_v58, %v2295_v46  ;;  %v2810_v38 = vmul.f32 %v5072_v21, %v5251_v33  ;;  %v2812_v58 = vmul.f32 %v5072_v21, %v5270_v16 }
 0xe1a   : > { %v2305_v6 = vadd.f32 %v2301_v59, %v2264_v30  ;;  %v2304_v51 = vadd.f32 %v2300_v19, %v2263_v48  ;;  %v2862_v30 = vrot.slane %v2851_v32, 2  ;;  %v2854_v21 = vmul.f32 %v5017_v17, %v5276_v49 }
 0xe1b   : > { %v2821_v61 = vrot.slane %v2810_v38, 2  ;;  %v2826_v39 = vrot.slane %v2812_v58, 2  ;;  %v2866_v46 = vsel %vm626_vm1, %v2864_v5, %v2865_v25  ;;  %v2892_v59 = vmul.f32 %v5113_v13, %v5251_v33 }
 0xe1c   : > { %v2863_v35 = vsel %vm626_vm1, %v2861_v18, %v2862_v30  ;;  %v2893_v58 = vmul.f32 %v5113_v13, %v5274_v1  ;;  %v2931_v18 = vmul.f32 %v5177_v29, %v5249_v7  ;;  %v2476_v5 = vmul.f32 %v5212_v14, %v2474_v15 }
 0xe1d   : > { %v2827_v3 = vsel %vm626_vm1, %v2821_v61, %v2826_v39  ;;  %v2822_v10 = vsel %vm626_vm1, %v2820_v0, %v2821_v61 }
 0xe1e   : > { %2793 = vrot.lane.b32.xlu0 %v2786_v57, %s3416_s21  ;;  %2795 = vrot.lane.b32.xlu1 %v2788_v40, %s3416_s21  ;;  %v2903_v57 = vrot.slane %v2892_v59, 2  ;;  %v2968_v59 = vld [vmem:[#allocation2 + $0x58] sm:$0xff] }
 0xe1f   : > { %2791 = vrot.lane.b32.xlu2 %v2784_v52, %s3416_s21  ;;  %v2895_v52 = vmul.f32 %v5113_v13, %v5276_v49 }
 0xe20   : > { %v2336_v20 = vpop.permute.xlu1 %2335  ;;  %v2334_v48 = vpop.permute.xlu0 %2333 }
 0xe21   : > { %v5311_v26 = vpop.permute.xlu2 %2415  ;;  %v2341_v23 = vsel %vm1304_vm9, %v2334_v48, %v2336_v20  ;;  %v2891_v20 = vmul.f32 %v5113_v13, %v5280_v43  ;;  %v2910_v0 = vrot.slane %v2895_v52, 2  ;;  %v2933_v13 = vmul.f32 %v5177_v29, %v5251_v33 }
 0xe22   : > { %v2345_v56 = vadd.f32 %v2341_v23, %v2304_v51  ;;  %v2869_v51 = vrot.slane %v2854_v21, 2  ;;  %v2908_v23 = vrot.slane %v2894_v53, 2 }
 0xe24   : > { %v2870_v38 = vsel %vm626_vm1, %v2865_v25, %v2869_v51  ;;  %v2978_v51 = vmul.f32 %v5152_v55, %v2968_v59 }
 0xe26   : > { %2832 = vrot.lane.b32.xlu0 %v2825_v22, %s3421_s16  ;;  %2834 = vrot.lane.b32.xlu1 %v2827_v3, %s3421_s16  ;;  %v2905_v22 = vrot.slane %v2891_v20, 2  ;;  %v2909_v3 = vsel %vm626_vm1, %v2903_v57, %v2908_v23 }
 0xe27   : > { %2830 = vrot.lane.b32.xlu2 %v2822_v10, %s3421_s16 }
 0xe28   : > { %v2375_v37 = vpop.permute.xlu1 %2374  ;;  %v2340_v9 = vpop.permute.xlu0 %2339 }
 0xe29   : > { %v2422_v60 = vpop.permute.xlu2 %2421  ;;  %v2382_v11 = vsel %vm1332_vm10, %v2375_v37, %v2377_v8  ;;  %v2342_v27 = vsel %vm1304_vm9, %v5267_v24, %v2340_v9  ;;  %v2829_v24 = vsel %vm626_vm1, %v2824_v54, %v2828_v41  ;;  %v2853_v8 = vmul.f32 %v5017_v17, %v5270_v16 }
 0xe2a   : > { %v2386_v28 = vadd.f32 %v2382_v11, %v2345_v56  ;;  %v2346_v45 = vadd.f32 %v2342_v27, %v2305_v6  ;;  %v2904_v17 = vsel %vm626_vm1, %v2902_v50, %v2903_v57  ;;  %v2906_v56 = vrot.slane %v2893_v58, 2 }
 0xe2b   : > { %v2867_v40 = vrot.slane %v2853_v8, 2  ;;  %v2934_v37 = vmul.f32 %v5177_v29, %v5274_v1  ;;  %v2944_v27 = vrot.slane %v2933_v13, 2  ;;  %v2482_v8 = vrot.slane %v2476_v5, 7 }
 0xe2c   : > { %v2911_v10 = vsel %vm626_vm1, %v2906_v56, %v2910_v0  ;;  %v2907_v9 = vsel %vm626_vm1, %v2905_v22, %v2906_v56 }
 0xe2d   : > { %v2868_v63 = vsel %vm626_vm1, %v2862_v30, %v2867_v40  ;;  %v2475_v30 = vmul.f32 %v2474_v15, %v5033_v42  ;;  %v2947_v21 = vrot.slane %v2934_v37, 2  ;;  %v2975_v42 = vmul.f32 %v5152_v55, %v5280_v43 }
 0xe2e   : > { %2871 = vrot.lane.b32.xlu0 %v2863_v35, %s3422_s17  ;;  %2873 = vrot.lane.b32.xlu1 %v2866_v46, %s3422_s17  ;;  %v2943_v46 = vrot.slane %v2931_v18, 2 }
 0xe2f   : > { %2836 = vrot.lane.b32.xlu2 %v2829_v24, %s3421_s16  ;;  %v2481_v24 = vrot.slane %v2475_v30, 7  ;;  %v2987_v53 = vrot.slane %v2975_v42, 2 }
 0xe30   : > { %v2381_v19 = vpop.permute.xlu1 %2380  ;;  %v2379_v12 = vpop.permute.xlu0 %2378  ;;  %v2945_v50 = vsel %vm626_vm1, %v2943_v46, %v2944_v27 }
 0xe31   : > { %v5347_v4 = vpop.permute.xlu2 %2462  ;;  %v2383_v6 = vsel %vm1332_vm10, %v2379_v12, %v2381_v19  ;;  %v2977_v19 = vmul.f32 %v5152_v55, %v5274_v1  ;;  %v2483_v1 = vsel %vm1191_vm8, %v2481_v24, %v2482_v8 }
 0xe32   : > { %v2387_v44 = vadd.f32 %v2383_v6, %v2346_v45  ;;  %v2949_v45 = vrot.slane %v2935_v31, 2  ;;  %v2976_v6 = vmul.f32 %v5152_v55, %v2967_v47 }
 0xe34   : > { %v2950_v14 = vsel %vm626_vm1, %v2944_v27, %v2949_v45  ;;  %v2990_v20 = vrot.slane %v2976_v6, 2 }
 0xe36   : > { %2877 = vrot.lane.b32.xlu0 %v2870_v38, %s3422_s17  ;;  %2912 = vrot.lane.b32.xlu1 %v2904_v17, %s3413_s8  ;;  %v2988_v38 = vrot.slane %v2977_v19, 2  ;;  %v2477_v17 = vmul.f32 %v2474_v15, %v5055_v34 }
 0xe37   : > { %2875 = vrot.lane.b32.xlu2 %v2868_v63, %s3422_s17 }
 0xe38   : > { %v2420_v48 = vpop.permute.xlu1 %2419  ;;  %v2418_v36 = vpop.permute.xlu0 %2417  ;;  %v2989_v56 = vsel %vm626_vm1, %v2987_v53, %v2988_v38  ;;  %v2484_v0 = vrot.slane %v2477_v17, 7  ;;  %v3025_v53 = vld [vmem:[%s5603_s5 + $0x70] sm:$0xff] }
 0xe39   : > { %v2424_v54 = vsel %vm1360_vm11, %v2420_v48, %v2422_v60  ;;  %v2522_v61 = vpop.permute.xlu2 %2521  ;;  %v2423_v39 = vsel %vm1360_vm11, %v5311_v26, %v2418_v36  ;;  %v2932_v26 = vmul.f32 %v5177_v29, %v5280_v43  ;;  %v2936_v43 = vmul.f32 %v5177_v29, %v5276_v49 }
 0xe3a   : > { %v2428_v62 = vadd.f32 %v2424_v54, %v2387_v44  ;;  %v2427_v32 = vadd.f32 %v2423_v39, %v2386_v28  ;;  %v2991_v48 = vrot.slane %v2978_v51, 2  ;;  %v2969_v54 = vld [vmem:[#allocation2 + $0x70] sm:$0x3] }
 0xe3b   : > { %v2946_v41 = vrot.slane %v2932_v26, 2  ;;  %v2951_v23 = vrot.slane %v2936_v43, 2 }
 0xe3c   : > { %v2992_v39 = vsel %vm626_vm1, %v2990_v20, %v2991_v48  ;;  %v3022_v20 = vld [vmem:[%s5603_s5 + $0x58] sm:$0xff] }
 0xe3d   : > { %v2948_v12 = vsel %vm626_vm1, %v2946_v41, %v2947_v21  ;;  %v2952_v34 = vsel %vm626_vm1, %v2947_v21, %v2951_v23  ;;  %v3020_v23 = vld [vmem:[%s5603_s5 + $0x48] sm:$0xff] }
 0xe3e   : > { %2916 = vrot.lane.b32.xlu0 %v2909_v3, %s3413_s8  ;;  %2918 = vrot.lane.b32.xlu1 %v2911_v10, %s3413_s8 }
 0xe3f   : > { %2914 = vrot.lane.b32.xlu2 %v2907_v9, %s3413_s8 }
 0xe40   : > { %v2461_v60 = vpop.permute.xlu1 %2460  ;;  %v2459_v11 = vpop.permute.xlu0 %2458 }
 0xe41   : > { %v5385_v25 = vpop.permute.xlu2 %2560  ;;  %v2466_v28 = vsel %vm369_vm3, %v2459_v11, %v2461_v60 }
 0xe42   : > { %v2470_v35 = vadd.f32 %v2466_v28, %v2427_v32  ;;  %v2980_v32 = vmul.f32 %v5152_v55, %v2969_v54  ;;  %v3019_v54 = vld [vmem:[%s5603_s5 + $0x40] sm:$0xff] }
 0xe44   : > { %v2488_v44 = vadd.f32 %v2483_v1, %v2470_v35  ;;  %v2995_v15 = vrot.slane %v2980_v32, 2 }
 0xe46   : > { %2957 = vrot.lane.b32.xlu1 %v2950_v14, %s3410_s22  ;;  %2955 = vrot.lane.b32.xlu0 %v2948_v12, %s3410_s22  ;;  %v2996_v26 = vsel %vm626_vm1, %v2991_v48, %v2995_v15  ;;  %v3021_v48 = vld [vmem:[%s5603_s5 + $0x50] sm:$0xff]  ;;  %v3012_v15 = vld [vmem:[%s5603_s5 + $0x8] sm:$0xff] }
 0xe47   : > { %2953 = vrot.lane.b32.xlu2 %v2945_v50, %s3410_s22 }
 0xe48   : > { %v2520_v57 = vpop.permute.xlu1 %2519  ;;  %v2465_v40 = vpop.permute.xlu0 %2464 }
 0xe49   : > { %v2567_v58 = vpop.permute.xlu2 %2566  ;;  %v2527_v52 = vsel %vm397_vm4, %v2520_v57, %v2522_v61  ;;  %v2467_v63 = vsel %vm369_vm3, %v5347_v4, %v2465_v40  ;;  %v2979_v4 = vmul.f32 %v5152_v55, %v5276_v49  ;;  %v2485_v61 = vsel %vm1191_vm8, %v2482_v8, %v2484_v0  ;;  %v3026_v40 = vld [vmem:[%s5603_s5 + $0x78] sm:$0xff]  ;;  %v3017_v0 = vld [vmem:[%s5603_s5 + $0x30] sm:$0xff] }
 0xe4a   : > { %v2531_v29 = vadd.f32 %v2527_v52, %v2488_v44  ;;  %v2471_v36 = vadd.f32 %v2467_v63, %v2428_v62  ;;  %3030 = vmatpush.msra.mxu0 %v3026_v40  ;;  %3210 = vmatpush.msra.mxu1 %v3026_v40  ;;  %v3023_v52 = vld [vmem:[%s5603_s5 + $0x60] sm:$0xff] }
 0xe4b   : > { %v2993_v31 = vrot.slane %v2979_v4, 2  ;;  %v3016_v4 = vld [vmem:[%s5603_s5 + $0x28] sm:$0xff] }
 0xe4c   : > { %v2489_v22 = vadd.f32 %v2485_v61, %v2471_v36  ;;  %3031 = vmatpush.msra.mxu0 %v3025_v53  ;;  %3211 = vmatpush.msra.mxu1 %v3025_v53  ;;  %v3015_v61 = vld [vmem:[%s5603_s5 + $0x20] sm:$0xff] }
 0xe4d   : > { %v2994_v37 = vsel %vm626_vm1, %v2988_v38, %v2993_v31 }
 0xe4e   : > { %2999 = vrot.lane.b32.xlu1 %v2992_v39, %s3415_s20  ;;  %2997 = vrot.lane.b32.xlu0 %v2989_v56, %s3415_s20  ;;  %v3018_v39 = vld [vmem:[%s5603_s5 + $0x38] sm:$0xff] }
 0xe4f   : > { %2959 = vrot.lane.b32.xlu2 %v2952_v34, %s3410_s22 }
 0xe50   : > { %v2526_v62 = vpop.permute.xlu1 %2525  ;;  %v2524_v3 = vpop.permute.xlu0 %2523 }
 0xe51   : > { %v2606_v13 = vpop.permute.xlu2 %2605  ;;  %v2528_v2 = vsel %vm397_vm4, %v2524_v3, %v2526_v62  ;;  %v3014_v62 = vld [vmem:[%s5603_s5 + $0x18] sm:$0xff] }
 0xe52   : > { %v2532_v10 = vadd.f32 %v2528_v2, %v2489_v22  ;;  %v3013_v22 = vld [vmem:[%s5603_s5 + $0x10] sm:$0xff] }
 0xe56   : > { %3003 = vrot.lane.b32.xlu0 %v2996_v26, %s3415_s20 }
 0xe57   : > { %3001 = vrot.lane.b32.xlu2 %v2994_v37, %s3415_s20 }
 0xe58   : > { %v2565_v55 = vpop.permute.xlu1 %2564  ;;  %v2563_v49 = vpop.permute.xlu0 %2562 }
 0xe59   : > { %v2569_v9 = vsel %vm1276_vm5, %v2565_v55, %v2567_v58  ;;  %v2645_v18 = vpop.permute.xlu2 %2644  ;;  %v2568_v30 = vsel %vm1276_vm5, %v5385_v25, %v2563_v49  ;;  %v3024_v58 = vld [vmem:[%s5603_s5 + $0x68] sm:$0xff]  ;;  %v3308_v55 = vld [vmem:[#allocation3 + $0x28] sm:$0xff] }
 0xe5a   : > { %v2573_v60 = vadd.f32 %v2569_v9, %v2532_v10  ;;  %v2572_v11 = vadd.f32 %v2568_v30, %v2531_v29  ;;  %3032 = vmatpush.msra.mxu0 %v3024_v58  ;;  %3212 = vmatpush.msra.mxu1 %v3024_v58  ;;  %v3011_v10 = vld [vmem:[%s5603_s5] sm:$0xff]  ;;  %v2743_v49 = vperm.slane %v3308_v55, 2  ;;  %v3054_v55 = vld [vmem:[%s3559_s18 + $0x8] sm:$0xfc] }
 0xe5c   : > { %3033 = vmatpush.msra.mxu0 %v3023_v52  ;;  %3213 = vmatpush.msra.mxu1 %v3023_v52 }
 0xe5e   : > { %3034 = vmatpush.msra.mxu0 %v3022_v20  ;;  %3214 = vmatpush.msra.mxu1 %v3022_v20 }
 0xe60   : > { %v2604_v27 = vpop.permute.xlu1 %2603  ;;  %v2602_v5 = vpop.permute.xlu0 %2601  ;;  %3035 = vmatpush.msra.mxu0 %v3021_v48  ;;  %3215 = vmatpush.msra.mxu1 %v3021_v48 }
 0xe61   : > { %v2609_v28 = vsel %vm1304_vm9, %v2602_v5, %v2604_v27  ;;  %v5426_v41 = vpop.permute.xlu2 %2683 }
 0xe62   : > { %v2613_v45 = vadd.f32 %v2609_v28, %v2572_v11  ;;  %3036 = vmatpush.msra.mxu0 %v3020_v23  ;;  %3216 = vmatpush.msra.mxu1 %v3020_v23 }
 0xe64   : > { %3037 = vmatpush.msra.mxu0 %v3019_v54  ;;  %3217 = vmatpush.msra.mxu1 %v3019_v54 }
 0xe66   : > { %3038 = vmatpush.msra.mxu0 %v3018_v39  ;;  %3218 = vmatpush.msra.mxu1 %v3018_v39 }
 0xe68   : > { %v2643_v21 = vpop.permute.xlu1 %2642  ;;  %v2608_v35 = vpop.permute.xlu0 %2607  ;;  %3039 = vmatpush.msra.mxu0 %v3017_v0  ;;  %3219 = vmatpush.msra.mxu1 %v3017_v0 }
 0xe69   : > { %v2650_v46 = vsel %vm1332_vm10, %v2643_v21, %v2645_v18  ;;  %v2610_v47 = vsel %vm1304_vm9, %v2606_v13, %v2608_v35  ;;  %v2690_v8 = vpop.permute.xlu2 %2689  ;;  %v2744_v18 = vmul.f32 %v2743_v49, %v5249_v7 }
 0xe6a   : > { %v5430_v59 = vadd.f32 %v2650_v46, %v2613_v45  ;;  %v2614_v24 = vadd.f32 %v2610_v47, %v2573_v60  ;;  %3040 = vmatpush.msra.mxu0 %v3016_v4  ;;  %3220 = vmatpush.msra.mxu1 %v3016_v4  ;;  %v2745_v60 = vmul.f32 %v2743_v49, %v5251_v33  ;;  %v3297_v4 = vld [vmem:[%s5604_s6] ss:$0 sm:$0xff] }
 0xe6b   : > { %v2750_v28 = vrot.slane %v2744_v18, 2 }
 0xe6c   : > { %3041 = vmatpush.msra.mxu0 %v3015_v61  ;;  %3221 = vmatpush.msra.mxu1 %v3015_v61  ;;  %v2751_v21 = vrot.slane %v2745_v60, 2  ;;  %v3057_v60 = vld [vmem:[%s3559_s18 + $0x20] sm:$0x3] }
 0xe6e   : > { %3042 = vmatpush.msra.mxu0 %v3014_v62  ;;  %3222 = vmatpush.msra.mxu1 %v3014_v62  ;;  %v2752_v46 = vsel %vm626_vm1, %v2750_v28, %v2751_v21 }
 0xe70   : > { %v2649_v25 = vpop.permute.xlu1 %2648  ;;  %v2647_v42 = vpop.permute.xlu0 %2646  ;;  %3043 = vmatpush.msra.mxu0 %v3013_v22  ;;  %3223 = vmatpush.msra.mxu1 %v3013_v22 }
 0xe71   : > { %v2651_v19 = vsel %vm1332_vm10, %v2647_v42, %v2649_v25  ;;  %v5433_v12 = vpop.permute.xlu2 %2730 }
 0xe72   : > { %v2655_v14 = vadd.f32 %v2651_v19, %v2614_v24  ;;  %3044 = vmatpush.msra.mxu0 %v3012_v15  ;;  %3224 = vmatpush.msra.mxu1 %v3012_v15 }
 0xe74   : > { %3045 = vmatpush.msra.mxu0 %v3011_v10  ;;  %3225 = vmatpush.msra.mxu1 %v3011_v10  ;;  %v3055_v10 = vld [vmem:[%s3559_s18 + $0x10] sm:$0xff] }
 0xe78   : > { %v2688_v6 = vpop.permute.xlu1 %2687  ;;  %v5435_v51 = vpop.permute.xlu0 %2685 }
 0xe79   : > { %v2692_v50 = vsel %vm1360_vm11, %v2688_v6, %v2690_v8  ;;  %v5444_v44 = vpop.permute.xlu2 %2791  ;;  %v2691_v9 = vsel %vm1360_vm11, %v5426_v41, %v5435_v51  ;;  %v2746_v41 = vmul.f32 %v2743_v49, %v5270_v16 }
 0xe7a   : > { %v5438_v43 = vadd.f32 %v2692_v50, %v2655_v14  ;;  %v2695_v11 = vadd.f32 %v2691_v9, %v5430_v59 }
 0xe7b   : > { %v2753_v42 = vrot.slane %v2746_v41, 2 }
 0xe7d   : > { %v2754_v50 = vsel %vm626_vm1, %v2751_v21, %v2753_v42 }
 0xe80   : > { %v5440_v1 = vpop.permute.xlu1 %2728  ;;  %v5442_v57 = vpop.permute.xlu0 %2726 }
 0xe81   : > { %v5462_v63 = vpop.permute.xlu2 %2830  ;;  %v2734_v30 = vsel %vm369_vm3, %v5442_v57, %v5440_v1 }
 0xe82   : > { %v2738_v45 = vadd.f32 %v2734_v30, %v2695_v11  ;;  %v3056_v30 = vld [vmem:[%s3559_s18 + $0x18] sm:$0xff]  ;;  %v3058_v11 = vld [vmem:[%s3559_s18 + $0x28] sm:$0x3] }
 0xe84   : > { %v2757_v47 = vadd.f32 %v2752_v46, %v2738_v45 }
 0xe88   : > { %v5452_v38 = vpop.permute.xlu1 %2789  ;;  %v5454_v17 = vpop.permute.xlu0 %2732 }
 0xe89   : > { %v5483_v56 = vpop.permute.xlu2 %2836  ;;  %v2797_v7 = vsel %vm397_vm4, %v5452_v38, %v5444_v44  ;;  %v2735_v33 = vsel %vm369_vm3, %v5433_v12, %v5454_v17 }
 0xe8a   : > { %v2801_v24 = vadd.f32 %v2797_v7, %v2757_v47  ;;  %v2739_v14 = vadd.f32 %v2735_v33, %v5438_v43 }
 0xe8c   : > { %v2758_v57 = vadd.f32 %v2754_v50, %v2739_v14 }
 0xe90   : > { %v5470_v29 = vpop.permute.xlu1 %2795  ;;  %v5472_v36 = vpop.permute.xlu0 %2793 }
 0xe91   : > { %v2876_v3 = vpop.permute.xlu2 %2875  ;;  %v2798_v12 = vsel %vm397_vm4, %v5472_v36, %v5470_v29 }
 0xe92   : > { %v2802_v43 = vadd.f32 %v2798_v12, %v2758_v57 }
 0xe98   : > { %v5488_v32 = vpop.permute.xlu1 %2834  ;;  %v2833_v34 = vpop.permute.xlu0 %2832 }
 0xe99   : > { %v2915_v37 = vpop.permute.xlu2 %2914  ;;  %v2838_v59 = vsel %vm1276_vm5, %v5462_v63, %v2833_v34  ;;  %v2839_v53 = vsel %vm1276_vm5, %v5488_v32, %v5483_v56 }
 0xe9a   : > { %v2842_v6 = vadd.f32 %v2838_v59, %v2801_v24  ;;  %v2843_v20 = vadd.f32 %v2839_v53, %v2802_v43 }
 0xea0   : > { %v2874_v13 = vpop.permute.xlu1 %2873  ;;  %v2872_v2 = vpop.permute.xlu0 %2871 }
 0xea1   : > { %v2954_v35 = vpop.permute.xlu2 %2953  ;;  %v2879_v19 = vsel %vm1304_vm9, %v2872_v2, %v2874_v13 }
 0xea2   : > { %v2883_v16 = vadd.f32 %v2879_v19, %v2842_v6 }
 0xea8   : > { %v2913_v31 = vpop.permute.xlu1 %2912  ;;  %v2878_v26 = vpop.permute.xlu0 %2877 }
 0xea9   : > { %v2920_v51 = vsel %vm1332_vm10, %v2913_v31, %v2915_v37  ;;  %v2960_v40 = vpop.permute.xlu2 %2959  ;;  %v2880_v52 = vsel %vm1304_vm9, %v2876_v3, %v2878_v26  ;;  %v3053_v37 = vld [vmem:[%s3559_s18] sm:$0xfc] }
 0xeaa   : > { %v2924_v44 = vadd.f32 %v2920_v51, %v2883_v16  ;;  %v2884_v36 = vadd.f32 %v2880_v52, %v2843_v20 }
 0xeb0   : > { %v2919_v27 = vpop.permute.xlu1 %2918  ;;  %v2917_v5 = vpop.permute.xlu0 %2916 }
 0xeb1   : > { %v2921_v29 = vsel %vm1332_vm10, %v2917_v5, %v2919_v27  ;;  %v3002_v39 = vpop.permute.xlu2 %3001 }
 0xeb2   : > { %v2925_v54 = vadd.f32 %v2921_v29, %v2884_v36 }
 0xeb8   : > { %v2958_v8 = vpop.permute.xlu1 %2957  ;;  %v2956_v25 = vpop.permute.xlu0 %2955 }
 0xeb9   : > { %v2961_v1 = vsel %vm1360_vm11, %v2954_v35, %v2956_v25  ;;  %v2962_v23 = vsel %vm1360_vm11, %v2958_v8, %v2960_v40 }
 0xeba   : > { %v2965_v38 = vadd.f32 %v2961_v1, %v2924_v44  ;;  %v2966_v0 = vadd.f32 %v2962_v23, %v2925_v54 }
 0xec0   : > { %v3000_v17 = vpop.permute.xlu1 %2999  ;;  %v2998_v58 = vpop.permute.xlu0 %2997 }
 0xec1   : > { %v3005_v63 = vsel %vm369_vm3, %v2998_v58, %v3000_v17 }
 0xec2   : > { %v3009_v48 = vadd.f32 %v3005_v63, %v2965_v38 }
 0xec4   : > { %3046 = vmatmul.f32.vlgmr.msra.gmra.mxu0 %v3009_v48 }
 0xec8   : > { %v3004_v56 = vpop.permute.xlu0 %3003 }
 0xec9   : > { %v3006_v32 = vsel %vm369_vm3, %v3002_v39, %v3004_v56 }
 0xeca   : > { %v3010_v34 = vadd.f32 %v3006_v32, %v2966_v0 }
 0xecc   : > { %3049 = vmatmul.f32.vlgmr.msra.gmra.mxu1 %v3010_v34 }
 0xf41   : > { %v3047_v61 = vpop.f32.mrf.mxu0 }
 0xf42   : > { %v3048_v62 = vadd.f32 %v3297_v4, %v3047_v61 }
 0xf44   : > { %v3061_v22 = vrot.slane %v3048_v62, 6 }
 0xf46   : > { %3064 = vrot.lane.b32.xlu1 %v3061_v22, %s3412_s29 }
 0xf49   : > { %v3050_v3 = vpop.f32.mrf.mxu1 }
 0xf4a   : > { %v3051_v13 = vadd.f32 %v3297_v4, %v3050_v3 }
 0xf4c   : > { %v3062_v2 = vrot.slane %v3051_v13, 6 }
 0xf4e   : > { %3068 = vrot.lane.b32.xlu0 %v3062_v2, %s3412_s29  ;;  %v3063_v15 = vsel %vm1673_vm2, %v3061_v22, %v3062_v2 }
 0xf4f   : > { %3066 = vrot.lane.b32.xlu2 %v3063_v15, %s3412_s29  ;;  %s286_s29 = sand.u32 1, %s3397_s25  }
 0xf50   : > { %s3202_s14 = sshll.u32 %s286_s29, 4  ;;  %s3107_s28 = scalar_lea.sflag [#allocation5], %s286_s29 }
 0xf51   : > { %s288_s16 = scalar_lea.vmem [#allocation6], %s3202_s14  ;;  %s3359_s14 = scalar_lea.hbm %s5605_s7, 32 }
 0xf52   : > { %s3119_s9 = sshll.u32 %s288_s16, 4  ;;  %s3120_s9 = int_to_ptr.vmem [resolvable:$true] %s3119_s9 }
 0xfa9   : > { %v3067_v31 = vpop.permute.xlu2 %3066 }
 0xfaa   : > { %v3075_v26 = vmul.f32 %v3067_v31, %v3055_v10  ;;  %v3076_v5 = vmul.f32 %v3067_v31, %v3056_v30 }
 0xfac   : > { %3089 = vrot.lane.b32.xlu0 %v3075_v26, %s3415_s20 }
 0xfb8   : > { %v3065_v49 = vpop.permute.xlu1 %3064 }
 0xfb9   : > { %v3073_v9 = vmul.f32 %v3065_v49, %v3053_v37  ;;  %v3074_v18 = vmul.f32 %v3065_v49, %v3054_v55 }
 0xfbb   : > { %3085 = vrot.lane.b32.xlu1 %v3073_v9, %s3415_s20  ;;  %3087 = vrot.lane.b32.xlu2 %v3074_v18, %s3415_s20 }
 0xfc0   : > { %v3069_v27 = vpop.permute.xlu0 %3068 }
 0xfc1   : > { %v3077_v28 = vmul.f32 %v3069_v27, %v3057_v60  ;;  %v3078_v45 = vmul.f32 %v3069_v27, %v3058_v11 }
 0xfc3   : > { %3093 = vrot.lane.b32.xlu2 %v3077_v28, %s3415_s20  ;;  %3091 = vrot.lane.b32.xlu1 %v3076_v5, %s3415_s20 }
 0xfc4   : > { %3095 = vrot.lane.b32.xlu0 %v3078_v45, %s3415_s20  ;;  %s3353_s20 = sshra.s32 %s3122_s23, 4  ;;  %s3354_s20 = int_to_ptr.hbm [resolvable:$true] %s3353_s20 }
 0xfc5   : > { %s3355_s8 = scalar_lea.hbm %s3354_s20, 16  ;;  %p3360_p3 = scmp.lt.s32.totalorder %s3354_s20, %s5605_s7 }
 0xfc6   : > { %p3356_p0 = scmp.ne.s32.totalorder %s3354_s20, %s3355_s8  ;;  %p3361_p4 = scmp.lt.s32.totalorder %s3359_s14, %s3355_s8 }
 0xfc8   : > { %p3357_p1 = pnand %p3356_p0, %p3502_p5  ;;  %p3362_p7 = por %p3361_p4, %p3360_p3 }
 0xfca   : > { %p3358_p2 = pneg %p3357_p1 }
 0xfcc   : > { %p3363_p8 = pnand %p3362_p7, %p3358_p2 }
0x1015   : > { %v3088_v21 = vpop.permute.xlu2 %3087 }
0x101d   : > { %v3094_v47 = vpop.permute.xlu2 %3093 }
0x101e   : > { %v3090_v46 = vpop.permute.xlu0 %3089 }
0x102d   : > { %v3086_v35 = vpop.permute.xlu1 %3085 }
0x102e   : > { %v3097_v7 = vsel %vm369_vm3, %v3086_v35, %v3088_v21 }
0x102f   : > { %3103 = vst [vmem:[%s288_s16 - $0x2] sm:$0xfc] %v3097_v7 }
0x1035   : > { %v3092_v41 = vpop.permute.xlu1 %3091 }
0x1036   : > { %v3098_v33 = vsel %vm369_vm3, %v3090_v46, %v3092_v41  ;;  %v3096_v59 = vpop.permute.xlu0 %3095 }
0x1037   : > { %3104 = vst [vmem:[%s288_s16 + $0x6] sm:$0xff] %v3098_v33  ;;  %v3099_v24 = vsel %vm369_vm3, %v3094_v47, %v3096_v59 }
0x1038   : > { %3105 = vst [vmem:[%s288_s16 + $0xe] sm:$0x3] %v3099_v24 }
0x1039   : > { %3366 = shalt.err (!%p3363_p8)
}
0x103a   : > { %s3423_s29 = smov 128  }
0x103b   : > { %3231 = dma.vmem_to_hbm [thread:$0]  (%p3502_p5), %s3120_s9, 256, %s3122_s23, %s3107_s28, %s3423_s29, %s3423_s29, %s3410_s22  }
0x103c PF: > { %p3243_p9 = scmp.ge.s32.totalorder %s3405_s27, 2  ;;  %s3136_s16 = sand.u32 1, %s3393_s24  }
0x103d   : > { %s3137_s17 = scalar_lea.sflag [#allocation5], %s3136_s16 }
0x103e   : > { %p3238_p10 = pnand %p3243_p9, %p3506_p6 }
0x1040   : > { %p3239_p11 = pneg %p3238_p10 }
0x1042   : > { %3388 = dma.done.wait (%p3239_p11), %s3137_s17, 256  }
0x1043   : > { %3390 = vsyncadd (%p3239_p11), %s3137_s17, 4294967040  ;;  %p18_p12 = scmp.ge.s32.totalorder %s3489_s30, 4   ;;  %s5684_s24 = smov %s3397_s25 }
0x1044   : > { %s5685_s25 = smov %s3401_s26  ;;  %s5686_s26 = smov %s3500_s10 }
0x1045   : > { %s5687_s27 = smov %s3489_s30  ;;  %20 = sbr.rel (!%p18_p12) target bundleno = 4 (0x4), region = 88 }
0x104a   :  { %3143 = vsyncpa [#allocation4], 1 }
0x104b   :  { %3145 = vsyncpa [#allocation4 + $0x1], 1 }
0x104c   :  { %3146 = vsyncpa [#allocation5], 1 }
0x104d   :  { %3148 = vsyncpa [#allocation5 + $0x1], 1 }

</bundles_post_ra>
